<compile_context>
chip_gen: v7x
topology: tpu7x:2x2x1
jax: 0.10.0
libtpu: 0.0.40
codegen_flags: <defaults>
</compile_context>

<pallas_src>
import functools
import math

import jax
import jax.numpy as jnp
from jax.experimental import pallas as pl
from jax.experimental.pallas import tpu as pltpu


def _round_up(x, m):
    return (x + m - 1) // m * m


# ------------------------- kernel 1: conv + BN stats ------------------------
def conv_stats_kernel(x_ref, w_ref, m_ref, y_ref, st_ref, *,
                      kh_sz, kw_sz, stride, cin, cout,
                      ho_pad, wo_pad, n_valid):
    """One image per grid step: fused im2col + conv matmul + masked BN stats.

    x_ref : (1, H_pad, W_pad, Cin)    bf16  padded NHWC image
    w_ref : (K, Cpad)                 bf16  (kh, kw, ci)-ordered filter matrix
    m_ref : (P, 1)                    f32   1.0 for valid (ho, wo), 0.0 for pad
    y_ref : (1, Ho_pad, Wo_pad*Cout)  bf16  lane-dense packed conv output
    st_ref: (1, 2, Cpad)              f32   row 0 = per-channel mean, row 1 = M2
    """
    p = ho_pad * wo_pad
    cpad = w_ref.shape[1]

    acc = jnp.zeros((p, cpad), jnp.float32)
    for kh in range(kh_sz):
        for kw in range(kw_sz):
            if stride == 1:
                xs = x_ref[0, kh:kh + ho_pad, kw:kw + wo_pad, :]
            else:
                xs = x_ref[0, pl.ds(kh, ho_pad, stride=stride),
                           pl.ds(kw, wo_pad, stride=stride), :]
            xs = xs.reshape(p, cin)
            wk = w_ref[(kh * kw_sz + kw) * cin:(kh * kw_sz + kw + 1) * cin, :]
            acc = acc + jnp.dot(xs, wk, preferred_element_type=jnp.float32)

    mask = m_ref[...]                                    # (P, 1)
    y_m = acc * mask                                     # padded positions -> 0
    mean = jnp.sum(y_m, axis=0, keepdims=True) * (1.0 / n_valid)   # (1, Cpad)
    d = (acc - mean) * mask
    m2 = jnp.sum(d * d, axis=0, keepdims=True)           # (1, Cpad)
    st_ref[0, 0:1, :] = mean
    st_ref[0, 1:2, :] = m2

    # Pack (wo, cout) into the lane dim of the bf16 HBM intermediate.  The out
    # block stays a dense (Ho_pad, 128k) slab for the HBM DMA; only these small
    # VMEM-local stores are masked.
    y3 = y_m.reshape(ho_pad, wo_pad, cpad)               # leading-dim split only
    for w in range(wo_pad):
        y_ref[0, :, w * cout:(w + 1) * cout] = y3[:, w, :cout].astype(jnp.bfloat16)


# ---------------------- kernel 2: BN apply + ReLU + pool --------------------
def bn_relu_pool_kernel(y_ref, scale_ref, shift_ref, o_ref, *, cout, hp, wp):
    """y_ref: (1, Ho_pad, Wo_pad*Cout) bf16; scale/shift: (1, Wo_pad*Cout) f32;
    o_ref: (1, Hp, Wp, Cout) f32."""
    ho_pad = y_ref.shape[1]
    y = y_ref[0].astype(jnp.float32)                     # f32 math (v5e-safe)
    yn = jnp.maximum(y * scale_ref[...] + shift_ref[...], 0.0)
    # H-direction 2:1 max on the dense 128-lane block (leading-dim split only).
    y3 = yn.reshape(ho_pad // 2, 2, yn.shape[-1])
    hmax = jnp.maximum(y3[:, 0, :], y3[:, 1, :])         # (Ho_pad//2, WC)
    # W-direction 2:1 max: the two parities are adjacent Cout-lane groups.
    for j in range(wp):
        a = hmax[:, (2 * j) * cout:(2 * j + 1) * cout]
        b = hmax[:, (2 * j + 1) * cout:(2 * j + 2) * cout]
        o_ref[0, :, j, :] = jnp.maximum(a, b)[:hp, :]


# ------------------------------ wrapper ------------------------------------
def templet_layer_forward(x_nchw, conv_weight, gamma, beta, *, stride, eps=1e-5):
    """TempletLayer forward: conv(bias=False) -> BN(train stats) -> ReLU -> 2x2 maxpool."""
    N, Cin, H, W = x_nchw.shape
    Cout, _, KH, KW = conv_weight.shape
    Ho = (H - KH) // stride + 1
    Wo = (W - KW) // stride + 1
    Hp, Wp = Ho // 2, Wo // 2
    K = KH * KW * Cin

    # Lane-dense packing: Wo_pad * Cout must be a multiple of 128 (and Wo_pad even).
    lane_mult = 128 // math.gcd(Cout, 128)
    w_mult = lane_mult if lane_mult % 2 == 0 else 2 * lane_mult
    Wo_pad = _round_up(Wo, w_mult)
    Ho_pad = _round_up(Ho, 16)
    WC = Wo_pad * Cout
    Cpad = _round_up(max(Cout, 128), 128)
    P = Ho_pad * Wo_pad

    # Padded NHWC input: one fused transpose+pad+cast pass, read exactly once by kernel 1.
    H_pad = (Ho_pad - 1) * stride + KH
    W_pad = (Wo_pad - 1) * stride + KW
    x_nhwc = jnp.transpose(x_nchw, (0, 2, 3, 1)).astype(jnp.bfloat16)
    x_pad = jnp.pad(x_nhwc, ((0, 0), (0, H_pad - H), (0, W_pad - W), (0, 0)))

    # Filter as (kh, kw, ci) x Cout matrix, zero-padded to 128 output lanes.
    w_mat = jnp.transpose(conv_weight.astype(jnp.float32), (2, 3, 1, 0)).reshape(K, Cout)
    w_mat = jnp.pad(w_mat, ((0, 0), (0, Cpad - Cout))).astype(jnp.bfloat16)

    # Validity mask over padded conv positions (BN stats must ignore the padding).
    mask = ((jnp.arange(Ho_pad) < Ho)[:, None] & (jnp.arange(Wo_pad) < Wo)[None, :])
    mask = mask.astype(jnp.float32).reshape(P, 1)

    cparams = pltpu.CompilerParams(
        dimension_semantics=("parallel",),
        vmem_limit_bytes=48 * 1024 * 1024)   # > v5e/v6e scoped defaults, < v7x 64 MiB/TC

    # --- kernel 1: fused im2col conv matmul + per-image BN partial stats -----
    y_conv, stats = pl.pallas_call(
        functools.partial(conv_stats_kernel, kh_sz=KH, kw_sz=KW, stride=stride,
                          cin=Cin, cout=Cout, ho_pad=Ho_pad, wo_pad=Wo_pad,
                          n_valid=float(Ho * Wo)),
        out_shape=(
            jax.ShapeDtypeStruct((N, Ho_pad, WC), jnp.bfloat16),
            jax.ShapeDtypeStruct((N, 2, Cpad), jnp.float32),
        ),
        grid=(N,),
        in_specs=[
            pl.BlockSpec((1, H_pad, W_pad, Cin), lambda n: (n, 0, 0, 0)),
            pl.BlockSpec((K, Cpad), lambda n: (0, 0)),
            pl.BlockSpec((P, 1), lambda n: (0, 0)),
        ],
        out_specs=(
            pl.BlockSpec((1, Ho_pad, WC), lambda n: (n, 0, 0)),
            pl.BlockSpec((1, 2, Cpad), lambda n: (n, 0, 0)),
        ),
        compiler_params=cparams,
    )(x_pad, w_mat, mask)

    # --- glue: exact (Chan) combination of per-image (mean, M2) -> scale/shift
    mean_n = stats[:, 0, :Cout]                       # (N, Cout)
    m2_n = stats[:, 1, :Cout]
    cnt = float(Ho * Wo)
    mean = jnp.mean(mean_n, axis=0)                   # equal per-image counts
    var = (jnp.sum(m2_n, axis=0)
           + cnt * jnp.sum((mean_n - mean[None, :]) ** 2, axis=0)) / (N * cnt)
    var = jnp.maximum(var, 0.0)                       # biased var (training-mode BN)
    scale = gamma.astype(jnp.float32) * jax.lax.rsqrt(var + eps)
    shift = beta.astype(jnp.float32) - mean * scale
    scale_wc = jnp.tile(scale, Wo_pad).reshape(1, WC)
    shift_wc = jnp.tile(shift, Wo_pad).reshape(1, WC)

    # --- kernel 2: BN apply + ReLU + fused 2x2/stride-2 max pool -------------
    out_nhwc = pl.pallas_call(
        functools.partial(bn_relu_pool_kernel, cout=Cout, hp=Hp, wp=Wp),
        out_shape=jax.ShapeDtypeStruct((N, Hp, Wp, Cout), jnp.float32),
        grid=(N,),
        in_specs=[
            pl.BlockSpec((1, Ho_pad, WC), lambda n: (n, 0, 0)),
            pl.BlockSpec((1, WC), lambda n: (0, 0)),
            pl.BlockSpec((1, WC), lambda n: (0, 0)),
        ],
        out_specs=pl.BlockSpec((1, Hp, Wp, Cout), lambda n: (n, 0, 0, 0)),
        compiler_params=cparams,
    )(y_conv, scale_wc, shift_wc)

    # Tiny epilogue transpose of the pooled output back to NCHW (left to XLA).
    return jnp.transpose(out_nhwc, (0, 3, 1, 2))


def _reference_forward(x, w, gamma, beta, stride, eps):
    y = jax.lax.conv_general_dilated(
        x, w, (stride, stride), "VALID",
        dimension_numbers=("NCHW", "OIHW", "NCHW"),
        precision=jax.lax.Precision.HIGHEST)
    mean = y.mean(axis=(0, 2, 3), keepdims=True)
    var = ((y - mean) ** 2).mean(axis=(0, 2, 3), keepdims=True)
    y = (y - mean) * jax.lax.rsqrt(var + eps)
    y = y * gamma.reshape(1, -1, 1, 1) + beta.reshape(1, -1, 1, 1)
    y = jnp.maximum(y, 0.0)
    n, c, hh, ww = y.shape
    hp, wp = hh // 2, ww // 2
    y = y[:, :, :2 * hp, :2 * wp].reshape(n, c, hp, 2, wp, 2)
    return y.max(axis=(3, 5))


if __name__ == "__main__":
    key = jax.random.PRNGKey(0)
    k_x, k_w = jax.random.split(key)

    # small shapes consistent with TempletLayer(4, 8, kernel=3, stride=1)
    N, Cin, H, W = 2, 4, 16, 16
    Cout, Kk, stride = 8, 3, 1

    x = jax.random.normal(k_x, (N, Cin, H, W), dtype=jnp.float32)
    fan_in = Cin * Kk * Kk
    bound = 1.0 / (fan_in ** 0.5)
    conv_w = jax.random.uniform(k_w, (Cout, Cin, Kk, Kk), jnp.float32, -bound, bound)
    gamma = jnp.linspace(0.8, 1.2, Cout).astype(jnp.float32)
    beta = jnp.linspace(-0.1, 0.1, Cout).astype(jnp.float32)

    fwd = jax.jit(functools.partial(templet_layer_forward, stride=stride))
    out = fwd(x, conv_w, gamma, beta)
    jax.block_until_ready(out)

    assert out.shape == (N, Cout, (H - Kk + 1) // 2, (W - Kk + 1) // 2), out.shape
    assert out.dtype == jnp.float32

    # loose-tolerance check vs a plain-JAX reference (bf16 matmul inputs + bf16
    # conv intermediate vs f32 reference)
    ref = _reference_forward(x, conv_w, gamma, beta, stride, 1e-5)
    assert jnp.allclose(out, ref, atol=5e-2, rtol=5e-2), \
        float(jnp.max(jnp.abs(out - ref)))

    print("KERNEL_OK")
</pallas_src>

<mosaic_0001>
module attributes {stable_mosaic.version = 11 : i64} {
  func.func @conv_stats_kernel(%arg0: i32, %arg1: memref<1x18x18x4xbf16, #tpu.memory_space<vmem>>, %arg2: memref<36x128xbf16, #tpu.memory_space<vmem>>, %arg3: memref<256x1xf32, #tpu.memory_space<vmem>>, %arg4: memref<1x16x128xbf16, #tpu.memory_space<vmem>>, %arg5: memref<1x2x128xf32, #tpu.memory_space<vmem>>) attributes {dimension_semantics = [#tpu.dimension_semantics<parallel>], iteration_bounds = array<i64: 2>, scalar_prefetch = 0 : i64, scratch_operands = 0 : i64, tpu.core_type = #tpu.core_type<tc>, window_params = [{transform_indices = @transform_0, window_bounds = array<i64: 1, 18, 18, 4>}, {pipeline_mode = #tpu.pipeline_mode<synchronous>, transform_indices = @transform_1, window_bounds = array<i64: 36, 128>}, {pipeline_mode = #tpu.pipeline_mode<synchronous>, transform_indices = @transform_2, window_bounds = array<i64: 256, 1>}, {transform_indices = @transform_3, window_bounds = array<i64: 1, 16, 128>}, {transform_indices = @transform_4, window_bounds = array<i64: 1, 2, 128>}]} {
    %cst = arith.constant 0.000000e+00 : f32
    %0 = vector.broadcast %cst : f32 to vector<256x128xf32>
    %c0 = arith.constant 0 : index
    %c0_0 = arith.constant 0 : index
    %c0_1 = arith.constant 0 : index
    %c0_2 = arith.constant 0 : index
    %1 = vector.load %arg1[%c0, %c0_0, %c0_1, %c0_2] : memref<1x18x18x4xbf16, #tpu.memory_space<vmem>>, vector<1x16x16x4xbf16>
    %2 = vector.shape_cast %1 : vector<1x16x16x4xbf16> to vector<16x16x4xbf16>
    %3 = vector.shape_cast %2 : vector<16x16x4xbf16> to vector<256x4xbf16>
    %c0_3 = arith.constant 0 : index
    %c0_4 = arith.constant 0 : index
    %4 = vector.load %arg2[%c0_3, %c0_4] : memref<36x128xbf16, #tpu.memory_space<vmem>>, vector<4x128xbf16>
    %cst_5 = arith.constant dense<0.000000e+00> : vector<256x128xf32>
    %5 = tpu.matmul %3, %4, %cst_5 {dimension_numbers = #tpu.dot_dimension_numbers<[1], [0], [0], [1], [0, 0, 1, 1], [], []>} : vector<256x4xbf16>, vector<4x128xbf16>, vector<256x128xf32> -> vector<256x128xf32>
    %6 = arith.addf %0, %5 : vector<256x128xf32>
    %c0_6 = arith.constant 0 : index
    %c0_7 = arith.constant 0 : index
    %c1 = arith.constant 1 : index
    %c0_8 = arith.constant 0 : index
    %7 = vector.load %arg1[%c0_6, %c0_7, %c1, %c0_8] : memref<1x18x18x4xbf16, #tpu.memory_space<vmem>>, vector<1x16x16x4xbf16>
    %8 = vector.shape_cast %7 : vector<1x16x16x4xbf16> to vector<16x16x4xbf16>
    %9 = vector.shape_cast %8 : vector<16x16x4xbf16> to vector<256x4xbf16>
    %c4 = arith.constant 4 : index
    %c0_9 = arith.constant 0 : index
    %10 = vector.load %arg2[%c4, %c0_9] : memref<36x128xbf16, #tpu.memory_space<vmem>>, vector<4x128xbf16>
    %cst_10 = arith.constant dense<0.000000e+00> : vector<256x128xf32>
    %11 = tpu.matmul %9, %10, %cst_10 {dimension_numbers = #tpu.dot_dimension_numbers<[1], [0], [0], [1], [0, 0, 1, 1], [], []>} : vector<256x4xbf16>, vector<4x128xbf16>, vector<256x128xf32> -> vector<256x128xf32>
    %12 = arith.addf %6, %11 : vector<256x128xf32>
    %c0_11 = arith.constant 0 : index
    %c0_12 = arith.constant 0 : index
    %c2 = arith.constant 2 : index
    %c0_13 = arith.constant 0 : index
    %13 = vector.load %arg1[%c0_11, %c0_12, %c2, %c0_13] : memref<1x18x18x4xbf16, #tpu.memory_space<vmem>>, vector<1x16x16x4xbf16>
    %14 = vector.shape_cast %13 : vector<1x16x16x4xbf16> to vector<16x16x4xbf16>
    %15 = vector.shape_cast %14 : vector<16x16x4xbf16> to vector<256x4xbf16>
    %c8 = arith.constant 8 : index
    %c0_14 = arith.constant 0 : index
    %16 = vector.load %arg2[%c8, %c0_14] : memref<36x128xbf16, #tpu.memory_space<vmem>>, vector<4x128xbf16>
    %cst_15 = arith.constant dense<0.000000e+00> : vector<256x128xf32>
    %17 = tpu.matmul %15, %16, %cst_15 {dimension_numbers = #tpu.dot_dimension_numbers<[1], [0], [0], [1], [0, 0, 1, 1], [], []>} : vector<256x4xbf16>, vector<4x128xbf16>, vector<256x128xf32> -> vector<256x128xf32>
    %18 = arith.addf %12, %17 : vector<256x128xf32>
    %c0_16 = arith.constant 0 : index
    %c1_17 = arith.constant 1 : index
    %c0_18 = arith.constant 0 : index
    %c0_19 = arith.constant 0 : index
    %19 = vector.load %arg1[%c0_16, %c1_17, %c0_18, %c0_19] : memref<1x18x18x4xbf16, #tpu.memory_space<vmem>>, vector<1x16x16x4xbf16>
    %20 = vector.shape_cast %19 : vector<1x16x16x4xbf16> to vector<16x16x4xbf16>
    %21 = vector.shape_cast %20 : vector<16x16x4xbf16> to vector<256x4xbf16>
    %c12 = arith.constant 12 : index
    %c0_20 = arith.constant 0 : index
    %22 = vector.load %arg2[%c12, %c0_20] : memref<36x128xbf16, #tpu.memory_space<vmem>>, vector<4x128xbf16>
    %cst_21 = arith.constant dense<0.000000e+00> : vector<256x128xf32>
    %23 = tpu.matmul %21, %22, %cst_21 {dimension_numbers = #tpu.dot_dimension_numbers<[1], [0], [0], [1], [0, 0, 1, 1], [], []>} : vector<256x4xbf16>, vector<4x128xbf16>, vector<256x128xf32> -> vector<256x128xf32>
    %24 = arith.addf %18, %23 : vector<256x128xf32>
    %c0_22 = arith.constant 0 : index
    %c1_23 = arith.constant 1 : index
    %c1_24 = arith.constant 1 : index
    %c0_25 = arith.constant 0 : index
    %25 = vector.load %arg1[%c0_22, %c1_23, %c1_24, %c0_25] : memref<1x18x18x4xbf16, #tpu.memory_space<vmem>>, vector<1x16x16x4xbf16>
    %26 = vector.shape_cast %25 : vector<1x16x16x4xbf16> to vector<16x16x4xbf16>
    %27 = vector.shape_cast %26 : vector<16x16x4xbf16> to vector<256x4xbf16>
    %c16 = arith.constant 16 : index
    %c0_26 = arith.constant 0 : index
    %28 = vector.load %arg2[%c16, %c0_26] : memref<36x128xbf16, #tpu.memory_space<vmem>>, vector<4x128xbf16>
    %cst_27 = arith.constant dense<0.000000e+00> : vector<256x128xf32>
    %29 = tpu.matmul %27, %28, %cst_27 {dimension_numbers = #tpu.dot_dimension_numbers<[1], [0], [0], [1], [0, 0, 1, 1], [], []>} : vector<256x4xbf16>, vector<4x128xbf16>, vector<256x128xf32> -> vector<256x128xf32>
    %30 = arith.addf %24, %29 : vector<256x128xf32>
    %c0_28 = arith.constant 0 : index
    %c1_29 = arith.constant 1 : index
    %c2_30 = arith.constant 2 : index
    %c0_31 = arith.constant 0 : index
    %31 = vector.load %arg1[%c0_28, %c1_29, %c2_30, %c0_31] : memref<1x18x18x4xbf16, #tpu.memory_space<vmem>>, vector<1x16x16x4xbf16>
    %32 = vector.shape_cast %31 : vector<1x16x16x4xbf16> to vector<16x16x4xbf16>
    %33 = vector.shape_cast %32 : vector<16x16x4xbf16> to vector<256x4xbf16>
    %c20 = arith.constant 20 : index
    %c0_32 = arith.constant 0 : index
    %34 = vector.load %arg2[%c20, %c0_32] : memref<36x128xbf16, #tpu.memory_space<vmem>>, vector<4x128xbf16>
    %cst_33 = arith.constant dense<0.000000e+00> : vector<256x128xf32>
    %35 = tpu.matmul %33, %34, %cst_33 {dimension_numbers = #tpu.dot_dimension_numbers<[1], [0], [0], [1], [0, 0, 1, 1], [], []>} : vector<256x4xbf16>, vector<4x128xbf16>, vector<256x128xf32> -> vector<256x128xf32>
    %36 = arith.addf %30, %35 : vector<256x128xf32>
    %c0_34 = arith.constant 0 : index
    %c2_35 = arith.constant 2 : index
    %c0_36 = arith.constant 0 : index
    %c0_37 = arith.constant 0 : index
    %37 = vector.load %arg1[%c0_34, %c2_35, %c0_36, %c0_37] : memref<1x18x18x4xbf16, #tpu.memory_space<vmem>>, vector<1x16x16x4xbf16>
    %38 = vector.shape_cast %37 : vector<1x16x16x4xbf16> to vector<16x16x4xbf16>
    %39 = vector.shape_cast %38 : vector<16x16x4xbf16> to vector<256x4xbf16>
    %c24 = arith.constant 24 : index
    %c0_38 = arith.constant 0 : index
    %40 = vector.load %arg2[%c24, %c0_38] : memref<36x128xbf16, #tpu.memory_space<vmem>>, vector<4x128xbf16>
    %cst_39 = arith.constant dense<0.000000e+00> : vector<256x128xf32>
    %41 = tpu.matmul %39, %40, %cst_39 {dimension_numbers = #tpu.dot_dimension_numbers<[1], [0], [0], [1], [0, 0, 1, 1], [], []>} : vector<256x4xbf16>, vector<4x128xbf16>, vector<256x128xf32> -> vector<256x128xf32>
    %42 = arith.addf %36, %41 : vector<256x128xf32>
    %c0_40 = arith.constant 0 : index
    %c2_41 = arith.constant 2 : index
    %c1_42 = arith.constant 1 : index
    %c0_43 = arith.constant 0 : index
    %43 = vector.load %arg1[%c0_40, %c2_41, %c1_42, %c0_43] : memref<1x18x18x4xbf16, #tpu.memory_space<vmem>>, vector<1x16x16x4xbf16>
    %44 = vector.shape_cast %43 : vector<1x16x16x4xbf16> to vector<16x16x4xbf16>
    %45 = vector.shape_cast %44 : vector<16x16x4xbf16> to vector<256x4xbf16>
    %c28 = arith.constant 28 : index
    %c0_44 = arith.constant 0 : index
    %46 = vector.load %arg2[%c28, %c0_44] : memref<36x128xbf16, #tpu.memory_space<vmem>>, vector<4x128xbf16>
    %cst_45 = arith.constant dense<0.000000e+00> : vector<256x128xf32>
    %47 = tpu.matmul %45, %46, %cst_45 {dimension_numbers = #tpu.dot_dimension_numbers<[1], [0], [0], [1], [0, 0, 1, 1], [], []>} : vector<256x4xbf16>, vector<4x128xbf16>, vector<256x128xf32> -> vector<256x128xf32>
    %48 = arith.addf %42, %47 : vector<256x128xf32>
    %c0_46 = arith.constant 0 : index
    %c2_47 = arith.constant 2 : index
    %c2_48 = arith.constant 2 : index
    %c0_49 = arith.constant 0 : index
    %49 = vector.load %arg1[%c0_46, %c2_47, %c2_48, %c0_49] : memref<1x18x18x4xbf16, #tpu.memory_space<vmem>>, vector<1x16x16x4xbf16>
    %50 = vector.shape_cast %49 : vector<1x16x16x4xbf16> to vector<16x16x4xbf16>
    %51 = vector.shape_cast %50 : vector<16x16x4xbf16> to vector<256x4xbf16>
    %c32 = arith.constant 32 : index
    %c0_50 = arith.constant 0 : index
    %52 = vector.load %arg2[%c32, %c0_50] : memref<36x128xbf16, #tpu.memory_space<vmem>>, vector<4x128xbf16>
    %cst_51 = arith.constant dense<0.000000e+00> : vector<256x128xf32>
    %53 = tpu.matmul %51, %52, %cst_51 {dimension_numbers = #tpu.dot_dimension_numbers<[1], [0], [0], [1], [0, 0, 1, 1], [], []>} : vector<256x4xbf16>, vector<4x128xbf16>, vector<256x128xf32> -> vector<256x128xf32>
    %54 = arith.addf %48, %53 : vector<256x128xf32>
    %c0_52 = arith.constant 0 : index
    %c0_53 = arith.constant 0 : index
    %55 = vector.load %arg3[%c0_52, %c0_53] : memref<256x1xf32, #tpu.memory_space<vmem>>, vector<256x1xf32>
    %56 = vector.broadcast %55 : vector<256x1xf32> to vector<256x128xf32>
    %57 = arith.mulf %54, %56 : vector<256x128xf32>
    %cst_54 = arith.constant dense<0.000000e+00> : vector<128xf32>
    %58 = vector.multi_reduction <add>, %57, %cst_54 [0] : vector<256x128xf32> to vector<128xf32>
    %59 = vector.shape_cast %58 : vector<128xf32> to vector<1x128xf32>
    %cst_55 = arith.constant 0.00510204071 : f32
    %60 = vector.broadcast %cst_55 : f32 to vector<1x128xf32>
    %61 = arith.mulf %59, %60 : vector<1x128xf32>
    %62 = vector.broadcast %61 : vector<1x128xf32> to vector<256x128xf32>
    %63 = arith.subf %54, %62 : vector<256x128xf32>
    %64 = vector.broadcast %55 : vector<256x1xf32> to vector<256x128xf32>
    %65 = arith.mulf %63, %64 : vector<256x128xf32>
    %66 = arith.mulf %65, %65 : vector<256x128xf32>
    %cst_56 = arith.constant dense<0.000000e+00> : vector<128xf32>
    %67 = vector.multi_reduction <add>, %66, %cst_56 [0] : vector<256x128xf32> to vector<128xf32>
    %68 = vector.shape_cast %67 : vector<128xf32> to vector<1x128xf32>
    %c0_57 = arith.constant 0 : index
    %c0_58 = arith.constant 0 : index
    %c0_59 = arith.constant 0 : index
    %69 = vector.load %arg5[%c0_57, %c0_58, %c0_59] : memref<1x2x128xf32, #tpu.memory_space<vmem>>, vector<1x1x128xf32>
    %70 = vector.shape_cast %69 : vector<1x1x128xf32> to vector<1x128xf32>
    %71 = vector.shape_cast %61 : vector<1x128xf32> to vector<1x1x128xf32>
    tpu.vector_store %arg5[%c0_57, %c0_58, %c0_59], %71 {strides = array<i32>} : memref<1x2x128xf32, #tpu.memory_space<vmem>>, vector<1x1x128xf32>,
    %c0_60 = arith.constant 0 : index
    %c1_61 = arith.constant 1 : index
    %c0_62 = arith.constant 0 : index
    %72 = vector.load %arg5[%c0_60, %c1_61, %c0_62] : memref<1x2x128xf32, #tpu.memory_space<vmem>>, vector<1x1x128xf32>
    %73 = vector.shape_cast %72 : vector<1x1x128xf32> to vector<1x128xf32>
    %74 = vector.shape_cast %68 : vector<1x128xf32> to vector<1x1x128xf32>
    tpu.vector_store %arg5[%c0_60, %c1_61, %c0_62], %74 {strides = array<i32>} : memref<1x2x128xf32, #tpu.memory_space<vmem>>, vector<1x1x128xf32>,
    %75 = vector.shape_cast %57 : vector<256x128xf32> to vector<16x16x128xf32>
    %76 = vector.extract_strided_slice %75 {offsets = [0, 0, 0], sizes = [16, 1, 8], strides = [1, 1, 1]} : vector<16x16x128xf32> to vector<16x1x8xf32>
    %77 = vector.shape_cast %76 : vector<16x1x8xf32> to vector<16x8xf32>
    %78 = arith.truncf %77 : vector<16x8xf32> to vector<16x8xbf16>
    %c0_63 = arith.constant 0 : index
    %c0_64 = arith.constant 0 : index
    %c0_65 = arith.constant 0 : index
    %79 = vector.load %arg4[%c0_63, %c0_64, %c0_65] : memref<1x16x128xbf16, #tpu.memory_space<vmem>>, vector<1x16x8xbf16>
    %80 = vector.shape_cast %79 : vector<1x16x8xbf16> to vector<16x8xbf16>
    %81 = vector.shape_cast %78 : vector<16x8xbf16> to vector<1x16x8xbf16>
    tpu.vector_store %arg4[%c0_63, %c0_64, %c0_65], %81 {strides = array<i32>} : memref<1x16x128xbf16, #tpu.memory_space<vmem>>, vector<1x16x8xbf16>,
    %82 = vector.extract_strided_slice %75 {offsets = [0, 1, 0], sizes = [16, 1, 8], strides = [1, 1, 1]} : vector<16x16x128xf32> to vector<16x1x8xf32>
    %83 = vector.shape_cast %82 : vector<16x1x8xf32> to vector<16x8xf32>
    %84 = arith.truncf %83 : vector<16x8xf32> to vector<16x8xbf16>
    %c0_66 = arith.constant 0 : index
    %c0_67 = arith.constant 0 : index
    %c8_68 = arith.constant 8 : index
    %85 = vector.load %arg4[%c0_66, %c0_67, %c8_68] : memref<1x16x128xbf16, #tpu.memory_space<vmem>>, vector<1x16x8xbf16>
    %86 = vector.shape_cast %85 : vector<1x16x8xbf16> to vector<16x8xbf16>
    %87 = vector.shape_cast %84 : vector<16x8xbf16> to vector<1x16x8xbf16>
    tpu.vector_store %arg4[%c0_66, %c0_67, %c8_68], %87 {strides = array<i32>} : memref<1x16x128xbf16, #tpu.memory_space<vmem>>, vector<1x16x8xbf16>,
    %88 = vector.extract_strided_slice %75 {offsets = [0, 2, 0], sizes = [16, 1, 8], strides = [1, 1, 1]} : vector<16x16x128xf32> to vector<16x1x8xf32>
    %89 = vector.shape_cast %88 : vector<16x1x8xf32> to vector<16x8xf32>
    %90 = arith.truncf %89 : vector<16x8xf32> to vector<16x8xbf16>
    %c0_69 = arith.constant 0 : index
    %c0_70 = arith.constant 0 : index
    %c16_71 = arith.constant 16 : index
    %91 = vector.load %arg4[%c0_69, %c0_70, %c16_71] : memref<1x16x128xbf16, #tpu.memory_space<vmem>>, vector<1x16x8xbf16>
    %92 = vector.shape_cast %91 : vector<1x16x8xbf16> to vector<16x8xbf16>
    %93 = vector.shape_cast %90 : vector<16x8xbf16> to vector<1x16x8xbf16>
    tpu.vector_store %arg4[%c0_69, %c0_70, %c16_71], %93 {strides = array<i32>} : memref<1x16x128xbf16, #tpu.memory_space<vmem>>, vector<1x16x8xbf16>,
    %94 = vector.extract_strided_slice %75 {offsets = [0, 3, 0], sizes = [16, 1, 8], strides = [1, 1, 1]} : vector<16x16x128xf32> to vector<16x1x8xf32>
    %95 = vector.shape_cast %94 : vector<16x1x8xf32> to vector<16x8xf32>
    %96 = arith.truncf %95 : vector<16x8xf32> to vector<16x8xbf16>
    %c0_72 = arith.constant 0 : index
    %c0_73 = arith.constant 0 : index
    %c24_74 = arith.constant 24 : index
    %97 = vector.load %arg4[%c0_72, %c0_73, %c24_74] : memref<1x16x128xbf16, #tpu.memory_space<vmem>>, vector<1x16x8xbf16>
    %98 = vector.shape_cast %97 : vector<1x16x8xbf16> to vector<16x8xbf16>
    %99 = vector.shape_cast %96 : vector<16x8xbf16> to vector<1x16x8xbf16>
    tpu.vector_store %arg4[%c0_72, %c0_73, %c24_74], %99 {strides = array<i32>} : memref<1x16x128xbf16, #tpu.memory_space<vmem>>, vector<1x16x8xbf16>,
    %100 = vector.extract_strided_slice %75 {offsets = [0, 4, 0], sizes = [16, 1, 8], strides = [1, 1, 1]} : vector<16x16x128xf32> to vector<16x1x8xf32>
    %101 = vector.shape_cast %100 : vector<16x1x8xf32> to vector<16x8xf32>
    %102 = arith.truncf %101 : vector<16x8xf32> to vector<16x8xbf16>
    %c0_75 = arith.constant 0 : index
    %c0_76 = arith.constant 0 : index
    %c32_77 = arith.constant 32 : index
    %103 = vector.load %arg4[%c0_75, %c0_76, %c32_77] : memref<1x16x128xbf16, #tpu.memory_space<vmem>>, vector<1x16x8xbf16>
    %104 = vector.shape_cast %103 : vector<1x16x8xbf16> to vector<16x8xbf16>
    %105 = vector.shape_cast %102 : vector<16x8xbf16> to vector<1x16x8xbf16>
    tpu.vector_store %arg4[%c0_75, %c0_76, %c32_77], %105 {strides = array<i32>} : memref<1x16x128xbf16, #tpu.memory_space<vmem>>, vector<1x16x8xbf16>,
    %106 = vector.extract_strided_slice %75 {offsets = [0, 5, 0], sizes = [16, 1, 8], strides = [1, 1, 1]} : vector<16x16x128xf32> to vector<16x1x8xf32>
    %107 = vector.shape_cast %106 : vector<16x1x8xf32> to vector<16x8xf32>
    %108 = arith.truncf %107 : vector<16x8xf32> to vector<16x8xbf16>
    %c0_78 = arith.constant 0 : index
    %c0_79 = arith.constant 0 : index
    %c40 = arith.constant 40 : index
    %109 = vector.load %arg4[%c0_78, %c0_79, %c40] : memref<1x16x128xbf16, #tpu.memory_space<vmem>>, vector<1x16x8xbf16>
    %110 = vector.shape_cast %109 : vector<1x16x8xbf16> to vector<16x8xbf16>
    %111 = vector.shape_cast %108 : vector<16x8xbf16> to vector<1x16x8xbf16>
    tpu.vector_store %arg4[%c0_78, %c0_79, %c40], %111 {strides = array<i32>} : memref<1x16x128xbf16, #tpu.memory_space<vmem>>, vector<1x16x8xbf16>,
    %112 = vector.extract_strided_slice %75 {offsets = [0, 6, 0], sizes = [16, 1, 8], strides = [1, 1, 1]} : vector<16x16x128xf32> to vector<16x1x8xf32>
    %113 = vector.shape_cast %112 : vector<16x1x8xf32> to vector<16x8xf32>
    %114 = arith.truncf %113 : vector<16x8xf32> to vector<16x8xbf16>
    %c0_80 = arith.constant 0 : index
    %c0_81 = arith.constant 0 : index
    %c48 = arith.constant 48 : index
    %115 = vector.load %arg4[%c0_80, %c0_81, %c48] : memref<1x16x128xbf16, #tpu.memory_space<vmem>>, vector<1x16x8xbf16>
    %116 = vector.shape_cast %115 : vector<1x16x8xbf16> to vector<16x8xbf16>
    %117 = vector.shape_cast %114 : vector<16x8xbf16> to vector<1x16x8xbf16>
    tpu.vector_store %arg4[%c0_80, %c0_81, %c48], %117 {strides = array<i32>} : memref<1x16x128xbf16, #tpu.memory_space<vmem>>, vector<1x16x8xbf16>,
    %118 = vector.extract_strided_slice %75 {offsets = [0, 7, 0], sizes = [16, 1, 8], strides = [1, 1, 1]} : vector<16x16x128xf32> to vector<16x1x8xf32>
    %119 = vector.shape_cast %118 : vector<16x1x8xf32> to vector<16x8xf32>
    %120 = arith.truncf %119 : vector<16x8xf32> to vector<16x8xbf16>
    %c0_82 = arith.constant 0 : index
    %c0_83 = arith.constant 0 : index
    %c56 = arith.constant 56 : index
    %121 = vector.load %arg4[%c0_82, %c0_83, %c56] : memref<1x16x128xbf16, #tpu.memory_space<vmem>>, vector<1x16x8xbf16>
    %122 = vector.shape_cast %121 : vector<1x16x8xbf16> to vector<16x8xbf16>
    %123 = vector.shape_cast %120 : vector<16x8xbf16> to vector<1x16x8xbf16>
    tpu.vector_store %arg4[%c0_82, %c0_83, %c56], %123 {strides = array<i32>} : memref<1x16x128xbf16, #tpu.memory_space<vmem>>, vector<1x16x8xbf16>,
    %124 = vector.extract_strided_slice %75 {offsets = [0, 8, 0], sizes = [16, 1, 8], strides = [1, 1, 1]} : vector<16x16x128xf32> to vector<16x1x8xf32>
    %125 = vector.shape_cast %124 : vector<16x1x8xf32> to vector<16x8xf32>
    %126 = arith.truncf %125 : vector<16x8xf32> to vector<16x8xbf16>
    %c0_84 = arith.constant 0 : index
    %c0_85 = arith.constant 0 : index
    %c64 = arith.constant 64 : index
    %127 = vector.load %arg4[%c0_84, %c0_85, %c64] : memref<1x16x128xbf16, #tpu.memory_space<vmem>>, vector<1x16x8xbf16>
    %128 = vector.shape_cast %127 : vector<1x16x8xbf16> to vector<16x8xbf16>
    %129 = vector.shape_cast %126 : vector<16x8xbf16> to vector<1x16x8xbf16>
    tpu.vector_store %arg4[%c0_84, %c0_85, %c64], %129 {strides = array<i32>} : memref<1x16x128xbf16, #tpu.memory_space<vmem>>, vector<1x16x8xbf16>,
    %130 = vector.extract_strided_slice %75 {offsets = [0, 9, 0], sizes = [16, 1, 8], strides = [1, 1, 1]} : vector<16x16x128xf32> to vector<16x1x8xf32>
    %131 = vector.shape_cast %130 : vector<16x1x8xf32> to vector<16x8xf32>
    %132 = arith.truncf %131 : vector<16x8xf32> to vector<16x8xbf16>
    %c0_86 = arith.constant 0 : index
    %c0_87 = arith.constant 0 : index
    %c72 = arith.constant 72 : index
    %133 = vector.load %arg4[%c0_86, %c0_87, %c72] : memref<1x16x128xbf16, #tpu.memory_space<vmem>>, vector<1x16x8xbf16>
    %134 = vector.shape_cast %133 : vector<1x16x8xbf16> to vector<16x8xbf16>
    %135 = vector.shape_cast %132 : vector<16x8xbf16> to vector<1x16x8xbf16>
    tpu.vector_store %arg4[%c0_86, %c0_87, %c72], %135 {strides = array<i32>} : memref<1x16x128xbf16, #tpu.memory_space<vmem>>, vector<1x16x8xbf16>,
    %136 = vector.extract_strided_slice %75 {offsets = [0, 10, 0], sizes = [16, 1, 8], strides = [1, 1, 1]} : vector<16x16x128xf32> to vector<16x1x8xf32>
    %137 = vector.shape_cast %136 : vector<16x1x8xf32> to vector<16x8xf32>
    %138 = arith.truncf %137 : vector<16x8xf32> to vector<16x8xbf16>
    %c0_88 = arith.constant 0 : index
    %c0_89 = arith.constant 0 : index
    %c80 = arith.constant 80 : index
    %139 = vector.load %arg4[%c0_88, %c0_89, %c80] : memref<1x16x128xbf16, #tpu.memory_space<vmem>>, vector<1x16x8xbf16>
    %140 = vector.shape_cast %139 : vector<1x16x8xbf16> to vector<16x8xbf16>
    %141 = vector.shape_cast %138 : vector<16x8xbf16> to vector<1x16x8xbf16>
    tpu.vector_store %arg4[%c0_88, %c0_89, %c80], %141 {strides = array<i32>} : memref<1x16x128xbf16, #tpu.memory_space<vmem>>, vector<1x16x8xbf16>,
    %142 = vector.extract_strided_slice %75 {offsets = [0, 11, 0], sizes = [16, 1, 8], strides = [1, 1, 1]} : vector<16x16x128xf32> to vector<16x1x8xf32>
    %143 = vector.shape_cast %142 : vector<16x1x8xf32> to vector<16x8xf32>
    %144 = arith.truncf %143 : vector<16x8xf32> to vector<16x8xbf16>
    %c0_90 = arith.constant 0 : index
    %c0_91 = arith.constant 0 : index
    %c88 = arith.constant 88 : index
    %145 = vector.load %arg4[%c0_90, %c0_91, %c88] : memref<1x16x128xbf16, #tpu.memory_space<vmem>>, vector<1x16x8xbf16>
    %146 = vector.shape_cast %145 : vector<1x16x8xbf16> to vector<16x8xbf16>
    %147 = vector.shape_cast %144 : vector<16x8xbf16> to vector<1x16x8xbf16>
    tpu.vector_store %arg4[%c0_90, %c0_91, %c88], %147 {strides = array<i32>} : memref<1x16x128xbf16, #tpu.memory_space<vmem>>, vector<1x16x8xbf16>,
    %148 = vector.extract_strided_slice %75 {offsets = [0, 12, 0], sizes = [16, 1, 8], strides = [1, 1, 1]} : vector<16x16x128xf32> to vector<16x1x8xf32>
    %149 = vector.shape_cast %148 : vector<16x1x8xf32> to vector<16x8xf32>
    %150 = arith.truncf %149 : vector<16x8xf32> to vector<16x8xbf16>
    %c0_92 = arith.constant 0 : index
    %c0_93 = arith.constant 0 : index
    %c96 = arith.constant 96 : index
    %151 = vector.load %arg4[%c0_92, %c0_93, %c96] : memref<1x16x128xbf16, #tpu.memory_space<vmem>>, vector<1x16x8xbf16>
    %152 = vector.shape_cast %151 : vector<1x16x8xbf16> to vector<16x8xbf16>
    %153 = vector.shape_cast %150 : vector<16x8xbf16> to vector<1x16x8xbf16>
    tpu.vector_store %arg4[%c0_92, %c0_93, %c96], %153 {strides = array<i32>} : memref<1x16x128xbf16, #tpu.memory_space<vmem>>, vector<1x16x8xbf16>,
    %154 = vector.extract_strided_slice %75 {offsets = [0, 13, 0], sizes = [16, 1, 8], strides = [1, 1, 1]} : vector<16x16x128xf32> to vector<16x1x8xf32>
    %155 = vector.shape_cast %154 : vector<16x1x8xf32> to vector<16x8xf32>
    %156 = arith.truncf %155 : vector<16x8xf32> to vector<16x8xbf16>
    %c0_94 = arith.constant 0 : index
    %c0_95 = arith.constant 0 : index
    %c104 = arith.constant 104 : index
    %157 = vector.load %arg4[%c0_94, %c0_95, %c104] : memref<1x16x128xbf16, #tpu.memory_space<vmem>>, vector<1x16x8xbf16>
    %158 = vector.shape_cast %157 : vector<1x16x8xbf16> to vector<16x8xbf16>
    %159 = vector.shape_cast %156 : vector<16x8xbf16> to vector<1x16x8xbf16>
    tpu.vector_store %arg4[%c0_94, %c0_95, %c104], %159 {strides = array<i32>} : memref<1x16x128xbf16, #tpu.memory_space<vmem>>, vector<1x16x8xbf16>,
    %160 = vector.extract_strided_slice %75 {offsets = [0, 14, 0], sizes = [16, 1, 8], strides = [1, 1, 1]} : vector<16x16x128xf32> to vector<16x1x8xf32>
    %161 = vector.shape_cast %160 : vector<16x1x8xf32> to vector<16x8xf32>
    %162 = arith.truncf %161 : vector<16x8xf32> to vector<16x8xbf16>
    %c0_96 = arith.constant 0 : index
    %c0_97 = arith.constant 0 : index
    %c112 = arith.constant 112 : index
    %163 = vector.load %arg4[%c0_96, %c0_97, %c112] : memref<1x16x128xbf16, #tpu.memory_space<vmem>>, vector<1x16x8xbf16>
    %164 = vector.shape_cast %163 : vector<1x16x8xbf16> to vector<16x8xbf16>
    %165 = vector.shape_cast %162 : vector<16x8xbf16> to vector<1x16x8xbf16>
    tpu.vector_store %arg4[%c0_96, %c0_97, %c112], %165 {strides = array<i32>} : memref<1x16x128xbf16, #tpu.memory_space<vmem>>, vector<1x16x8xbf16>,
    %166 = vector.extract_strided_slice %75 {offsets = [0, 15, 0], sizes = [16, 1, 8], strides = [1, 1, 1]} : vector<16x16x128xf32> to vector<16x1x8xf32>
    %167 = vector.shape_cast %166 : vector<16x1x8xf32> to vector<16x8xf32>
    %168 = arith.truncf %167 : vector<16x8xf32> to vector<16x8xbf16>
    %c0_98 = arith.constant 0 : index
    %c0_99 = arith.constant 0 : index
    %c120 = arith.constant 120 : index
    %169 = vector.load %arg4[%c0_98, %c0_99, %c120] : memref<1x16x128xbf16, #tpu.memory_space<vmem>>, vector<1x16x8xbf16>
    %170 = vector.shape_cast %169 : vector<1x16x8xbf16> to vector<16x8xbf16>
    %171 = vector.shape_cast %168 : vector<16x8xbf16> to vector<1x16x8xbf16>
    tpu.vector_store %arg4[%c0_98, %c0_99, %c120], %171 {strides = array<i32>} : memref<1x16x128xbf16, #tpu.memory_space<vmem>>, vector<1x16x8xbf16>,
    return
  }
  func.func @transform_0(%arg0: i32) -> (i32, i32, i32, i32) {
    %c0_i32 = arith.constant 0 : i32
    %c0_i32_0 = arith.constant 0 : i32
    %c0_i32_1 = arith.constant 0 : i32
    %c0_i32_2 = arith.constant 0 : i32
    return %arg0, %c0_i32, %c0_i32_0, %c0_i32_1 : i32, i32, i32, i32
  }
  func.func @transform_1(%arg0: i32) -> (i32, i32) {
    %c0_i32 = arith.constant 0 : i32
    %c0_i32_0 = arith.constant 0 : i32
    %c0_i32_1 = arith.constant 0 : i32
    return %c0_i32, %c0_i32_0 : i32, i32
  }
  func.func @transform_2(%arg0: i32) -> (i32, i32) {
    %c0_i32 = arith.constant 0 : i32
    %c0_i32_0 = arith.constant 0 : i32
    %c0_i32_1 = arith.constant 0 : i32
    return %c0_i32, %c0_i32_0 : i32, i32
  }
  func.func @transform_3(%arg0: i32) -> (i32, i32, i32) {
    %c0_i32 = arith.constant 0 : i32
    %c0_i32_0 = arith.constant 0 : i32
    %c0_i32_1 = arith.constant 0 : i32
    return %arg0, %c0_i32, %c0_i32_0 : i32, i32, i32
  }
  func.func @transform_4(%arg0: i32) -> (i32, i32, i32) {
    %c0_i32 = arith.constant 0 : i32
    %c0_i32_0 = arith.constant 0 : i32
    %c0_i32_1 = arith.constant 0 : i32
    return %arg0, %c0_i32, %c0_i32_0 : i32, i32, i32
  }
}

module attributes {stable_mosaic.version = 11 : i64} {
  func.func @bn_relu_pool_kernel(%arg0: i32, %arg1: memref<1x16x128xbf16, #tpu.memory_space<vmem>>, %arg2: memref<1x128xf32, #tpu.memory_space<vmem>>, %arg3: memref<1x128xf32, #tpu.memory_space<vmem>>, %arg4: memref<1x7x7x8xf32, #tpu.memory_space<vmem>>) attributes {dimension_semantics = [#tpu.dimension_semantics<parallel>], iteration_bounds = array<i64: 2>, scalar_prefetch = 0 : i64, scratch_operands = 0 : i64, tpu.core_type = #tpu.core_type<tc>, window_params = [{transform_indices = @transform_0, window_bounds = array<i64: 1, 16, 128>}, {pipeline_mode = #tpu.pipeline_mode<synchronous>, transform_indices = @transform_1, window_bounds = array<i64: 1, 128>}, {pipeline_mode = #tpu.pipeline_mode<synchronous>, transform_indices = @transform_2, window_bounds = array<i64: 1, 128>}, {transform_indices = @transform_3, window_bounds = array<i64: 1, 7, 7, 8>}]} {
    %c0 = arith.constant 0 : index
    %c0_0 = arith.constant 0 : index
    %c0_1 = arith.constant 0 : index
    %0 = vector.load %arg1[%c0, %c0_0, %c0_1] : memref<1x16x128xbf16, #tpu.memory_space<vmem>>, vector<1x16x128xbf16>
    %1 = vector.shape_cast %0 : vector<1x16x128xbf16> to vector<16x128xbf16>
    %2 = arith.extf %1 : vector<16x128xbf16> to vector<16x128xf32>
    %c0_2 = arith.constant 0 : index
    %c0_3 = arith.constant 0 : index
    %3 = vector.load %arg2[%c0_2, %c0_3] : memref<1x128xf32, #tpu.memory_space<vmem>>, vector<1x128xf32>
    %4 = vector.broadcast %3 : vector<1x128xf32> to vector<16x128xf32>
    %5 = arith.mulf %2, %4 : vector<16x128xf32>
    %c0_4 = arith.constant 0 : index
    %c0_5 = arith.constant 0 : index
    %6 = vector.load %arg3[%c0_4, %c0_5] : memref<1x128xf32, #tpu.memory_space<vmem>>, vector<1x128xf32>
    %7 = vector.broadcast %6 : vector<1x128xf32> to vector<16x128xf32>
    %8 = arith.addf %5, %7 : vector<16x128xf32>
    %cst = arith.constant 0.000000e+00 : f32
    %9 = vector.broadcast %cst : f32 to vector<16x128xf32>
    %10 = arith.maximumf %8, %9 : vector<16x128xf32>
    %11 = vector.shape_cast %10 : vector<16x128xf32> to vector<8x2x128xf32>
    %12 = vector.extract_strided_slice %11 {offsets = [0, 0, 0], sizes = [8, 1, 128], strides = [1, 1, 1]} : vector<8x2x128xf32> to vector<8x1x128xf32>
    %13 = vector.shape_cast %12 : vector<8x1x128xf32> to vector<8x128xf32>
    %14 = vector.extract_strided_slice %11 {offsets = [0, 1, 0], sizes = [8, 1, 128], strides = [1, 1, 1]} : vector<8x2x128xf32> to vector<8x1x128xf32>
    %15 = vector.shape_cast %14 : vector<8x1x128xf32> to vector<8x128xf32>
    %16 = arith.maximumf %13, %15 : vector<8x128xf32>
    %17 = vector.extract_strided_slice %16 {offsets = [0, 0], sizes = [8, 8], strides = [1, 1]} : vector<8x128xf32> to vector<8x8xf32>
    %18 = vector.extract_strided_slice %16 {offsets = [0, 8], sizes = [8, 8], strides = [1, 1]} : vector<8x128xf32> to vector<8x8xf32>
    %19 = arith.maximumf %17, %18 : vector<8x8xf32>
    %20 = vector.extract_strided_slice %19 {offsets = [0, 0], sizes = [7, 8], strides = [1, 1]} : vector<8x8xf32> to vector<7x8xf32>
    %c0_6 = arith.constant 0 : index
    %c0_7 = arith.constant 0 : index
    %c0_8 = arith.constant 0 : index
    %c0_9 = arith.constant 0 : index
    %21 = vector.load %arg4[%c0_6, %c0_7, %c0_8, %c0_9] : memref<1x7x7x8xf32, #tpu.memory_space<vmem>>, vector<1x7x1x8xf32>
    %22 = vector.shape_cast %21 : vector<1x7x1x8xf32> to vector<7x8xf32>
    %23 = vector.shape_cast %20 : vector<7x8xf32> to vector<1x7x1x8xf32>
    tpu.vector_store %arg4[%c0_6, %c0_7, %c0_8, %c0_9], %23 {strides = array<i32>} : memref<1x7x7x8xf32, #tpu.memory_space<vmem>>, vector<1x7x1x8xf32>,
    %24 = vector.extract_strided_slice %16 {offsets = [0, 16], sizes = [8, 8], strides = [1, 1]} : vector<8x128xf32> to vector<8x8xf32>
    %25 = vector.extract_strided_slice %16 {offsets = [0, 24], sizes = [8, 8], strides = [1, 1]} : vector<8x128xf32> to vector<8x8xf32>
    %26 = arith.maximumf %24, %25 : vector<8x8xf32>
    %27 = vector.extract_strided_slice %26 {offsets = [0, 0], sizes = [7, 8], strides = [1, 1]} : vector<8x8xf32> to vector<7x8xf32>
    %c0_10 = arith.constant 0 : index
    %c0_11 = arith.constant 0 : index
    %c1 = arith.constant 1 : index
    %c0_12 = arith.constant 0 : index
    %28 = vector.load %arg4[%c0_10, %c0_11, %c1, %c0_12] : memref<1x7x7x8xf32, #tpu.memory_space<vmem>>, vector<1x7x1x8xf32>
    %29 = vector.shape_cast %28 : vector<1x7x1x8xf32> to vector<7x8xf32>
    %30 = vector.shape_cast %27 : vector<7x8xf32> to vector<1x7x1x8xf32>
    tpu.vector_store %arg4[%c0_10, %c0_11, %c1, %c0_12], %30 {strides = array<i32>} : memref<1x7x7x8xf32, #tpu.memory_space<vmem>>, vector<1x7x1x8xf32>,
    %31 = vector.extract_strided_slice %16 {offsets = [0, 32], sizes = [8, 8], strides = [1, 1]} : vector<8x128xf32> to vector<8x8xf32>
    %32 = vector.extract_strided_slice %16 {offsets = [0, 40], sizes = [8, 8], strides = [1, 1]} : vector<8x128xf32> to vector<8x8xf32>
    %33 = arith.maximumf %31, %32 : vector<8x8xf32>
    %34 = vector.extract_strided_slice %33 {offsets = [0, 0], sizes = [7, 8], strides = [1, 1]} : vector<8x8xf32> to vector<7x8xf32>
    %c0_13 = arith.constant 0 : index
    %c0_14 = arith.constant 0 : index
    %c2 = arith.constant 2 : index
    %c0_15 = arith.constant 0 : index
    %35 = vector.load %arg4[%c0_13, %c0_14, %c2, %c0_15] : memref<1x7x7x8xf32, #tpu.memory_space<vmem>>, vector<1x7x1x8xf32>
    %36 = vector.shape_cast %35 : vector<1x7x1x8xf32> to vector<7x8xf32>
    %37 = vector.shape_cast %34 : vector<7x8xf32> to vector<1x7x1x8xf32>
    tpu.vector_store %arg4[%c0_13, %c0_14, %c2, %c0_15], %37 {strides = array<i32>} : memref<1x7x7x8xf32, #tpu.memory_space<vmem>>, vector<1x7x1x8xf32>,
    %38 = vector.extract_strided_slice %16 {offsets = [0, 48], sizes = [8, 8], strides = [1, 1]} : vector<8x128xf32> to vector<8x8xf32>
    %39 = vector.extract_strided_slice %16 {offsets = [0, 56], sizes = [8, 8], strides = [1, 1]} : vector<8x128xf32> to vector<8x8xf32>
    %40 = arith.maximumf %38, %39 : vector<8x8xf32>
    %41 = vector.extract_strided_slice %40 {offsets = [0, 0], sizes = [7, 8], strides = [1, 1]} : vector<8x8xf32> to vector<7x8xf32>
    %c0_16 = arith.constant 0 : index
    %c0_17 = arith.constant 0 : index
    %c3 = arith.constant 3 : index
    %c0_18 = arith.constant 0 : index
    %42 = vector.load %arg4[%c0_16, %c0_17, %c3, %c0_18] : memref<1x7x7x8xf32, #tpu.memory_space<vmem>>, vector<1x7x1x8xf32>
    %43 = vector.shape_cast %42 : vector<1x7x1x8xf32> to vector<7x8xf32>
    %44 = vector.shape_cast %41 : vector<7x8xf32> to vector<1x7x1x8xf32>
    tpu.vector_store %arg4[%c0_16, %c0_17, %c3, %c0_18], %44 {strides = array<i32>} : memref<1x7x7x8xf32, #tpu.memory_space<vmem>>, vector<1x7x1x8xf32>,
    %45 = vector.extract_strided_slice %16 {offsets = [0, 64], sizes = [8, 8], strides = [1, 1]} : vector<8x128xf32> to vector<8x8xf32>
    %46 = vector.extract_strided_slice %16 {offsets = [0, 72], sizes = [8, 8], strides = [1, 1]} : vector<8x128xf32> to vector<8x8xf32>
    %47 = arith.maximumf %45, %46 : vector<8x8xf32>
    %48 = vector.extract_strided_slice %47 {offsets = [0, 0], sizes = [7, 8], strides = [1, 1]} : vector<8x8xf32> to vector<7x8xf32>
    %c0_19 = arith.constant 0 : index
    %c0_20 = arith.constant 0 : index
    %c4 = arith.constant 4 : index
    %c0_21 = arith.constant 0 : index
    %49 = vector.load %arg4[%c0_19, %c0_20, %c4, %c0_21] : memref<1x7x7x8xf32, #tpu.memory_space<vmem>>, vector<1x7x1x8xf32>
    %50 = vector.shape_cast %49 : vector<1x7x1x8xf32> to vector<7x8xf32>
    %51 = vector.shape_cast %48 : vector<7x8xf32> to vector<1x7x1x8xf32>
    tpu.vector_store %arg4[%c0_19, %c0_20, %c4, %c0_21], %51 {strides = array<i32>} : memref<1x7x7x8xf32, #tpu.memory_space<vmem>>, vector<1x7x1x8xf32>,
    %52 = vector.extract_strided_slice %16 {offsets = [0, 80], sizes = [8, 8], strides = [1, 1]} : vector<8x128xf32> to vector<8x8xf32>
    %53 = vector.extract_strided_slice %16 {offsets = [0, 88], sizes = [8, 8], strides = [1, 1]} : vector<8x128xf32> to vector<8x8xf32>
    %54 = arith.maximumf %52, %53 : vector<8x8xf32>
    %55 = vector.extract_strided_slice %54 {offsets = [0, 0], sizes = [7, 8], strides = [1, 1]} : vector<8x8xf32> to vector<7x8xf32>
    %c0_22 = arith.constant 0 : index
    %c0_23 = arith.constant 0 : index
    %c5 = arith.constant 5 : index
    %c0_24 = arith.constant 0 : index
    %56 = vector.load %arg4[%c0_22, %c0_23, %c5, %c0_24] : memref<1x7x7x8xf32, #tpu.memory_space<vmem>>, vector<1x7x1x8xf32>
    %57 = vector.shape_cast %56 : vector<1x7x1x8xf32> to vector<7x8xf32>
    %58 = vector.shape_cast %55 : vector<7x8xf32> to vector<1x7x1x8xf32>
    tpu.vector_store %arg4[%c0_22, %c0_23, %c5, %c0_24], %58 {strides = array<i32>} : memref<1x7x7x8xf32, #tpu.memory_space<vmem>>, vector<1x7x1x8xf32>,
    %59 = vector.extract_strided_slice %16 {offsets = [0, 96], sizes = [8, 8], strides = [1, 1]} : vector<8x128xf32> to vector<8x8xf32>
    %60 = vector.extract_strided_slice %16 {offsets = [0, 104], sizes = [8, 8], strides = [1, 1]} : vector<8x128xf32> to vector<8x8xf32>
    %61 = arith.maximumf %59, %60 : vector<8x8xf32>
    %62 = vector.extract_strided_slice %61 {offsets = [0, 0], sizes = [7, 8], strides = [1, 1]} : vector<8x8xf32> to vector<7x8xf32>
    %c0_25 = arith.constant 0 : index
    %c0_26 = arith.constant 0 : index
    %c6 = arith.constant 6 : index
    %c0_27 = arith.constant 0 : index
    %63 = vector.load %arg4[%c0_25, %c0_26, %c6, %c0_27] : memref<1x7x7x8xf32, #tpu.memory_space<vmem>>, vector<1x7x1x8xf32>
    %64 = vector.shape_cast %63 : vector<1x7x1x8xf32> to vector<7x8xf32>
    %65 = vector.shape_cast %62 : vector<7x8xf32> to vector<1x7x1x8xf32>
    tpu.vector_store %arg4[%c0_25, %c0_26, %c6, %c0_27], %65 {strides = array<i32>} : memref<1x7x7x8xf32, #tpu.memory_space<vmem>>, vector<1x7x1x8xf32>,
    return
  }
  func.func @transform_0(%arg0: i32) -> (i32, i32, i32) {
    %c0_i32 = arith.constant 0 : i32
    %c0_i32_0 = arith.constant 0 : i32
    %c0_i32_1 = arith.constant 0 : i32
    return %arg0, %c0_i32, %c0_i32_0 : i32, i32, i32
  }
  func.func @transform_1(%arg0: i32) -> (i32, i32) {
    %c0_i32 = arith.constant 0 : i32
    %c0_i32_0 = arith.constant 0 : i32
    %c0_i32_1 = arith.constant 0 : i32
    return %c0_i32, %c0_i32_0 : i32, i32
  }
  func.func @transform_2(%arg0: i32) -> (i32, i32) {
    %c0_i32 = arith.constant 0 : i32
    %c0_i32_0 = arith.constant 0 : i32
    %c0_i32_1 = arith.constant 0 : i32
    return %c0_i32, %c0_i32_0 : i32, i32
  }
  func.func @transform_3(%arg0: i32) -> (i32, i32, i32, i32) {
    %c0_i32 = arith.constant 0 : i32
    %c0_i32_0 = arith.constant 0 : i32
    %c0_i32_1 = arith.constant 0 : i32
    %c0_i32_2 = arith.constant 0 : i32
    return %arg0, %c0_i32, %c0_i32_0, %c0_i32_1 : i32, i32, i32, i32
  }
}

</mosaic_0001>

<bundles_post_ra>
// kernel: tile.18
= control target key start
LH: loop header
LB: loop body
LE: loop exit
PB: predicated region body
PF: predicated region fallthrough
CT: control target
= control target key end

     0   :  { %s28_s0 = inlined_call_operand.vmem [shape: f32[8], index: 0, kind: input, shape index: {}]   ;;  %s29_s1 = inlined_call_operand.vmem [shape: f32[16,8], index: 1, kind: output, shape index: {}]  }
   0x1   :  { %v4_v0 = vld [vmem:[%s28_s0] ss:$0 sm:$0xff] }
   0x2   :  { %5 = vst [vmem:[%s29_s1] sm:$0xff] %v4_v0  ;;  %8 = vst [vmem:[%s29_s1 + $0x8] sm:$0xff] %v4_v0 }

// kernel: tile.19
= control target key start
LH: loop header
LB: loop body
LE: loop exit
PB: predicated region body
PF: predicated region fallthrough
CT: control target
= control target key end

     0   :  { %s131_s10 = smov 120   ;;  %s132_s11 = smov 104   ;;  %vm3_vm0 = vcmask 64512   ;;  %vm9_vm1 = vcmask 1048512   ;;  %vm15_vm2 = vcmask 982912   ;;  %vm21_vm3 = vcmask 917312   ;;  %s207_s0 = inlined_call_operand.vmem [shape: f32[16,8], index: 0, kind: input, shape index: {}]   ;;  %s208_s1 = inlined_call_operand.vmem [shape: f32[1,128], index: 1, kind: output, shape index: {}]  }
   0x1   :  { %v101_v0 = vld [vmem:[%s207_s0 + $0xf] sm:$0x1]   ;;  %v103_v1 = vld [vmem:[%s207_s0 + $0xd] sm:$0x1]   ;;  %v102_v2 = vld [vmem:[%s207_s0 + $0xe] sm:$0x1]  }
   0x2   :  { %7 = vrot.lane.b32.xlu0 %v101_v0, %s131_s10  ;;  %19 = vrot.lane.b32.xlu1 %v103_v1, %s132_s11  ;;  %v104_v3 = vld [vmem:[%s207_s0 + $0xc] sm:$0x1]   ;;  %s133_s16 = smov 112   ;;  %s134_s17 = smov 96   ;;  %v105_v4 = vld [vmem:[%s207_s0 + $0xb] sm:$0x1]  }
   0x3   :  { %v106_v5 = vld [vmem:[%s207_s0 + $0xa] sm:$0x1]   ;;  %v2_v6 = vld [vmem:[%s207_s0] sm:$0x1]   ;;  %s135_s24 = smov 88   ;;  %s136_s25 = smov 80  }
   0x4   :  { %4 = vst.msk [vmem:[#allocation0] sm:$0x1] %vm3_vm0, %v2_v6   ;;  %v107_v7 = vld [vmem:[%s207_s0 + $0x9] sm:$0x1]   ;;  %v108_v8 = vld [vmem:[%s207_s0 + $0x8] sm:$0x1]  }
   0x5   :  { %s137_s30 = smov 72   ;;  %s138_s2 = smov 64   ;;  %v109_v9 = vld [vmem:[%s207_s0 + $0x7] sm:$0x1]   ;;  %v110_v10 = vld [vmem:[%s207_s0 + $0x6] sm:$0x1]  }
   0x6   :  { %13 = vrot.lane.b32.xlu0 %v102_v2, %s133_s16  ;;  %25 = vrot.lane.b32.xlu1 %v104_v3, %s134_s17  ;;  %s139_s7 = smov 56   ;;  %s140_s8 = smov 48   ;;  %v111_v11 = vld [vmem:[%s207_s0 + $0x5] sm:$0x1]   ;;  %v112_v12 = vld [vmem:[%s207_s0 + $0x4] sm:$0x1]  }
   0x7   :  { %s141_s13 = smov 40   ;;  %s142_s14 = smov 32   ;;  %v113_v13 = vld [vmem:[%s207_s0 + $0x3] sm:$0x1]   ;;  %v114_v14 = vld [vmem:[%s207_s0 + $0x2] sm:$0x1]  }
   0x8   :  { %s143_s19 = smov 24   ;;  %s144_s20 = smov 16   ;;  %v115_v15 = vld [vmem:[%s207_s0 + $0x1] sm:$0x1]   ;;  %vm27_vm4 = vcmask 851712   ;;  %vm33_vm5 = vcmask 786112  }
   0x9   :  { %s145_s0 = smov 8   ;;  %vm39_vm6 = vcmask 720512   ;;  %vm45_vm7 = vcmask 654912   ;;  %vm51_vm8 = vcmask 589312   ;;  %vm57_vm9 = vcmask 523712  }
   0xa   :  { %31 = vrot.lane.b32.xlu0 %v105_v4, %s135_s24  ;;  %37 = vrot.lane.b32.xlu1 %v106_v5, %s136_s25  ;;  %vm63_vm10 = vcmask 458112   ;;  %vm69_vm11 = vcmask 392512   ;;  %vm75_vm12 = vcmask 326912   ;;  %vm81_vm13 = vcmask 261312  }
   0xb   :  { %vm87_vm14 = vcmask 195712   ;;  %vm93_vm15 = vcmask 130112  }
   0xe   :  { %43 = vrot.lane.b32.xlu0 %v107_v7, %s137_s30  ;;  %49 = vrot.lane.b32.xlu1 %v108_v8, %s138_s2 }
  0x12   :  { %55 = vrot.lane.b32.xlu0 %v109_v9, %s139_s7  ;;  %61 = vrot.lane.b32.xlu1 %v110_v10, %s140_s8 }
  0x16   :  { %67 = vrot.lane.b32.xlu0 %v111_v11, %s141_s13  ;;  %73 = vrot.lane.b32.xlu1 %v112_v12, %s142_s14 }
  0x1a   :  { %79 = vrot.lane.b32.xlu0 %v113_v13, %s143_s19  ;;  %85 = vrot.lane.b32.xlu1 %v114_v14, %s144_s20 }
  0x1e   :  { %91 = vrot.lane.b32.xlu0 %v115_v15, %s145_s0 }
  0x74   :  { %v8_v16 = vpop.permute.xlu0 %7   ;;  %v20_v17 = vpop.permute.xlu1 %19  }
  0x75   :  { %10 = vst.msk [vmem:[#allocation0] sm:$0x1] %vm9_vm1, %v8_v16  }
  0x78   :  { %v14_v18 = vpop.permute.xlu0 %13   ;;  %v26_v19 = vpop.permute.xlu1 %25  }
  0x79   :  { %16 = vst.msk [vmem:[#allocation0] sm:$0x1] %vm15_vm2, %v14_v18  }
  0x7a   :  { %22 = vst.msk [vmem:[#allocation0] sm:$0x1] %vm21_vm3, %v20_v17  }
  0x7b   :  { %28 = vst.msk [vmem:[#allocation0] sm:$0x1] %vm27_vm4, %v26_v19  }
  0x7c   :  { %v32_v20 = vpop.permute.xlu0 %31   ;;  %v38_v21 = vpop.permute.xlu1 %37  }
  0x7d   :  { %34 = vst.msk [vmem:[#allocation0] sm:$0x1] %vm33_vm5, %v32_v20  }
  0x7e   :  { %40 = vst.msk [vmem:[#allocation0] sm:$0x1] %vm39_vm6, %v38_v21  }
  0x80   :  { %v44_v22 = vpop.permute.xlu0 %43   ;;  %v50_v23 = vpop.permute.xlu1 %49  }
  0x81   :  { %46 = vst.msk [vmem:[#allocation0] sm:$0x1] %vm45_vm7, %v44_v22  }
  0x82   :  { %52 = vst.msk [vmem:[#allocation0] sm:$0x1] %vm51_vm8, %v50_v23  }
  0x84   :  { %v56_v24 = vpop.permute.xlu0 %55   ;;  %v62_v25 = vpop.permute.xlu1 %61  }
  0x85   :  { %58 = vst.msk [vmem:[#allocation0] sm:$0x1] %vm57_vm9, %v56_v24  }
  0x86   :  { %64 = vst.msk [vmem:[#allocation0] sm:$0x1] %vm63_vm10, %v62_v25  }
  0x88   :  { %v68_v26 = vpop.permute.xlu0 %67   ;;  %v74_v27 = vpop.permute.xlu1 %73  }
  0x89   :  { %70 = vst.msk [vmem:[#allocation0] sm:$0x1] %vm69_vm11, %v68_v26  }
  0x8a   :  { %76 = vst.msk [vmem:[#allocation0] sm:$0x1] %vm75_vm12, %v74_v27  }
  0x8c   :  { %v80_v28 = vpop.permute.xlu0 %79   ;;  %v86_v29 = vpop.permute.xlu1 %85  }
  0x8d   :  { %82 = vst.msk [vmem:[#allocation0] sm:$0x1] %vm81_vm13, %v80_v28  }
  0x8e   :  { %88 = vst.msk [vmem:[#allocation0] sm:$0x1] %vm87_vm14, %v86_v29  }
  0x90   :  { %v92_v30 = vpop.permute.xlu0 %91  }
  0x91   :  { %94 = vst.msk [vmem:[#allocation0] sm:$0x1] %vm93_vm15, %v92_v30  }
  0x98   :  { %v98_v31 = vld [vmem:[#allocation0] sm:$0x1] }
  0x99   :  { %100 = vst [vmem:[%s208_s1] sm:$0x1] %v98_v31 }

// kernel: templet_layer_forward.3
= control target key start
LH: loop header
LB: loop body
LE: loop exit
PB: predicated region body
PF: predicated region fallthrough
CT: control target
= control target key end

     0   :  { %s643_s12 = smov 0   ;;  %s821_s0 = inlined_call_operand.vmem [shape: bf16[2,16,128], index: 0, kind: input, shape index: {}]   ;;  %s822_s1 = inlined_call_operand.vmem [shape: f32[1,128], index: 1, kind: input, shape index: {}]   ;;  %s823_s2 = inlined_call_operand.vmem [shape: f32[1,128], index: 2, kind: input, shape index: {}]   ;;  %s824_s3 = inlined_call_operand.vmem [shape: f32[2,7,7,8], index: 3, kind: output, shape index: {}]  }
   0x1 LB: > { %s566_s13 = sadd.s32 4294967295, %s613_s12   ;;  %p570_p0 = scmp.ge.s32.totalorder %s613_s12, 1  ;;  %s613_s12 = sphi %s643_s12, %s13_s12  }
   0x2   : > { %p137_p1 = scmp.lt.s32.totalorder %s613_s12, 3 }
   0x4   : > { %p138_p2 = pnand %p570_p0, %p137_p1 }
   0x5   : > { %p161_p3 = scmp.lt.s32.totalorder (!%p138_p2), %s566_s13, 1  ;;  %v615_v0 = vmov (!%p138_p2), 1983009808   ;;  %v201_v2 = vlaneseq (!%p138_p2)  ;;  %v574_v4 = vld [vmem:[%s822_s1] ss:$0 sm:$0xff] (!%p138_p2)  ;;  %s616_s22 = smov (!%p138_p2), 120  }
   0x6   : > { %141 = sbr.rel (%p138_p2) target bundleno = 346 (0x15a), region = 32  ;;  %v199_v1 = vunpack.c.l.s4 (!%p138_p2), %v615_v0  ;;  %v575_v9 = vld [vmem:[%s823_s2] ss:$0 sm:$0xff] (!%p138_p2)  ;;  %vm300_vm0 = vcmask (!%p138_p2), 57344   ;;  %s617_s27 = smov (!%p138_p2), 96  }
   0x7   : > { %v202_v8 = vshrl.u32 (!%p138_p2), %v201_v2, 7  ;;  %s618_s28 = smov (!%p138_p2), 112   ;;  %s619_s29 = smov (!%p138_p2), 64  }
   0x8   : > { %v200_v7 = vunpack.c.0.s8 (!%p138_p2), %v199_v1  ;;  %s620_s30 = smov (!%p138_p2), 80   ;;  %s621_s4 = smov (!%p138_p2), 32  }
   0x9   : > { %v664_v40 = vsub.s32 (!%p138_p2), 0, %v202_v8  ;;  %s622_s5 = smov (!%p138_p2), 48  }
   0xa   : > { %v203_v14 = vsub.s32 (!%p138_p2), %v200_v7, %v202_v8 }
   0xd   : > { %s826_s13 = smov (!%p161_p3, %s566_s13), 1 }
   0xe   : > { %s585_s14 = sshll.u32 %s826_s13, 3  ;;  %s590_s23 = smul.u32 56, %s826_s13 }
   0xf   : > { %s165_s17 = scalar_lea.vmem %s821_s0, %s585_s14 }
  0x10   : > { %v587_v3 = vld [vmem:[%s165_s17] sm:$0xff]   ;;  %s669_s26 = scalar_lea.vmem %s824_s3, %s590_s23 }
  0x11   : > { %v588_v5 = vunpack.c.l.bf16 %v587_v3  ;;  %v589_v6 = vunpack.c.h.bf16 %v587_v3 }
  0x13   : > { %v182_v10 = vmul.f32 %v588_v5, %v574_v4  ;;  %v183_v11 = vmul.f32 %v589_v6, %v574_v4 }
  0x15   : > { %v191_v12 = vadd.f32 %v575_v9, %v182_v10  ;;  %v192_v13 = vadd.f32 %v575_v9, %v183_v11 }
  0x17   : > { %v193_v15 = vmax.f32 %v191_v12, 0.0  ;;  %v194_v16 = vmax.f32 %v192_v13, 0.0 }
  0x19   : > { %v204_v17 = vrot.slane %v193_v15, %v203_v14  ;;  %v221_v18 = vrot.slane %v194_v16, %v203_v14  ;;  %v197_v19 = vcombine.high %v193_v15, %v193_v15  ;;  %v214_v20 = vcombine.high %v194_v16, %v194_v16 }
  0x1b   : > { %v576_v21 = vrot.slane %v204_v17, 9  ;;  %v580_v22 = vrot.slane %v221_v18, 9  ;;  %v212_v23 = vcombine.high %v204_v17, %v204_v17  ;;  %v211_v24 = vrot.slane %v197_v19, %v203_v14 }
  0x1c   : > { %v229_v25 = vcombine.high %v221_v18, %v221_v18  ;;  %v228_v33 = vrot.slane %v214_v20, %v203_v14 }
  0x1d   : > { %v258_v26 = vmax.f32 %v204_v17, %v576_v21  ;;  %v578_v27 = vrot.slane %v211_v24, 9  ;;  %v213_v29 = vcombine.high %v211_v24, %v211_v24  ;;  %v262_v30 = vmax.f32 %v221_v18, %v580_v22 }
  0x1e   : > { %v581_v28 = vrot.slane %v229_v25, 9  ;;  %v577_v31 = vrot.slane %v212_v23, 9  ;;  %v582_v37 = vrot.slane %v228_v33, 9 }
  0x1f   : > { %272 = vrot.lane.b32.xlu0 %v258_v26, %s616_s22  ;;  %v260_v32 = vmax.f32 %v211_v24, %v578_v27  ;;  %v579_v35 = vrot.slane %v213_v29, 9 }
  0x20   : > { %v263_v34 = vmax.f32 %v229_v25, %v581_v28  ;;  %v259_v36 = vmax.f32 %v212_v23, %v577_v31  ;;  %v264_v39 = vmax.f32 %v228_v33, %v582_v37 }
  0x21   : > { %276 = vrot.lane.b32.xlu1 %v260_v32, %s616_s22  ;;  %v261_v38 = vmax.f32 %v213_v29, %v579_v35 }
  0x23   : > { %280 = vrot.lane.b32.xlu0 %v262_v30, %s616_s22 }
  0x25   : > { %282 = vrot.lane.b32.xlu1 %v263_v34, %s616_s22 }
  0x27   : > { %274 = vrot.lane.b32.xlu0 %v259_v36, %s616_s22 }
  0x29   : > { %278 = vrot.lane.b32.xlu1 %v261_v38, %s616_s22 }
  0x2b   : > { %284 = vrot.lane.b32.xlu0 %v264_v39, %s616_s22 }
  0x91   : > { %v273_v41 = vpop.permute.xlu0 %272 }
  0x92   : > { %v293_v42 = vmax.f32 %v258_v26, %v273_v41 }
  0x93   : > { %v277_v43 = vpop.permute.xlu1 %276 }
  0x94   : > { %301 = vst.msk [vmem:[%s669_s26] sm:$0x1] %vm300_vm0, %v293_v42  ;;  %v318_v44 = vrot.slane %v293_v42, %v664_v40  ;;  %v295_v45 = vmax.f32 %v260_v32, %v277_v43 }
  0x95   : > { %v281_v46 = vpop.permute.xlu0 %280 }
  0x96   : > { %v297_v47 = vmax.f32 %v262_v30, %v281_v46  ;;  %371 = vrot.lane.b32.xlu0 %v318_v44, %s617_s27  ;;  %343 = vrot.lane.b32.xlu1 %v318_v44, %s618_s28  ;;  %303 = vst.msk [vmem:[%s669_s26 + $0x10] sm:$0x1] %vm300_vm0, %v295_v45  ;;  %v326_v58 = vrot.slane %v295_v45, %v664_v40 }
  0x97   : > { %v283_v48 = vpop.permute.xlu1 %282 }
  0x98   : > { %305 = vst.msk [vmem:[%s669_s26 + $0x20] sm:$0x1] %vm300_vm0, %v297_v47  ;;  %v334_v49 = vrot.slane %v297_v47, %v664_v40  ;;  %v298_v50 = vmax.f32 %v263_v34, %v283_v48 }
  0x99   : > { %v275_v51 = vpop.permute.xlu0 %274 }
  0x9a   : > { %379 = vrot.lane.b32.xlu0 %v334_v49, %s617_s27  ;;  %351 = vrot.lane.b32.xlu1 %v334_v49, %s618_s28  ;;  %v294_v52 = vmax.f32 %v259_v36, %v275_v51  ;;  %306 = vst.msk [vmem:[%s669_s26 + $0x28] sm:$0x1] %vm300_vm0, %v298_v50  ;;  %v338_v60 = vrot.slane %v298_v50, %v664_v40 }
  0x9b   : > { %v279_v53 = vpop.permute.xlu1 %278 }
  0x9c   : > { %302 = vst.msk [vmem:[%s669_s26 + $0x8] sm:$0x1] %vm300_vm0, %v294_v52  ;;  %v296_v54 = vmax.f32 %v261_v38, %v279_v53  ;;  %v322_v57 = vrot.slane %v294_v52, %v664_v40 }
  0x9d   : > { %v285_v55 = vpop.permute.xlu0 %284 }
  0x9e   : > { %427 = vrot.lane.b32.xlu0 %v318_v44, %s619_s29  ;;  %399 = vrot.lane.b32.xlu1 %v318_v44, %s620_s30  ;;  %v299_v56 = vmax.f32 %v264_v39, %v285_v55  ;;  %304 = vst.msk [vmem:[%s669_s26 + $0x18] sm:$0x1] %vm300_vm0, %v296_v54  ;;  %v330_v61 = vrot.slane %v296_v54, %v664_v40 }
  0xa0   : > { %307 = vst.msk [vmem:[%s669_s26 + $0x30] sm:$0x1] %vm300_vm0, %v299_v56  ;;  %v342_v59 = vrot.slane %v299_v56, %v664_v40 }
  0xa2   : > { %435 = vrot.lane.b32.xlu0 %v334_v49, %s619_s29  ;;  %407 = vrot.lane.b32.xlu1 %v334_v49, %s620_s30 }
  0xa6   : > { %483 = vrot.lane.b32.xlu0 %v318_v44, %s621_s4  ;;  %455 = vrot.lane.b32.xlu1 %v318_v44, %s622_s5 }
  0xaa   : > { %491 = vrot.lane.b32.xlu0 %v334_v49, %s621_s4  ;;  %463 = vrot.lane.b32.xlu1 %v334_v49, %s622_s5 }
  0xae   : > { %345 = vrot.lane.b32.xlu0 %v322_v57, %s618_s28  ;;  %347 = vrot.lane.b32.xlu1 %v326_v58, %s618_s28 }
  0xb2   : > { %353 = vrot.lane.b32.xlu0 %v338_v60, %s618_s28  ;;  %355 = vrot.lane.b32.xlu1 %v342_v59, %s618_s28 }
  0xb6   : > { %375 = vrot.lane.b32.xlu0 %v326_v58, %s617_s27  ;;  %373 = vrot.lane.b32.xlu1 %v322_v57, %s617_s27 }
  0xba   : > { %383 = vrot.lane.b32.xlu0 %v342_v59, %s617_s27  ;;  %381 = vrot.lane.b32.xlu1 %v338_v60, %s617_s27 }
  0xbe   : > { %401 = vrot.lane.b32.xlu0 %v322_v57, %s620_s30  ;;  %403 = vrot.lane.b32.xlu1 %v326_v58, %s620_s30 }
  0xc2   : > { %409 = vrot.lane.b32.xlu0 %v338_v60, %s620_s30  ;;  %411 = vrot.lane.b32.xlu1 %v342_v59, %s620_s30 }
  0xc6   : > { %431 = vrot.lane.b32.xlu0 %v326_v58, %s619_s29  ;;  %429 = vrot.lane.b32.xlu1 %v322_v57, %s619_s29 }
  0xca   : > { %439 = vrot.lane.b32.xlu0 %v342_v59, %s619_s29  ;;  %437 = vrot.lane.b32.xlu1 %v338_v60, %s619_s29 }
  0xce   : > { %457 = vrot.lane.b32.xlu0 %v322_v57, %s622_s5  ;;  %459 = vrot.lane.b32.xlu1 %v326_v58, %s622_s5 }
  0xd2   : > { %465 = vrot.lane.b32.xlu0 %v338_v60, %s622_s5  ;;  %467 = vrot.lane.b32.xlu1 %v342_v59, %s622_s5 }
  0xd6   : > { %487 = vrot.lane.b32.xlu0 %v326_v58, %s621_s4  ;;  %485 = vrot.lane.b32.xlu1 %v322_v57, %s621_s4 }
  0xda   : > { %377 = vrot.lane.b32.xlu1 %v330_v61, %s617_s27  ;;  %349 = vrot.lane.b32.xlu0 %v330_v61, %s618_s28 }
  0xde   : > { %433 = vrot.lane.b32.xlu1 %v330_v61, %s619_s29  ;;  %405 = vrot.lane.b32.xlu0 %v330_v61, %s620_s30 }
  0xe2   : > { %489 = vrot.lane.b32.xlu1 %v330_v61, %s621_s4  ;;  %461 = vrot.lane.b32.xlu0 %v330_v61, %s622_s5 }
  0xe6   : > { %493 = vrot.lane.b32.xlu1 %v338_v60, %s621_s4  ;;  %495 = vrot.lane.b32.xlu0 %v342_v59, %s621_s4 }
 0x108   : > { %v372_v62 = vpop.permute.xlu0 %371  ;;  %v344_v63 = vpop.permute.xlu1 %343 }
 0x109   : > { %392 = vst.msk [vmem:[%s669_s26 + $0x2] sm:$0x1] %vm300_vm0, %v372_v62  ;;  %364 = vst.msk [vmem:[%s669_s26 + $0x1] sm:$0x1] %vm300_vm0, %v344_v63 }
 0x10c   : > { %v380_v0 = vpop.permute.xlu0 %379  ;;  %v352_v1 = vpop.permute.xlu1 %351 }
 0x10d   : > { %396 = vst.msk [vmem:[%s669_s26 + $0x22] sm:$0x1] %vm300_vm0, %v380_v0  ;;  %368 = vst.msk [vmem:[%s669_s26 + $0x21] sm:$0x1] %vm300_vm0, %v352_v1 }
 0x110   : > { %v428_v2 = vpop.permute.xlu0 %427  ;;  %v400_v3 = vpop.permute.xlu1 %399 }
 0x111   : > { %448 = vst.msk [vmem:[%s669_s26 + $0x4] sm:$0x1] %vm300_vm0, %v428_v2  ;;  %420 = vst.msk [vmem:[%s669_s26 + $0x3] sm:$0x1] %vm300_vm0, %v400_v3 }
 0x114   : > { %v436_v4 = vpop.permute.xlu0 %435  ;;  %v408_v5 = vpop.permute.xlu1 %407 }
 0x115   : > { %452 = vst.msk [vmem:[%s669_s26 + $0x24] sm:$0x1] %vm300_vm0, %v436_v4  ;;  %424 = vst.msk [vmem:[%s669_s26 + $0x23] sm:$0x1] %vm300_vm0, %v408_v5 }
 0x118   : > { %v484_v6 = vpop.permute.xlu0 %483  ;;  %v456_v7 = vpop.permute.xlu1 %455 }
 0x119   : > { %504 = vst.msk [vmem:[%s669_s26 + $0x6] sm:$0x1] %vm300_vm0, %v484_v6  ;;  %476 = vst.msk [vmem:[%s669_s26 + $0x5] sm:$0x1] %vm300_vm0, %v456_v7 }
 0x11c   : > { %v492_v8 = vpop.permute.xlu0 %491  ;;  %v464_v9 = vpop.permute.xlu1 %463 }
 0x11d   : > { %508 = vst.msk [vmem:[%s669_s26 + $0x26] sm:$0x1] %vm300_vm0, %v492_v8  ;;  %480 = vst.msk [vmem:[%s669_s26 + $0x25] sm:$0x1] %vm300_vm0, %v464_v9 }
 0x120   : > { %v346_v10 = vpop.permute.xlu0 %345  ;;  %v348_v11 = vpop.permute.xlu1 %347 }
 0x121   : > { %365 = vst.msk [vmem:[%s669_s26 + $0x9] sm:$0x1] %vm300_vm0, %v346_v10  ;;  %366 = vst.msk [vmem:[%s669_s26 + $0x11] sm:$0x1] %vm300_vm0, %v348_v11 }
 0x124   : > { %v354_v12 = vpop.permute.xlu0 %353  ;;  %v356_v13 = vpop.permute.xlu1 %355 }
 0x125   : > { %369 = vst.msk [vmem:[%s669_s26 + $0x29] sm:$0x1] %vm300_vm0, %v354_v12  ;;  %370 = vst.msk [vmem:[%s669_s26 + $0x31] sm:$0x1] %vm300_vm0, %v356_v13 }
 0x128   : > { %v376_v14 = vpop.permute.xlu0 %375  ;;  %v374_v15 = vpop.permute.xlu1 %373 }
 0x129   : > { %394 = vst.msk [vmem:[%s669_s26 + $0x12] sm:$0x1] %vm300_vm0, %v376_v14  ;;  %393 = vst.msk [vmem:[%s669_s26 + $0xa] sm:$0x1] %vm300_vm0, %v374_v15 }
 0x12c   : > { %v384_v16 = vpop.permute.xlu0 %383  ;;  %v382_v17 = vpop.permute.xlu1 %381 }
 0x12d   : > { %398 = vst.msk [vmem:[%s669_s26 + $0x32] sm:$0x1] %vm300_vm0, %v384_v16  ;;  %397 = vst.msk [vmem:[%s669_s26 + $0x2a] sm:$0x1] %vm300_vm0, %v382_v17 }
 0x130   : > { %v402_v18 = vpop.permute.xlu0 %401  ;;  %v404_v19 = vpop.permute.xlu1 %403 }
 0x131   : > { %421 = vst.msk [vmem:[%s669_s26 + $0xb] sm:$0x1] %vm300_vm0, %v402_v18  ;;  %422 = vst.msk [vmem:[%s669_s26 + $0x13] sm:$0x1] %vm300_vm0, %v404_v19 }
 0x134   : > { %v410_v20 = vpop.permute.xlu0 %409  ;;  %v412_v21 = vpop.permute.xlu1 %411 }
 0x135   : > { %425 = vst.msk [vmem:[%s669_s26 + $0x2b] sm:$0x1] %vm300_vm0, %v410_v20  ;;  %426 = vst.msk [vmem:[%s669_s26 + $0x33] sm:$0x1] %vm300_vm0, %v412_v21 }
 0x138   : > { %v432_v22 = vpop.permute.xlu0 %431  ;;  %v430_v23 = vpop.permute.xlu1 %429 }
 0x139   : > { %450 = vst.msk [vmem:[%s669_s26 + $0x14] sm:$0x1] %vm300_vm0, %v432_v22  ;;  %449 = vst.msk [vmem:[%s669_s26 + $0xc] sm:$0x1] %vm300_vm0, %v430_v23 }
 0x13c   : > { %v440_v24 = vpop.permute.xlu0 %439  ;;  %v438_v25 = vpop.permute.xlu1 %437 }
 0x13d   : > { %454 = vst.msk [vmem:[%s669_s26 + $0x34] sm:$0x1] %vm300_vm0, %v440_v24  ;;  %453 = vst.msk [vmem:[%s669_s26 + $0x2c] sm:$0x1] %vm300_vm0, %v438_v25 }
 0x140   : > { %v458_v26 = vpop.permute.xlu0 %457  ;;  %v460_v27 = vpop.permute.xlu1 %459 }
 0x141   : > { %477 = vst.msk [vmem:[%s669_s26 + $0xd] sm:$0x1] %vm300_vm0, %v458_v26  ;;  %478 = vst.msk [vmem:[%s669_s26 + $0x15] sm:$0x1] %vm300_vm0, %v460_v27 }
 0x144   : > { %v466_v28 = vpop.permute.xlu0 %465  ;;  %v468_v29 = vpop.permute.xlu1 %467 }
 0x145   : > { %481 = vst.msk [vmem:[%s669_s26 + $0x2d] sm:$0x1] %vm300_vm0, %v466_v28  ;;  %482 = vst.msk [vmem:[%s669_s26 + $0x35] sm:$0x1] %vm300_vm0, %v468_v29 }
 0x148   : > { %v488_v30 = vpop.permute.xlu0 %487  ;;  %v486_v31 = vpop.permute.xlu1 %485 }
 0x149   : > { %506 = vst.msk [vmem:[%s669_s26 + $0x16] sm:$0x1] %vm300_vm0, %v488_v30  ;;  %505 = vst.msk [vmem:[%s669_s26 + $0xe] sm:$0x1] %vm300_vm0, %v486_v31 }
 0x14c   : > { %v350_v32 = vpop.permute.xlu0 %349  ;;  %v378_v33 = vpop.permute.xlu1 %377 }
 0x14d   : > { %367 = vst.msk [vmem:[%s669_s26 + $0x19] sm:$0x1] %vm300_vm0, %v350_v32  ;;  %395 = vst.msk [vmem:[%s669_s26 + $0x1a] sm:$0x1] %vm300_vm0, %v378_v33 }
 0x150   : > { %v406_v34 = vpop.permute.xlu0 %405  ;;  %v434_v35 = vpop.permute.xlu1 %433 }
 0x151   : > { %423 = vst.msk [vmem:[%s669_s26 + $0x1b] sm:$0x1] %vm300_vm0, %v406_v34  ;;  %451 = vst.msk [vmem:[%s669_s26 + $0x1c] sm:$0x1] %vm300_vm0, %v434_v35 }
 0x154   : > { %v462_v36 = vpop.permute.xlu0 %461  ;;  %v490_v37 = vpop.permute.xlu1 %489 }
 0x155   : > { %479 = vst.msk [vmem:[%s669_s26 + $0x1d] sm:$0x1] %vm300_vm0, %v462_v36  ;;  %507 = vst.msk [vmem:[%s669_s26 + $0x1e] sm:$0x1] %vm300_vm0, %v490_v37 }
 0x158   : > { %v496_v38 = vpop.permute.xlu0 %495  ;;  %v494_v39 = vpop.permute.xlu1 %493 }
 0x159   : > { %510 = vst.msk [vmem:[%s669_s26 + $0x36] sm:$0x1] %vm300_vm0, %v496_v38  ;;  %509 = vst.msk [vmem:[%s669_s26 + $0x2e] sm:$0x1] %vm300_vm0, %v494_v39 }
 0x15a PF: > { %s13_s12 = sadd.s32 1, %s613_s12  }
 0x15b   : > { %p10_p4 = scmp.ge.s32.totalorder %s13_s12, 4  }
 0x15d   :  { %12 = sbr.rel (!%p10_p4) target bundleno = 1 (0x1), region = 62 }

// kernel: templet_layer_forward.2
= control target key start
LH: loop header
LB: loop body
LE: loop exit
PB: predicated region body
PF: predicated region fallthrough
CT: control target
= control target key end

     0   :  { %s7570_s15 = smov 0   ;;  %s10508_s0 = inlined_call_operand.vmem [shape: bf16[2,18,18,4], index: 0, kind: input, shape index: {}]   ;;  %s10509_s1 = inlined_call_operand.vmem [shape: bf16[36,128], index: 1, kind: input, shape index: {}]   ;;  %s10510_s2 = inlined_call_operand.vmem [shape: f32[256,1], index: 2, kind: input, shape index: {}]   ;;  %s10511_s3 = inlined_call_operand.vmem [shape: bf16[2,16,128], index: 3, kind: output, shape index: {0}]   ;;  %s10512_s4 = inlined_call_operand.vmem [shape: f32[2,2,128], index: 4, kind: output, shape index: {1}]  }
   0x1 LB: > { %s6047_s16 = sadd.s32 4294967295, %s7527_s15   ;;  %p6051_p0 = scmp.ge.s32.totalorder %s7527_s15, 1  ;;  %s7527_s15 = sphi %s7570_s15, %s15_s15  }
   0x2   : > { %p165_p1 = scmp.lt.s32.totalorder %s7527_s15, 3 }
   0x4   : > { %p166_p2 = pnand %p6051_p0, %p165_p1 }
   0x6   : > { %169 = sbr.rel (%p166_p2) target bundleno = 837 (0x345), region = 32 }
   0xd   : > { %v7409_v0 = vld [vmem:[%s10509_s1] ss:$0 sps:$4 sm:$0xcc]   ;;  %vm748_vm0 = vcmask 1041408   ;;  %v2455_v1 = vld [vmem:[%s10509_s1 + $0x8] sm:$0x3] }
   0xe   : > { %p195_p3 = scmp.lt.s32.totalorder %s6047_s16, 1  ;;  %v698_v2 = vrot.slane %v7409_v0, 2  ;;  %7376 = vmatprep.subr.msk.bf16.mxu0 %vm748_vm0, %v2455_v1  ;;  %v7586_v3 = vsel %vm748_vm0, %v2455_v1, 0  ;;  %v242_v4 = vld [vmem:[%s10509_s1] sm:$0x3]  ;;  %vm699_vm3 = vcmask 31744  }
   0xf   : > { %10602 = vst [vmem:[#allocation2_spill] sm:$0xff] %v7586_v3  ;;  %6945 = vmatpush3.bf16.msra.mxu0 %v7586_v3  ;;  %v7410_v5 = vld [vmem:[%s10509_s1 + $0x8] ss:$0 sps:$4 sm:$0xcc]   ;;  %vm259_vm1 = vsmask.f32 3328 }
  0x10   : > { %s10798_s16 = smov (!%p195_p3, %s6047_s16), 1  ;;  %7372 = vmatprep.subr.msk.bf16.mxu1 %vm748_vm0, %v698_v2  ;;  %v750_v6 = vsel %vm748_vm0, %v698_v2, 0  ;;  %v2976_v7 = vrot.slane %v7410_v5, 2  ;;  %vm260_vm2 = vsmask.f32 7440  ;;  %v7618_v19 = vsel %vm748_vm0, %v242_v4, 0 }
  0x11   : > { %6809 = vmatpush3.bf16.msra.mxu1 %v750_v6  ;;  %s7382_s25 = smul.u32 216, %s10798_s16  ;;  %v7623_v24 = vld [vmem:[%s10509_s1 + $0xc] sm:$0x3]  ;;  %vm7631_vm4 = vmor %vm259_vm1, %vm260_vm2  ;;  %vm1253_vm5 = vcmask 1042432   ;;  %vm1254_vm6 = vcmask 1046532   ;;  %vm5255_vm8 = vcmask 1041409  }
  0x12   : > { %7373 = vmatprep.subr.msk.bf16.mxu1 %vm748_vm0, %v242_v4  ;;  %7378 = vmatprep.subr.msk.bf16.mxu0 %vm748_vm0, %v2976_v7  ;;  %v7638_v39 = vsel %vm748_vm0, %v7623_v24, 0  ;;  %v7641_v43 = vsel %vm748_vm0, %v2976_v7, 0  ;;  %vm7857_vm7 = vmor %vm1253_vm5, %vm1254_vm6  ;;  %vm5258_vm9 = vcmask 1042434   ;;  %vm5261_vm10 = vcmask 1043459   ;;  %s7531_s12 = smov 8   ;;  %s7532_s13 = smov 16  }
  0x13   : > { %s7604_s28 = scalar_lea.vmem %s10508_s0, %s7382_s25  ;;  %vm5264_vm11 = vcmask 1044484   ;;  %vm5267_vm12 = vcmask 1045509   ;;  %vm5270_vm13 = vcmask 1046534   ;;  %vm5273_vm14 = vcmask 1047559   ;;  %s7533_s14 = smov 24  }
  0x14   : > { %v210_v8 = vld [vmem:[%s7604_s28] sm:$0xf]  ;;  %v211_v9 = vld [vmem:[%s7604_s28 + $0x4] sm:$0xf]  ;;  %v243_v10 = vld [vmem:[%s7604_s28 + $0x8] sm:$0x1] }
  0x15   : > { %v263_v11 = vshrl.u32 %v210_v8, 16  ;;  %v266_v12 = vshll.u32 %v210_v8, 16  ;;  %v272_v13 = vshll.u32 %v211_v9, 16  ;;  %v276_v14 = vshrl.u32 %v211_v9, 16  ;;  %v6234_v15 = vld [vmem:[%s7604_s28 + $0xc] sm:$0xf] }
  0x16   : > { %v282_v16 = vshll.u32 %v243_v10, 16  ;;  %v7612_v17 = vld [vmem:[%s7604_s28 + $0x10] sm:$0xf]  ;;  %v7615_v18 = vld [vmem:[%s7604_s28 + $0x14] sm:$0x1]  ;;  %v2072_v26 = vshrl.u32 %v6234_v15, 16 }
  0x17   : > { %v265_v20 = vrot.slane %v263_v11, 4  ;;  %v268_v21 = vrot.slane %v266_v12, 5  ;;  %v274_v22 = vrot.slane %v272_v13, 5  ;;  %v278_v23 = vrot.slane %v276_v14, 4  ;;  %v212_v33 = vld [vmem:[%s7604_s28 + $0xc] sm:$0xf] }
  0x18   : > { %v284_v25 = vrot.slane %v282_v16, 5  ;;  %v2075_v27 = vshll.u32 %v6234_v15, 16  ;;  %v2081_v28 = vshll.u32 %v7612_v17, 16  ;;  %v2085_v31 = vshrl.u32 %v7612_v17, 16  ;;  %v213_v38 = vld [vmem:[%s7604_s28 + $0x10] sm:$0xf] }
  0x19   : > { %v269_v29 = vor.u32 %v268_v21, %v265_v20  ;;  %v279_v30 = vor.u32 %v278_v23, %v274_v22  ;;  %v2091_v32 = vshll.u32 %v7615_v18, 16  ;;  %v2074_v35 = vrot.slane %v2072_v26, 4  ;;  %v244_v46 = vld [vmem:[%s7604_s28 + $0x14] sm:$0x1]  ;;  %v6237_v57 = vld [vmem:[%s7604_s28 + $0x18] sm:$0xf] }
  0x1a   : > { %v2077_v36 = vrot.slane %v2075_v27, 5  ;;  %v2083_v37 = vrot.slane %v2081_v28, 5  ;;  %v2087_v42 = vrot.slane %v2085_v31, 4  ;;  %v287_v47 = vshrl.u32 %v212_v33, 16  ;;  %v7650_v62 = vld [vmem:[%s7604_s28 + $0x1c] sm:$0xf] }
  0x1b   : > { %v270_v40 = vrot.slane %v269_v29, 4  ;;  %v280_v41 = vrot.slane %v279_v30, 4  ;;  %v2093_v45 = vrot.slane %v2091_v32, 5  ;;  %v290_v48 = vshll.u32 %v212_v33, 16  ;;  %v7658_v4 = vld [vmem:[%s7604_s28 + $0x20] sm:$0x1] }
  0x1c   : > { %v2078_v44 = vor.u32 %v2077_v36, %v2074_v35  ;;  %v2088_v51 = vor.u32 %v2087_v42, %v2083_v37  ;;  %v296_v52 = vshll.u32 %v213_v38, 16  ;;  %v289_v55 = vrot.slane %v287_v47, 4  ;;  %v214_v20 = vld [vmem:[%s7604_s28 + $0x18] sm:$0xf]  ;;  %v215_v26 = vld [vmem:[%s7604_s28 + $0x1c] sm:$0xf] }
  0x1d   : > { %v275_v49 = vsel %vm7631_vm4, %v270_v40, %v274_v22  ;;  %v285_v50 = vsel %vm7631_vm4, %v280_v41, %v284_v25  ;;  %v292_v56 = vrot.slane %v290_v48, 5  ;;  %v300_v60 = vshrl.u32 %v213_v38, 16  ;;  %v245_v33 = vld [vmem:[%s7604_s28 + $0x20] sm:$0x1]  ;;  %v6240_v42 = vld [vmem:[%s7604_s28 + $0x24] sm:$0xf] }
  0x1e   : > { %v6056_v53 = vcombine.low %v275_v49, %v285_v50  ;;  %v2079_v54 = vrot.slane %v2078_v44, 4  ;;  %v2089_v58 = vrot.slane %v2088_v51, 4  ;;  %v298_v59 = vrot.slane %v296_v52, 5  ;;  %v7681_v48 = vld [vmem:[%s7604_s28 + $0x28] sm:$0xf]  ;;  %s7534_s17 = smov 32  }
  0x1f   : > { %v306_v61 = vshll.u32 %v244_v46, 16  ;;  %v2814_v0 = vrot.slane %v7612_v17, 5  ;;  %v2817_v1 = vrot.slane %v7615_v18, 5  ;;  %v293_v2 = vor.u32 %v292_v56, %v289_v55  ;;  %v7690_v56 = vld [vmem:[%s7604_s28 + $0x2c] sm:$0x1]  ;;  %s7535_s18 = smov 40  }
  0x20   : > { %6810 = vmatprep.mubr.msk.bf16.mxu1 %vm699_vm3, %v6056_v53  ;;  %v2084_v63 = vsel %vm7631_vm4, %v2079_v54, %v2083_v37  ;;  %v2094_v5 = vsel %vm7631_vm4, %v2089_v58, %v2093_v45  ;;  %v302_v6 = vrot.slane %v300_v60, 4  ;;  %v2096_v8 = vshrl.u32 %v6237_v57, 16  ;;  %v1368_v53 = vld [vmem:[%s10509_s1 + $0x4] sm:$0x3]  ;;  %v7890_v18 = vld [vmem:[%s7604_s28 + $0x7c] sm:$0xf] }
  0x21   : > { %v308_v7 = vrot.slane %v306_v61, 5  ;;  %v6282_v9 = vcombine.low %v2084_v63, %v2094_v5  ;;  %v294_v10 = vrot.slane %v293_v2, 4  ;;  %v2099_v11 = vshll.u32 %v6237_v57, 16  ;;  %v216_v2 = vld [vmem:[%s7604_s28 + $0x24] sm:$0xf]  ;;  %s7536_s19 = smov 56  }
  0x22   : > { %v2105_v12 = vshll.u32 %v7650_v62, 16  ;;  %v303_v13 = vor.u32 %v302_v6, %v298_v59  ;;  %v2098_v14 = vrot.slane %v2096_v8, 4  ;;  %v2109_v15 = vshrl.u32 %v7650_v62, 16  ;;  %s6055_s20 = sshll.u32 %s10798_s16, 1  ;;  %s7537_s21 = smov 112  }
  0x23   : > { %v2115_v16 = vshll.u32 %v7658_v4, 16  ;;  %6946 = vmatprep.mubr.msk.bf16.mxu0 %vm699_vm3, %v6282_v9  ;;  %v299_v21 = vsel %vm7631_vm4, %v294_v10, %v298_v59  ;;  %v2101_v22 = vrot.slane %v2099_v11, 5  ;;  %v2821_v25 = vrot.slane %v7650_v62, 5  ;;  %v217_v9 = vld [vmem:[%s7604_s28 + $0x28] sm:$0xf]  ;;  %s9862_s24 = scalar_lea.vmem %s10512_s4, %s6055_s20  ;;  %s7538_s25 = smov 64  }
  0x24   : > { %v2107_v23 = vrot.slane %v2105_v12, 5  ;;  %v304_v27 = vrot.slane %v303_v13, 4  ;;  %v2111_v28 = vrot.slane %v2109_v15, 4  ;;  %v2824_v30 = vrot.slane %v7658_v4, 5  ;;  %v246_v15 = vld [vmem:[%s7604_s28 + $0x2c] sm:$0x1] }
  0x25   : > { %v2117_v29 = vrot.slane %v2115_v16, 5  ;;  %v2102_v31 = vor.u32 %v2101_v22, %v2098_v14  ;;  %v7674_v32 = vrot.slane %v2821_v25, 4  ;;  %v311_v35 = vshrl.u32 %v214_v20, 16  ;;  %s7539_s26 = smov 72   ;;  %s7540_s27 = smov 80  }
  0x26   : > { %v314_v36 = vshll.u32 %v214_v20, 16  ;;  %v309_v37 = vsel %vm7631_vm4, %v304_v27, %v308_v7  ;;  %v2112_v38 = vor.u32 %v2111_v28, %v2107_v23  ;;  %v320_v40 = vshll.u32 %v215_v26, 16  ;;  %v6243_v27 = vld [vmem:[%s7604_s28 + $0x30] sm:$0xf]  ;;  %s7541_s29 = smov 88   ;;  %s7542_s30 = smov 96  }
  0x27   : > { %v324_v41 = vshrl.u32 %v215_v26, 16  ;;  %v6057_v44 = vcombine.low %v299_v21, %v309_v37  ;;  %v2103_v45 = vrot.slane %v2102_v31, 4  ;;  %v313_v46 = vrot.slane %v311_v35, 4  ;;  %v7710_v35 = vld [vmem:[%s7604_s28 + $0x34] sm:$0xf]  ;;  %s7543_s5 = smov 104  }
  0x28   : > { %v316_v47 = vrot.slane %v314_v36, 5  ;;  %v2113_v49 = vrot.slane %v2112_v38, 4  ;;  %v322_v50 = vrot.slane %v320_v40, 5  ;;  %v330_v52 = vshll.u32 %v245_v33, 16  ;;  %s7544_s6 = smov 120   ;;  %s6622_s7 = sshll.u32 %s10798_s16, 3 }
  0x29   : > { %v326_v51 = vrot.slane %v324_v41, 4  ;;  %6811 = vmatmul.mubr.msk.bf16.vlgmr.msra.gmra.mrb[0].mxu1 %vm699_vm3, %v6057_v44  ;;  %v2108_v54 = vsel %vm7631_vm4, %v2103_v45, %v2107_v23  ;;  %v2120_v57 = vshrl.u32 %v6240_v42, 16  ;;  %v2123_v58 = vshll.u32 %v6240_v42, 16  ;;  %v7718_v42 = vld [vmem:[%s7604_s28 + $0x38] sm:$0x1]  ;;  %s10417_s10 = scalar_lea.vmem %s10511_s3, %s6622_s7 }
  0x2a   : > { %v317_v55 = vor.u32 %v316_v47, %v313_v46  ;;  %6843 = vmatpush3.bf16.msra.mxu1 %v7618_v19  ;;  %v2118_v59 = vsel %vm7631_vm4, %v2113_v49, %v2117_v29  ;;  %v332_v61 = vrot.slane %v330_v52, 5  ;;  %v2129_v63 = vshll.u32 %v7681_v48, 16 }
  0x2b   : > { %v327_v60 = vor.u32 %v326_v51, %v322_v50  ;;  %v6283_v5 = vcombine.low %v2108_v54, %v2118_v59  ;;  %v2122_v7 = vrot.slane %v2120_v57, 4  ;;  %v2125_v8 = vrot.slane %v2123_v58, 5  ;;  %7374 = vmatprep.subr.msk.bf16.mxu1 %vm748_vm0, %v1368_v53  ;;  %v218_v54 = vld [vmem:[%s7604_s28 + $0x30] sm:$0xf] }
  0x2c   : > { %v318_v6 = vrot.slane %v317_v55, 4  ;;  %v2131_v11 = vrot.slane %v2129_v63, 5  ;;  %v2133_v19 = vshrl.u32 %v7681_v48, 16  ;;  %v2139_v12 = vshll.u32 %v7690_v56, 16 }
  0x2d   : > { %v328_v10 = vrot.slane %v327_v60, 4  ;;  %6947 = vmatmul.mubr.msk.bf16.vlgmr.msra.gmra.mrb[0].mxu0 %vm699_vm3, %v6283_v5  ;;  %v2126_v14 = vor.u32 %v2125_v8, %v2122_v7  ;;  %v335_v16 = vshrl.u32 %v216_v2, 16  ;;  %v338_v20 = vshll.u32 %v216_v2, 16  ;;  %v219_v60 = vld [vmem:[%s7604_s28 + $0x34] sm:$0xf] }
  0x2e   : > { %v323_v13 = vsel %vm7631_vm4, %v318_v6, %v322_v50  ;;  %6979 = vmatpush3.bf16.msra.mxu0 %v7641_v43  ;;  %v2135_v22 = vrot.slane %v2133_v19, 4  ;;  %v2141_v23 = vrot.slane %v2139_v12, 5  ;;  %v344_v26 = vshll.u32 %v217_v9, 16  ;;  %v247_v6 = vld [vmem:[%s7604_s28 + $0x38] sm:$0x1] }
  0x2f   : > { %v333_v21 = vsel %vm7631_vm4, %v328_v10, %v332_v61  ;;  %v2127_v29 = vrot.slane %v2126_v14, 4  ;;  %v337_v31 = vrot.slane %v335_v16, 4  ;;  %v340_v33 = vrot.slane %v338_v20, 5  ;;  %7379 = vmatprep.subr.msk.bf16.mxu0 %vm748_vm0, %v7623_v24  ;;  %v6246_v14 = vld [vmem:[%s7604_s28 + $0x3c] sm:$0xf] }
  0x30   : > { %v6058_v28 = vcombine.low %v323_v13, %v333_v21  ;;  %v2136_v36 = vor.u32 %v2135_v22, %v2131_v11  ;;  %v346_v37 = vrot.slane %v344_v26, 5  ;;  %v348_v43 = vshrl.u32 %v217_v9, 16  ;;  %v7735_v22 = vld [vmem:[%s7604_s28 + $0x40] sm:$0xf] }
  0x31   : > { %v354_v38 = vshll.u32 %v246_v15, 16  ;;  %v2132_v40 = vsel %vm7631_vm4, %v2127_v29, %v2131_v11  ;;  %v341_v41 = vor.u32 %v340_v33, %v337_v31  ;;  %v2144_v44 = vshrl.u32 %v6243_v27, 16 }
  0x32   : > { %6814 = vmatprep.mubr.msk.bf16.mxu1 %vm699_vm3, %v6058_v28  ;;  %v2147_v45 = vshll.u32 %v6243_v27, 16  ;;  %v2137_v46 = vrot.slane %v2136_v36, 4  ;;  %v350_v47 = vrot.slane %v348_v43, 4  ;;  %v2153_v24 = vshll.u32 %v7710_v35, 16  ;;  %v7740_v36 = vld [vmem:[%s7604_s28 + $0x44] sm:$0x1] }
  0x33   : > { %v356_v49 = vrot.slane %v354_v38, 5  ;;  %v342_v50 = vrot.slane %v341_v41, 4  ;;  %v2146_v51 = vrot.slane %v2144_v44, 4  ;;  %v2157_v53 = vshrl.u32 %v7710_v35, 16  ;;  %v220_v44 = vld [vmem:[%s7604_s28 + $0x3c] sm:$0xf] }
  0x34   : > { %v2149_v52 = vrot.slane %v2147_v45, 5  ;;  %v2142_v55 = vsel %vm7631_vm4, %v2137_v46, %v2141_v23  ;;  %v351_v57 = vor.u32 %v350_v47, %v346_v37  ;;  %v2155_v58 = vrot.slane %v2153_v24, 5  ;;  %v221_v24 = vld [vmem:[%s7604_s28 + $0x40] sm:$0xf] }
  0x35   : > { %v2163_v59 = vshll.u32 %v7718_v42, 16  ;;  %v6284_v61 = vcombine.low %v2132_v40, %v2142_v55  ;;  %v347_v63 = vsel %vm7631_vm4, %v342_v50, %v346_v37  ;;  %v2159_v5 = vrot.slane %v2157_v53, 4 }
  0x36   : > { %v2150_v2 = vor.u32 %v2149_v52, %v2146_v51  ;;  %v352_v7 = vrot.slane %v351_v57, 4  ;;  %v359_v9 = vshrl.u32 %v218_v54, 16  ;;  %v362_v10 = vshll.u32 %v218_v54, 16 }
  0x37   : > { %v2165_v8 = vrot.slane %v2163_v59, 5  ;;  %6950 = vmatprep.mubr.msk.bf16.mxu0 %vm699_vm3, %v6284_v61  ;;  %v2160_v19 = vor.u32 %v2159_v5, %v2155_v58  ;;  %v368_v12 = vshll.u32 %v219_v60, 16  ;;  %v372_v13 = vshrl.u32 %v219_v60, 16  ;;  %v6249_v5 = vld [vmem:[%s7604_s28 + $0x48] sm:$0xf] }
  0x38   : > { %v2151_v11 = vrot.slane %v2150_v2, 4  ;;  %v357_v15 = vsel %vm7631_vm4, %v352_v7, %v356_v49  ;;  %v361_v16 = vrot.slane %v359_v9, 4  ;;  %v364_v20 = vrot.slane %v362_v10, 5  ;;  %v7758_v10 = vld [vmem:[%s7604_s28 + $0x4c] sm:$0xf] }
  0x39   : > { %v378_v21 = vshll.u32 %v247_v6, 16  ;;  %v6059_v23 = vcombine.low %v347_v63, %v357_v15  ;;  %v2161_v27 = vrot.slane %v2160_v19, 4  ;;  %v370_v28 = vrot.slane %v368_v12, 5  ;;  %v248_v63 = vld [vmem:[%s7604_s28 + $0x44] sm:$0x1] }
  0x3a   : > { %v2156_v26 = vsel %vm7631_vm4, %v2151_v11, %v2155_v58  ;;  %v365_v29 = vor.u32 %v364_v20, %v361_v16  ;;  %v374_v31 = vrot.slane %v372_v13, 4  ;;  %v2168_v37 = vshrl.u32 %v6246_v14, 16 }
  0x3b   : > { %v380_v33 = vrot.slane %v378_v21, 5  ;;  %6815 = vmatmul.mubr.msk.bf16.gmra.mrb[4].mxu1 %vm699_vm3, %v6059_v23  ;;  %v2166_v43 = vsel %vm7631_vm4, %v2161_v27, %v2165_v8  ;;  %v2171_v38 = vshll.u32 %v6246_v14, 16  ;;  %v2177_v40 = vshll.u32 %v7735_v22, 16 }
  0x3c   : > { %v2181_v41 = vshrl.u32 %v7735_v22, 16  ;;  %v6285_v45 = vcombine.low %v2156_v26, %v2166_v43  ;;  %v366_v46 = vrot.slane %v365_v29, 4  ;;  %v375_v47 = vor.u32 %v374_v31, %v370_v28  ;;  %v7766_v26 = vld [vmem:[%s7604_s28 + $0x50] sm:$0x1]  ;;  %v7770_v29 = vld [vmem:[%s7604_s28 + $0x48] sm:$0xf] }
  0x3d   : > { %v2170_v49 = vrot.slane %v2168_v37, 4  ;;  %v2173_v50 = vrot.slane %v2171_v38, 5  ;;  %v2179_v51 = vrot.slane %v2177_v40, 5  ;;  %v2187_v53 = vshll.u32 %v7740_v36, 16  ;;  %v7773_v38 = vld [vmem:[%s7604_s28 + $0x4c] sm:$0xf] }
  0x3e   : > { %v2183_v52 = vrot.slane %v2181_v41, 4  ;;  %6951 = vmatmul.mubr.msk.bf16.gmra.mrb[4].mxu0 %vm699_vm3, %v6285_v45  ;;  %v371_v54 = vsel %vm7631_vm4, %v366_v46, %v370_v28  ;;  %v376_v55 = vrot.slane %v375_v47, 4  ;;  %v383_v57 = vshrl.u32 %v220_v44, 16 }
  0x3f   : > { %v386_v58 = vshll.u32 %v220_v44, 16  ;;  %v2174_v59 = vor.u32 %v2173_v50, %v2170_v49  ;;  %v2189_v61 = vrot.slane %v2187_v53, 5  ;;  %v392_v2 = vshll.u32 %v221_v24, 16 }
  0x40   : > { %v2184_v60 = vor.u32 %v2183_v52, %v2179_v51  ;;  %v381_v6 = vsel %vm7631_vm4, %v376_v55, %v380_v33  ;;  %v385_v7 = vrot.slane %v383_v57, 4  ;;  %v396_v9 = vshrl.u32 %v221_v24, 16  ;;  %v249_v24 = vld [vmem:[%s7604_s28 + $0x50] sm:$0x1]  ;;  %v6252_v55 = vld [vmem:[%s7604_s28 + $0x54] sm:$0xf] }
  0x41   : > { %v388_v8 = vrot.slane %v386_v58, 5  ;;  %v6060_v11 = vcombine.low %v371_v54, %v381_v6  ;;  %v2175_v19 = vrot.slane %v2174_v59, 4  ;;  %v394_v13 = vrot.slane %v392_v2, 5  ;;  %v7789_v6 = vld [vmem:[%s7604_s28 + $0x58] sm:$0xf] }
  0x42   : > { %v2185_v12 = vrot.slane %v2184_v60, 4  ;;  %v398_v15 = vrot.slane %v396_v9, 4  ;;  %v402_v16 = vshll.u32 %v248_v63, 16  ;;  %v2192_v20 = vshrl.u32 %v6249_v5, 16 }
  0x43   : > { %v389_v14 = vor.u32 %v388_v8, %v385_v7  ;;  %6818 = vmatprep.mubr.msk.bf16.mxu1 %vm699_vm3, %v6060_v11  ;;  %v2180_v21 = vsel %vm7631_vm4, %v2175_v19, %v2179_v51  ;;  %v2195_v27 = vshll.u32 %v6249_v5, 16  ;;  %v2201_v28 = vshll.u32 %v7758_v10, 16 }
  0x44   : > { %v2190_v23 = vsel %vm7631_vm4, %v2185_v12, %v2189_v61  ;;  %v399_v37 = vor.u32 %v398_v15, %v394_v13  ;;  %v404_v43 = vrot.slane %v402_v16, 5  ;;  %v2194_v40 = vrot.slane %v2192_v20, 4 }
  0x45   : > { %v6286_v31 = vcombine.low %v2180_v21, %v2190_v23  ;;  %v390_v33 = vrot.slane %v389_v14, 4  ;;  %v2197_v41 = vrot.slane %v2195_v27, 5  ;;  %v2203_v44 = vrot.slane %v2201_v28, 5  ;;  %v7795_v14 = vld [vmem:[%s7604_s28 + $0x5c] sm:$0x1] }
  0x46   : > { %v2205_v45 = vshrl.u32 %v7758_v10, 16  ;;  %v400_v47 = vrot.slane %v399_v37, 4  ;;  %v2211_v49 = vshll.u32 %v7766_v26, 16  ;;  %v407_v50 = vshrl.u32 %v7770_v29, 16  ;;  %v7799_v27 = vld [vmem:[%s7604_s28 + $0x54] sm:$0xf] }
  0x47   : > { %6954 = vmatprep.mubr.msk.bf16.mxu0 %vm699_vm3, %v6286_v31  ;;  %v395_v46 = vsel %vm7631_vm4, %v390_v33, %v394_v13  ;;  %v2198_v51 = vor.u32 %v2197_v41, %v2194_v40  ;;  %v410_v53 = vshll.u32 %v7770_v29, 16  ;;  %v416_v54 = vshll.u32 %v7773_v38, 16 }
  0x48   : > { %v2207_v52 = vrot.slane %v2205_v45, 4  ;;  %v405_v57 = vsel %vm7631_vm4, %v400_v47, %v404_v43  ;;  %v2213_v58 = vrot.slane %v2211_v49, 5  ;;  %v409_v59 = vrot.slane %v407_v50, 4  ;;  %v7805_v43 = vld [vmem:[%s7604_s28 + $0x58] sm:$0xf] }
  0x49   : > { %v420_v60 = vshrl.u32 %v7773_v38, 16  ;;  %v6061_v61 = vcombine.low %v395_v46, %v405_v57  ;;  %v2199_v63 = vrot.slane %v2198_v51, 4  ;;  %v412_v5 = vrot.slane %v410_v53, 5 }
  0x4a   : > { %v2208_v2 = vor.u32 %v2207_v52, %v2203_v44  ;;  %v418_v7 = vrot.slane %v416_v54, 5  ;;  %v426_v9 = vshll.u32 %v249_v24, 16  ;;  %v2216_v11 = vshrl.u32 %v6252_v55, 16  ;;  %v250_v24 = vld [vmem:[%s7604_s28 + $0x5c] sm:$0x1] }
  0x4b   : > { %v422_v8 = vrot.slane %v420_v60, 4  ;;  %6819 = vmatmul.mubr.msk.bf16.gmra.mrb[8].mxu1 %vm699_vm3, %v6061_v61  ;;  %v2204_v19 = vsel %vm7631_vm4, %v2199_v63, %v2203_v44  ;;  %v413_v13 = vor.u32 %v412_v5, %v409_v59  ;;  %v2219_v15 = vshll.u32 %v6252_v55, 16  ;;  %v6255_v55 = vld [vmem:[%s7604_s28 + $0x60] sm:$0xf]  ;;  %v7819_v61 = vld [vmem:[%s7604_s28 + $0x64] sm:$0xf] }
  0x4c   : > { %v2209_v12 = vrot.slane %v2208_v2, 4  ;;  %v428_v20 = vrot.slane %v426_v9, 5  ;;  %v2218_v21 = vrot.slane %v2216_v11, 4  ;;  %v2225_v23 = vshll.u32 %v7789_v6, 16  ;;  %v7826_v11 = vld [vmem:[%s7604_s28 + $0x68] sm:$0x1] }
  0x4d   : > { %v423_v16 = vor.u32 %v422_v8, %v418_v7  ;;  %v414_v31 = vrot.slane %v413_v13, 4  ;;  %v2221_v33 = vrot.slane %v2219_v15, 5  ;;  %v2229_v37 = vshrl.u32 %v7789_v6, 16 }
  0x4e   : > { %v2214_v28 = vsel %vm7631_vm4, %v2209_v12, %v2213_v58  ;;  %v2227_v44 = vrot.slane %v2225_v23, 5  ;;  %v2235_v45 = vshll.u32 %v7795_v14, 16  ;;  %v431_v50 = vshrl.u32 %v7799_v27, 16 }
  0x4f   : > { %v6287_v40 = vcombine.low %v2204_v19, %v2214_v28  ;;  %v424_v41 = vrot.slane %v423_v16, 4  ;;  %v419_v46 = vsel %vm7631_vm4, %v414_v31, %v418_v7  ;;  %v2222_v47 = vor.u32 %v2221_v33, %v2218_v21  ;;  %v7830_v21 = vld [vmem:[%s7604_s28 + $0x60] sm:$0xf] }
  0x50   : > { %v2231_v49 = vrot.slane %v2229_v37, 4  ;;  %v2237_v52 = vrot.slane %v2235_v45, 5  ;;  %v434_v53 = vshll.u32 %v7799_v27, 16  ;;  %v440_v54 = vshll.u32 %v7805_v43, 16  ;;  %v7836_v37 = vld [vmem:[%s7604_s28 + $0x64] sm:$0xf] }
  0x51   : > { %6955 = vmatmul.mubr.msk.bf16.gmra.mrb[8].mxu0 %vm699_vm3, %v6287_v40  ;;  %v429_v51 = vsel %vm7631_vm4, %v424_v41, %v428_v20  ;;  %v2223_v58 = vrot.slane %v2222_v47, 4  ;;  %v433_v60 = vrot.slane %v431_v50, 4  ;;  %v444_v5 = vshrl.u32 %v7805_v43, 16 }
  0x52   : > { %v6062_v57 = vcombine.low %v419_v46, %v429_v51  ;;  %v2232_v59 = vor.u32 %v2231_v49, %v2227_v44  ;;  %v436_v63 = vrot.slane %v434_v53, 5  ;;  %v442_v2 = vrot.slane %v440_v54, 5 }
  0x53   : > { %v450_v7 = vshll.u32 %v250_v24, 16  ;;  %v2228_v8 = vsel %vm7631_vm4, %v2223_v58, %v2227_v44  ;;  %v2240_v19 = vshrl.u32 %v6255_v55, 16  ;;  %v2243_v12 = vshll.u32 %v6255_v55, 16 }
  0x54   : > { %6822 = vmatprep.mubr.msk.bf16.mxu1 %vm699_vm3, %v6062_v57  ;;  %v2233_v9 = vrot.slane %v2232_v59, 4  ;;  %v437_v13 = vor.u32 %v436_v63, %v433_v60  ;;  %v446_v15 = vrot.slane %v444_v5, 4  ;;  %v2249_v20 = vshll.u32 %v7819_v61, 16  ;;  %v6314_v60 = vld [vmem:[%s7604_s28 + $0xc] sm:$0xe] }
  0x55   : > { %v452_v16 = vrot.slane %v450_v7, 5  ;;  %v2242_v28 = vrot.slane %v2240_v19, 4  ;;  %v2245_v31 = vrot.slane %v2243_v12, 5  ;;  %v2253_v33 = vshrl.u32 %v7819_v61, 16 }
  0x56   : > { %v2238_v23 = vsel %vm7631_vm4, %v2233_v9, %v2237_v52  ;;  %v438_v41 = vrot.slane %v437_v13, 4  ;;  %v447_v44 = vor.u32 %v446_v15, %v442_v2  ;;  %v2251_v45 = vrot.slane %v2249_v20, 5  ;;  %v251_v52 = vld [vmem:[%s7604_s28 + $0x68] sm:$0x1] }
  0x57   : > { %v6288_v40 = vcombine.low %v2228_v8, %v2238_v23  ;;  %v2246_v46 = vor.u32 %v2245_v31, %v2242_v28  ;;  %v2255_v47 = vrot.slane %v2253_v33, 4  ;;  %v2259_v49 = vshll.u32 %v7826_v11, 16  ;;  %v7864_v31 = vld [vmem:[%s7604_s28 + $0x70] sm:$0xf] }
  0x58   : > { %v455_v24 = vshrl.u32 %v7830_v21, 16  ;;  %v443_v50 = vsel %vm7631_vm4, %v438_v41, %v442_v2  ;;  %v448_v51 = vrot.slane %v447_v44, 4  ;;  %v458_v53 = vshll.u32 %v7830_v21, 16  ;;  %v7851_v2 = vld [vmem:[%s7604_s28 + $0x6c] sm:$0xf] }
  0x59   : > { %6958 = vmatprep.mubr.msk.bf16.mxu0 %vm699_vm3, %v6288_v40  ;;  %v464_v54 = vshll.u32 %v7836_v37, 16  ;;  %v2247_v55 = vrot.slane %v2246_v46, 4  ;;  %v2256_v57 = vor.u32 %v2255_v47, %v2251_v45  ;;  %v2261_v58 = vrot.slane %v2259_v49, 5 }
  0x5a   : > { %v457_v59 = vrot.slane %v455_v24, 4  ;;  %v453_v63 = vsel %vm7631_vm4, %v448_v51, %v452_v16  ;;  %v460_v5 = vrot.slane %v458_v53, 5  ;;  %v468_v8 = vshrl.u32 %v7836_v37, 16  ;;  %v252_v24 = vld [vmem:[%s7604_s28 + $0x74] sm:$0x1] }
  0x5b   : > { %v466_v7 = vrot.slane %v464_v54, 5  ;;  %v6063_v9 = vcombine.low %v443_v50, %v453_v63  ;;  %v2252_v19 = vsel %vm7631_vm4, %v2247_v55, %v2251_v45  ;;  %v2257_v12 = vrot.slane %v2256_v57, 4  ;;  %v6315_v50 = vld [vmem:[%s7604_s28 + $0x18] sm:$0xe] }
  0x5c   : > { %v474_v13 = vshll.u32 %v251_v52, 16  ;;  %v461_v16 = vor.u32 %v460_v5, %v457_v59  ;;  %v470_v20 = vrot.slane %v468_v8, 4  ;;  %v6330_v23 = vrot.slane %v6314_v60, 9  ;;  %v7883_v55 = vld [vmem:[%s7604_s28 + $0x78] sm:$0xf] }
  0x5d   : > { %v2816_v28 = vrot.slane %v2814_v0, 4  ;;  %6823 = vmatmul.mubr.msk.bf16.gmra.mrb[12].mxu1 %vm699_vm3, %v6063_v9  ;;  %v2262_v33 = vsel %vm7631_vm4, %v2257_v12, %v2261_v58  ;;  %v479_v41 = vshrl.u32 %v7851_v2, 16  ;;  %v482_v44 = vshll.u32 %v7851_v2, 16  ;;  %v253_v59 = vld [vmem:[%s7604_s28 + $0x80] sm:$0x1] }
  0x5e   : > { %v476_v40 = vrot.slane %v474_v13, 5  ;;  %v6289_v45 = vcombine.low %v2252_v19, %v2262_v33  ;;  %v462_v46 = vrot.slane %v461_v16, 4  ;;  %v471_v47 = vor.u32 %v470_v20, %v466_v7 }
  0x5f   : > { %v2815_v49 = vsel %vm7857_vm7, %v6330_v23, %v2814_v0  ;;  %v2818_v51 = vsel %vm7857_vm7, %v2816_v28, %v2817_v1  ;;  %v481_v52 = vrot.slane %v479_v41, 4  ;;  %v484_v53 = vrot.slane %v482_v44, 5  ;;  %v6316_v23 = vld [vmem:[%s7604_s28 + $0x24] sm:$0xe] }
  0x60   : > { %v488_v54 = vshll.u32 %v7864_v31, 16  ;;  %6959 = vmatmul.mubr.msk.bf16.gmra.mrb[12].mxu0 %vm699_vm3, %v6289_v45  ;;  %v467_v17 = vsel %vm7631_vm4, %v462_v46, %v466_v7  ;;  %v472_v57 = vrot.slane %v471_v47, 4  ;;  %v6346_v0 = vcombine.low %v2815_v49, %v2818_v51  ;;  %v7909_v41 = vld [vmem:[%s7604_s28 + $0x84] sm:$0xf] }
  0x61   : > { %v492_v58 = vshrl.u32 %v7864_v31, 16  ;;  %v485_v1 = vor.u32 %v484_v53, %v481_v52  ;;  %v498_v63 = vshll.u32 %v252_v24, 16  ;;  %v6331_v5 = vrot.slane %v6315_v50, 9  ;;  %v254_v53 = vld [vmem:[%s7604_s28 + $0x8c] sm:$0x1] }
  0x62   : > { %v490_v60 = vrot.slane %v488_v54, 5  ;;  %v477_v8 = vsel %vm7631_vm4, %v472_v57, %v476_v40  ;;  %6980 = vmatprep.mubr.msk.bf16.mxu0 %vm699_vm3, %v6346_v0  ;;  %v2825_v7 = vsel %vm7857_vm7, %v7674_v32, %v2824_v30  ;;  %v503_v19 = vshrl.u32 %v7883_v55, 16 }
  0x63   : > { %v494_v9 = vrot.slane %v492_v58, 4  ;;  %v6064_v12 = vcombine.low %v467_v17, %v477_v8  ;;  %v486_v13 = vrot.slane %v485_v1, 4  ;;  %v500_v16 = vrot.slane %v498_v63, 5  ;;  %v6317_v58 = vld [vmem:[%s7604_s28 + $0x30] sm:$0xe] }
  0x64   : > { %v2822_v20 = vsel %vm7857_vm7, %v6331_v5, %v2821_v25  ;;  %v505_v40 = vrot.slane %v503_v19, 4  ;;  %v506_v4 = vshll.u32 %v7883_v55, 16  ;;  %v512_v32 = vshll.u32 %v7890_v18, 16  ;;  %v7917_v25 = vld [vmem:[%s7604_s28 + $0x88] sm:$0xf] }
  0x65   : > { %v495_v28 = vor.u32 %v494_v9, %v490_v60  ;;  %v6347_v33 = vcombine.low %v2822_v20, %v2825_v7  ;;  %6826 = vmatprep.mubr.msk.bf16.mxu1 %vm699_vm3, %v6064_v12  ;;  %v491_v30 = vsel %vm7631_vm4, %v486_v13, %v490_v60  ;;  %v516_v62 = vshrl.u32 %v7890_v18, 16  ;;  %v7936_v9 = vld [vmem:[%s7604_s28 + $0x90] sm:$0xf] }
  0x66   : > { %v522_v44 = vshll.u32 %v253_v59, 16  ;;  %v508_v46 = vrot.slane %v506_v4, 5  ;;  %v6332_v47 = vrot.slane %v6316_v23, 9  ;;  %v2828_v49 = vrot.slane %v7681_v48, 5 }
  0x67   : > { %v496_v45 = vrot.slane %v495_v28, 4  ;;  %v514_v24 = vrot.slane %v512_v32, 5  ;;  %v518_v50 = vrot.slane %v516_v62, 4  ;;  %v2831_v52 = vrot.slane %v7690_v56, 5 }
  0x68   : > { %v524_v51 = vrot.slane %v522_v44, 5  ;;  %6981 = vmatmul.mubr.msk.bf16.vlgmr.msra.gmra.mrb[0].mxu0 %vm699_vm3, %v6347_v33  ;;  %v509_v17 = vor.u32 %v508_v46, %v505_v40  ;;  %v2829_v57 = vsel %vm7857_vm7, %v6332_v47, %v2828_v49  ;;  %v2830_v0 = vrot.slane %v2828_v49, 4  ;;  %v255_v46 = vld [vmem:[%s7604_s28 + $0x98] sm:$0x1]  ;;  %v6318_v47 = vld [vmem:[%s7604_s28 + $0x3c] sm:$0xe] }
  0x69   : > { %v501_v54 = vsel %vm7631_vm4, %v496_v45, %v500_v16  ;;  %7013 = vmatpush3.bf16.msra.mxu0 %v7638_v39  ;;  %v519_v48 = vor.u32 %v518_v50, %v514_v24  ;;  %v527_v1 = vshrl.u32 %v7909_v41, 16  ;;  %v530_v56 = vshll.u32 %v7909_v41, 16 }
  0x6a   : > { %v6065_v59 = vcombine.low %v491_v30, %v501_v54  ;;  %v510_v60 = vrot.slane %v509_v17, 4  ;;  %v2832_v63 = vsel %vm7857_vm7, %v2830_v0, %v2831_v52  ;;  %v536_v5 = vshll.u32 %v7917_v25, 16  ;;  %v7946_v30 = vld [vmem:[%s7604_s28 + $0x94] sm:$0xf] }
  0x6b   : > { %v540_v8 = vshrl.u32 %v7917_v25, 16  ;;  %v520_v7 = vrot.slane %v519_v48, 4  ;;  %v6348_v39 = vcombine.low %v2829_v57, %v2832_v63  ;;  %v529_v19 = vrot.slane %v527_v1, 4 }
  0x6c   : > { %6827 = vmatmul.mubr.msk.bf16.gmra.mrb[16].mxu1 %vm699_vm3, %v6065_v59  ;;  %v532_v12 = vrot.slane %v530_v56, 5  ;;  %v515_v13 = vsel %vm7631_vm4, %v510_v60, %v514_v24  ;;  %v538_v16 = vrot.slane %v536_v5, 5  ;;  %v546_v23 = vshll.u32 %v254_v53, 16  ;;  %v7968_v60 = vld [vmem:[%s7604_s28 + $0xa0] sm:$0xf] }
  0x6d   : > { %v542_v20 = vrot.slane %v540_v8, 4  ;;  %v525_v28 = vsel %vm7631_vm4, %v520_v7, %v524_v51  ;;  %6984 = vmatprep.mubr.msk.bf16.mxu0 %vm699_vm3, %v6348_v39  ;;  %v6333_v40 = vrot.slane %v6317_v58, 9  ;;  %v2835_v4 = vrot.slane %v7710_v35, 5  ;;  %v7963_v58 = vld [vmem:[%s7604_s28 + $0x9c] sm:$0xf] }
  0x6e   : > { %v533_v33 = vor.u32 %v532_v12, %v529_v19  ;;  %v6066_v32 = vcombine.low %v515_v13, %v525_v28  ;;  %v548_v44 = vrot.slane %v546_v23, 5  ;;  %v2838_v45 = vrot.slane %v7718_v42, 5  ;;  %v256_v39 = vld [vmem:[%s7604_s28 + $0xa4] sm:$0x1] }
  0x6f   : > { %v543_v62 = vor.u32 %v542_v20, %v538_v16  ;;  %v2836_v24 = vsel %vm7857_vm7, %v6333_v40, %v2835_v4  ;;  %v2837_v50 = vrot.slane %v2835_v4, 4  ;;  %v551_v51 = vshrl.u32 %v7936_v9, 16  ;;  %v6319_v40 = vld [vmem:[%s7604_s28 + $0x48] sm:$0xe] }
  0x70   : > { %v534_v49 = vrot.slane %v533_v33, 4  ;;  %6830 = vmatprep.mubr.msk.bf16.mxu1 %vm699_vm3, %v6066_v32  ;;  %v554_v52 = vshll.u32 %v7936_v9, 16  ;;  %v560_v53 = vshll.u32 %v7946_v30, 16  ;;  %v564_v42 = vshrl.u32 %v7946_v30, 16 }
  0x71   : > { %v544_v35 = vrot.slane %v543_v62, 4  ;;  %v2839_v17 = vsel %vm7857_vm7, %v2837_v50, %v2838_v45  ;;  %v553_v57 = vrot.slane %v551_v51, 4  ;;  %v570_v0 = vshll.u32 %v255_v46, 16  ;;  %v7987_v51 = vld [vmem:[%s7604_s28 + $0xa8] sm:$0xf] }
  0x72   : > { %v539_v54 = vsel %vm7631_vm4, %v534_v49, %v538_v16  ;;  %v6349_v48 = vcombine.low %v2836_v24, %v2839_v17  ;;  %v556_v1 = vrot.slane %v554_v52, 5  ;;  %v562_v56 = vrot.slane %v560_v53, 5 }
  0x73   : > { %v549_v59 = vsel %vm7631_vm4, %v544_v35, %v548_v44  ;;  %v566_v5 = vrot.slane %v564_v42, 4  ;;  %v572_v8 = vrot.slane %v570_v0, 5  ;;  %v6334_v7 = vrot.slane %v6318_v47, 9 }
  0x74   : > { %v6067_v63 = vcombine.low %v539_v54, %v549_v59  ;;  %6985 = vmatmul.mubr.msk.bf16.gmra.mrb[4].mxu0 %vm699_vm3, %v6349_v48  ;;  %v557_v19 = vor.u32 %v556_v1, %v553_v57  ;;  %v2842_v12 = vrot.slane %v7735_v22, 5  ;;  %v2845_v13 = vrot.slane %v7740_v36, 5  ;;  %v7992_v54 = vld [vmem:[%s7604_s28 + $0xac] sm:$0xf]  ;;  %v7997_v48 = vld [vmem:[%s7604_s28 + $0xb0] sm:$0x1] }
  0x75   : > { %v575_v16 = vshrl.u32 %v7963_v58, 16  ;;  %v567_v20 = vor.u32 %v566_v5, %v562_v56  ;;  %v578_v23 = vshll.u32 %v7963_v58, 16  ;;  %v584_v28 = vshll.u32 %v7968_v60, 16  ;;  %v6320_v1 = vld [vmem:[%s7604_s28 + $0x54] sm:$0xe] }
  0x76   : > { %6831 = vmatmul.mubr.msk.bf16.gmra.mrb[20].mxu1 %vm699_vm3, %v6067_v63  ;;  %v588_v33 = vshrl.u32 %v7968_v60, 16  ;;  %v558_v4 = vrot.slane %v557_v19, 4  ;;  %v2843_v32 = vsel %vm7857_vm7, %v6334_v7, %v2842_v12  ;;  %v2844_v22 = vrot.slane %v2842_v12, 4  ;;  %v8004_v7 = vld [vmem:[%s7604_s28 + $0xb4] sm:$0xf] }
  0x77   : > { %v577_v36 = vrot.slane %v575_v16, 4  ;;  %v568_v62 = vrot.slane %v567_v20, 4  ;;  %v580_v44 = vrot.slane %v578_v23, 5  ;;  %v586_v45 = vrot.slane %v584_v28, 5  ;;  %v8016_v23 = vld [vmem:[%s7604_s28 + $0xb8] sm:$0xf] }
  0x78   : > { %v590_v46 = vrot.slane %v588_v33, 4  ;;  %v563_v47 = vsel %vm7631_vm4, %v558_v4, %v562_v56  ;;  %v2846_v49 = vsel %vm7857_vm7, %v2844_v22, %v2845_v13  ;;  %v594_v24 = vshll.u32 %v256_v39, 16 }
  0x79   : > { %v6335_v50 = vrot.slane %v6319_v40, 9  ;;  %v573_v35 = vsel %vm7631_vm4, %v568_v62, %v572_v8  ;;  %v6350_v52 = vcombine.low %v2843_v32, %v2846_v49  ;;  %v581_v53 = vor.u32 %v580_v44, %v577_v36 }
  0x7a   : > { %v591_v42 = vor.u32 %v590_v46, %v586_v45  ;;  %v6068_v17 = vcombine.low %v563_v47, %v573_v35  ;;  %v596_v57 = vrot.slane %v594_v24, 5  ;;  %v2849_v0 = vrot.slane %v7758_v10, 5  ;;  %v258_v47 = vld [vmem:[%s7604_s28 + $0xbc] sm:$0x1] }
  0x7b   : > { %v2852_v59 = vrot.slane %v7766_v26, 5  ;;  %6988 = vmatprep.mubr.msk.bf16.mxu0 %vm699_vm3, %v6350_v52  ;;  %v582_v56 = vrot.slane %v581_v53, 4  ;;  %v599_v5 = vshrl.u32 %v7987_v51, 16  ;;  %v602_v8 = vshll.u32 %v7987_v51, 16  ;;  %v6321_v53 = vld [vmem:[%s7604_s28 + $0x60] sm:$0xe] }
  0x7c   : > { %v592_v63 = vrot.slane %v591_v42, 4  ;;  %6834 = vmatprep.mubr.msk.bf16.mxu1 %vm699_vm3, %v6068_v17  ;;  %v2850_v10 = vsel %vm7857_vm7, %v6335_v50, %v2849_v0  ;;  %v2851_v26 = vrot.slane %v2849_v0, 4  ;;  %v608_v39 = vshll.u32 %v7992_v54, 16 }
  0x7d   : > { %v612_v19 = vshrl.u32 %v7992_v54, 16  ;;  %v587_v12 = vsel %vm7631_vm4, %v582_v56, %v586_v45  ;;  %v601_v16 = vrot.slane %v599_v5, 4  ;;  %v604_v20 = vrot.slane %v602_v8, 5  ;;  %v6322_v56 = vld [vmem:[%s7604_s28 + $0x6c] sm:$0xe] }
  0x7e   : > { %v597_v13 = vsel %vm7631_vm4, %v592_v63, %v596_v57  ;;  %v2853_v33 = vsel %vm7857_vm7, %v2851_v26, %v2852_v59  ;;  %v610_v40 = vrot.slane %v608_v39, 5  ;;  %v618_v36 = vshll.u32 %v7997_v48, 16  ;;  %v6259_v26 = vld [vmem:[%s7604_s28 + $0x70] sm:$0xf]  ;;  %v6260_v39 = vld [vmem:[%s7604_s28 + $0x74] sm:$0x1] }
  0x7f   : > { %v6069_v28 = vcombine.low %v587_v12, %v597_v13  ;;  %v614_v4 = vrot.slane %v612_v19, 4  ;;  %v6351_v32 = vcombine.low %v2850_v10, %v2853_v33  ;;  %v605_v22 = vor.u32 %v604_v20, %v601_v16 }
  0x80   : > { %v6336_v62 = vrot.slane %v6320_v1, 9  ;;  %v2856_v45 = vrot.slane %v7789_v6, 5  ;;  %v2859_v46 = vrot.slane %v7795_v14, 5  ;;  %v623_v49 = vshrl.u32 %v8004_v7, 16 }
  0x81   : > { %6835 = vmatmul.mubr.msk.bf16.gmra.mrb[24].mxu1 %vm699_vm3, %v6069_v28  ;;  %v615_v44 = vor.u32 %v614_v4, %v610_v40  ;;  %6989 = vmatmul.mubr.msk.bf16.gmra.mrb[8].mxu0 %vm699_vm3, %v6351_v32  ;;  %v606_v24 = vrot.slane %v605_v22, 4  ;;  %v620_v50 = vrot.slane %v618_v36, 5  ;;  %v626_v35 = vshll.u32 %v8004_v7, 16 }
  0x82   : > { %v632_v52 = vshll.u32 %v8016_v23, 16  ;;  %v2857_v6 = vsel %vm7857_vm7, %v6336_v62, %v2856_v45  ;;  %v2858_v14 = vrot.slane %v2856_v45, 4  ;;  %v625_v17 = vrot.slane %v623_v49, 4 }
  0x83   : > { %v616_v42 = vrot.slane %v615_v44, 4  ;;  %v611_v57 = vsel %vm7631_vm4, %v606_v24, %v610_v40  ;;  %v628_v0 = vrot.slane %v626_v35, 5  ;;  %v636_v1 = vshrl.u32 %v8016_v23, 16  ;;  %v6323_v44 = vld [vmem:[%s7604_s28 + $0x78] sm:$0xe] }
  0x84   : > { %v634_v59 = vrot.slane %v632_v52, 5  ;;  %v2860_v5 = vsel %vm7857_vm7, %v2858_v14, %v2859_v46  ;;  %v642_v8 = vshll.u32 %v258_v47, 16  ;;  %v6337_v10 = vrot.slane %v6321_v53, 9  ;;  %v7461_v24 = vld [vmem:[%s7604_s28] sm:$0xf] }
  0x85   : > { %v621_v63 = vsel %vm7631_vm4, %v616_v42, %v620_v50  ;;  %v6352_v12 = vcombine.low %v2857_v6, %v2860_v5  ;;  %v629_v13 = vor.u32 %v628_v0, %v625_v17  ;;  %v638_v16 = vrot.slane %v636_v1, 4  ;;  %v8057_v50 = vld [vmem:[%s7604_s28 + $0x4] sm:$0xf]  ;;  %v8061_v52 = vld [vmem:[%s7604_s28 + $0x7c] sm:$0xf] }
  0x86   : > { %v6070_v19 = vcombine.low %v611_v57, %v621_v63  ;;  %v644_v20 = vrot.slane %v642_v8, 5  ;;  %v2863_v28 = vrot.slane %v7819_v61, 5  ;;  %v2866_v33 = vrot.slane %v7826_v11, 5  ;;  %v8064_v53 = vld [vmem:[%s7604_s28 + $0x80] sm:$0x1] }
  0x87   : > { %v6338_v40 = vrot.slane %v6322_v56, 9  ;;  %6992 = vmatprep.mubr.msk.bf16.mxu0 %vm699_vm3, %v6352_v12  ;;  %v630_v4 = vrot.slane %v629_v13, 4  ;;  %v639_v32 = vor.u32 %v638_v16, %v634_v59  ;;  %v2870_v22 = vrot.slane %v6259_v26, 5  ;;  %v6265_v42 = vld [vmem:[%s7604_s28 + $0x88] sm:$0xf] }
  0x88   : > { %6838 = vmatprep.mubr.msk.bf16.mxu1 %vm699_vm3, %v6070_v19  ;;  %v2873_v36 = vrot.slane %v6260_v39, 5  ;;  %v2864_v62 = vsel %vm7857_vm7, %v6337_v10, %v2863_v28  ;;  %v2865_v61 = vrot.slane %v2863_v28, 4  ;;  %v6089_v35 = vcombine.low %v7461_v24, %v8057_v50  ;;  %v6266_v0 = vld [vmem:[%s7604_s28 + $0x8c] sm:$0x1]  ;;  %v6268_v8 = vld [vmem:[%s7604_s28 + $0x94] sm:$0xf] }
  0x89   : > { %v635_v11 = vsel %vm7631_vm4, %v630_v4, %v634_v59  ;;  %v640_v45 = vrot.slane %v639_v32, 4  ;;  %v2871_v46 = vsel %vm7857_vm7, %v6338_v40, %v2870_v22  ;;  %v2872_v47 = vrot.slane %v2870_v22, 4  ;;  %v6324_v59 = vld [vmem:[%s7604_s28 + $0x84] sm:$0xe]  ;;  %v6325_v19 = vld [vmem:[%s7604_s28 + $0x90] sm:$0xe] }
  0x8a   : > { %v2867_v49 = vsel %vm7857_vm7, %v2865_v61, %v2866_v33  ;;  %v6339_v57 = vrot.slane %v6323_v44, 9  ;;  %v2877_v63 = vrot.slane %v8061_v52, 5  ;;  %v2880_v5 = vrot.slane %v8064_v53, 5  ;;  %v6269_v16 = vld [vmem:[%s7604_s28 + $0x98] sm:$0x1] }
  0x8b   : > { %v645_v6 = vsel %vm7631_vm4, %v640_v45, %v644_v20  ;;  %v6353_v14 = vcombine.low %v2864_v62, %v2867_v49  ;;  %v2874_v17 = vsel %vm7857_vm7, %v2872_v47, %v2873_v36  ;;  %v6340_v10 = vrot.slane %v6324_v59, 9  ;;  %v6271_v20 = vld [vmem:[%s7604_s28 + $0xa0] sm:$0xf]  ;;  %v6272_v4 = vld [vmem:[%s7604_s28 + $0xa4] sm:$0x1] }
  0x8c   : > { %v6071_v1 = vcombine.low %v635_v11, %v645_v6  ;;  %v6354_v56 = vcombine.low %v2871_v46, %v2874_v17  ;;  %v2884_v26 = vrot.slane %v6265_v42, 5  ;;  %v2887_v39 = vrot.slane %v6266_v0, 5  ;;  %v6326_v32 = vld [vmem:[%s7604_s28 + $0x9c] sm:$0xe]  ;;  %v7463_v22 = vld [vmem:[%s7604_s28 + $0xc] sm:$0xf] }
  0x8d   : > { %6993 = vmatmul.mubr.msk.bf16.gmra.mrb[12].mxu0 %vm699_vm3, %v6353_v14  ;;  %v2878_v12 = vsel %vm7857_vm7, %v6339_v57, %v2877_v63  ;;  %v2879_v13 = vrot.slane %v2877_v63, 4  ;;  %v2891_v40 = vrot.slane %v6268_v8, 5  ;;  %v8091_v36 = vld [vmem:[%s7604_s28 + $0x10] sm:$0xf]  ;;  %v7465_v44 = vld [vmem:[%s7604_s28 + $0x18] sm:$0xf] }
  0x8e   : > { %6839 = vmatmul.mubr.msk.bf16.gmra.mrb[28].mxu1 %vm699_vm3, %v6071_v1  ;;  %6996 = vmatprep.mubr.msk.bf16.mxu0 %vm699_vm3, %v6354_v56  ;;  %v2885_v28 = vsel %vm7857_vm7, %v6340_v10, %v2884_v26  ;;  %v2886_v33 = vrot.slane %v2884_v26, 4  ;;  %v6090_v62 = vcombine.low %v7463_v22, %v8091_v36  ;;  %v8098_v11 = vld [vmem:[%s7604_s28 + $0x1c] sm:$0xf]  ;;  %v6341_v46 = vrot.slane %v6325_v19, 9  ;;  %v6274_v57 = vld [vmem:[%s7604_s28 + $0xac] sm:$0xf] }
  0x8f   : > { %6844 = vmatprep.mubr.msk.bf16.mxu1 %vm699_vm3, %v6089_v35  ;;  %v2881_v61 = vsel %vm7857_vm7, %v2879_v13, %v2880_v5  ;;  %v6091_v45 = vcombine.low %v7465_v44, %v8098_v11  ;;  %v2893_v24 = vrot.slane %v2891_v40, 4  ;;  %v2894_v35 = vrot.slane %v6269_v16, 5  ;;  %v7467_v0 = vld [vmem:[%s10509_s1 + $0x4] sm:$0x3]  ;;  %v6277_v1 = vld [vmem:[%s7604_s28 + $0xb8] sm:$0xf] }
  0x90   : > { %v6355_v47 = vcombine.low %v2878_v12, %v2881_v61  ;;  %v2888_v49 = vsel %vm7857_vm7, %v2886_v33, %v2887_v39  ;;  %v6342_v6 = vrot.slane %v6326_v32, 9  ;;  %v2898_v14 = vrot.slane %v6271_v20, 5  ;;  %v6327_v8 = vld [vmem:[%s7604_s28 + $0xa8] sm:$0xe]  ;;  %v6275_v12 = vld [vmem:[%s7604_s28 + $0xb0] sm:$0x1] }
  0x91   : > { %v6356_v42 = vcombine.low %v2885_v28, %v2888_v49  ;;  %v2901_v17 = vrot.slane %v6272_v4, 5  ;;  %v1466_v59 = vsel %vm748_vm0, %v7467_v0, 0  ;;  %v2892_v63 = vsel %vm7857_vm7, %v6341_v46, %v2891_v40  ;;  %v8120_v26 = vld [vmem:[%s10509_s1 + $0xc] ss:$0 sps:$4 sm:$0xcc]  }
  0x92   : > { %v2900_v56 = vrot.slane %v2898_v14, 4  ;;  %v2895_v5 = vsel %vm7857_vm7, %v2893_v24, %v2894_v35  ;;  %v2905_v10 = vrot.slane %v6274_v57, 5  ;;  %v2899_v39 = vsel %vm7857_vm7, %v6342_v6, %v2898_v14  ;;  %v6278_v13 = vld [vmem:[%s7604_s28 + $0xbc] sm:$0x1]  ;;  %v6328_v20 = vld [vmem:[%s7604_s28 + $0xb4] sm:$0xe] }
  0x93   : > { %v2912_v16 = vrot.slane %v6277_v1, 5  ;;  %v7468_v28 = vld [vmem:[%s7604_s28 + $0x24] sm:$0xf]  ;;  %v8132_v33 = vld [vmem:[%s7604_s28 + $0x28] sm:$0xf]  ;;  %v6357_v4 = vcombine.low %v2892_v63, %v2895_v5  ;;  %v6343_v32 = vrot.slane %v6327_v8, 9 }
  0x94   : > { %v2902_v19 = vsel %vm7857_vm7, %v2900_v56, %v2901_v17  ;;  %v6092_v40 = vcombine.low %v7468_v28, %v8132_v33  ;;  %v6280_v22 = vld [vmem:[%s7604_s28 + $0xc4] sm:$0xf]  ;;  %v2907_v44 = vrot.slane %v2905_v10, 4  ;;  %v4063_v46 = vrot.slane %v8120_v26, 2  ;;  %v8144_v49 = vld [vmem:[%s7604_s28 + $0x34] sm:$0xf] }
  0x95   : > { %6997 = vmatmul.mubr.msk.bf16.gmra.mrb[16].mxu0 %vm699_vm3, %v6355_v47  ;;  %v6358_v61 = vcombine.low %v2899_v39, %v2902_v19  ;;  %v7470_v47 = vld [vmem:[%s7604_s28 + $0x30] sm:$0xf]  ;;  %v6344_v35 = vrot.slane %v6328_v20, 9  ;;  %v2915_v6 = vrot.slane %v6278_v13, 5  ;;  %v2906_v14 = vsel %vm7857_vm7, %v6343_v32, %v2905_v10  ;;  %v6281_v56 = vld [vmem:[%s7604_s28 + $0xc8] sm:$0x1] }
  0x96   : > { %6845 = vmatmul.mubr.msk.bf16.vlgmr.msra.gmra.mrb[0].mxu1 %vm699_vm3, %v6090_v62  ;;  %7000 = vmatprep.mubr.msk.bf16.mxu0 %vm699_vm3, %v6356_v42  ;;  %v8139_v62 = vld [vmem:[%s10509_s1 + $0x4] ss:$0 sps:$4 sm:$0xcc]   ;;  %v6093_v24 = vcombine.low %v7470_v47, %v8144_v49  ;;  %v2914_v42 = vrot.slane %v2912_v16, 4  ;;  %v2919_v57 = vrot.slane %v6280_v22, 5  ;;  %v6095_v20 = vcombine.low %v7770_v29, %v7773_v38 }
  0x97   : > { %6877 = vmatpush3.bf16.msra.mxu1 %v1466_v59  ;;  %6848 = vmatprep.mubr.msk.bf16.mxu1 %vm699_vm3, %v6091_v45  ;;  %v2908_v45 = vrot.slane %v6275_v12, 5  ;;  %v1778_v0 = vrot.slane %v8139_v62, 2  ;;  %v2913_v59 = vsel %vm7857_vm7, %v6344_v35, %v2912_v16  ;;  %v6329_v63 = vld [vmem:[%s7604_s28 + $0xc0] sm:$0xe]  ;;  %v7472_v5 = vld [vmem:[%s7604_s28 + $0x3c] sm:$0xf]  ;;  %v6096_v22 = vcombine.low %v7799_v27, %v7805_v43 }
  0x98   : > { %7380 = vmatprep.subr.msk.bf16.mxu0 %vm748_vm0, %v4063_v46  ;;  %v2916_v1 = vsel %vm7857_vm7, %v2914_v42, %v2915_v6  ;;  %v8170_v8 = vld [vmem:[%s7604_s28 + $0x40] sm:$0xf]  ;;  %v6345_v12 = vrot.slane %v6329_v63, 9  ;;  %v2921_v13 = vrot.slane %v2919_v57, 4  ;;  %v2922_v16 = vrot.slane %v6281_v56, 5  ;;  %v7423_v63 = vld [vmem:[%s7604_s28 + $0x24] sm:$0xff]  }
  0x99   : > { %v2909_v17 = vsel %vm7857_vm7, %v2907_v44, %v2908_v45  ;;  %7375 = vmatprep.subr.msk.bf16.mxu1 %vm748_vm0, %v1778_v0  ;;  %v6094_v10 = vcombine.low %v7472_v5, %v8170_v8  ;;  %v6360_v19 = vcombine.low %v2913_v59, %v2916_v1  ;;  %v2297_v28 = vshll.u32 %v8061_v52, 16  ;;  %v1206_v42 = vld [vmem:[%s7604_s28 + $0xc] sm:$0xe]  ;;  %v7474_v43 = vld [vmem:[%s7604_s28 + $0x8] sm:$0x1] }
  0x9a   : > { %v6359_v39 = vcombine.low %v2906_v14, %v2909_v17  ;;  %v2923_v32 = vsel %vm7857_vm7, %v2921_v13, %v2922_v16  ;;  %v1265_v44 = vrot.slane %v8091_v36, 5  ;;  %v6097_v45 = vcombine.low %v7830_v21, %v7836_v37  ;;  %v1207_v14 = vld [vmem:[%s7604_s28 + $0x18] sm:$0xe]  ;;  %v7475_v36 = vld [vmem:[%s7604_s28 + $0x14] sm:$0x1] }
  0x9b   : > { %v8185_v29 = vrot.slane %v2297_v28, 5  ;;  %v2307_v47 = vshll.u32 %v8064_v53, 16  ;;  %v1258_v35 = vrot.slane %v8057_v50, 5  ;;  %v1272_v27 = vrot.slane %v8098_v11, 5  ;;  %v8206_v53 = vld [vmem:[%s7604_s28 + $0x24] sm:$0xe] }
  0x9c   : > { %v1261_v21 = vrot.slane %v7474_v43, 5  ;;  %v6122_v50 = vrot.slane %v1206_v42, 9  ;;  %v1268_v17 = vrot.slane %v7475_v36, 5  ;;  %v1267_v1 = vrot.slane %v1265_v44, 4  ;;  %v7476_v13 = vld [vmem:[%s7604_s28 + $0x20] sm:$0x1] }
  0x9d   : > { %7001 = vmatmul.mubr.msk.bf16.gmra.mrb[20].mxu0 %vm699_vm3, %v6357_v4  ;;  %v2920_v4 = vsel %vm7857_vm7, %v6345_v12, %v2919_v57  ;;  %10607 = vst [vmem:[#allocation3_spill] sm:$0xff] %v8185_v29  ;;  %v8209_v57 = vrot.slane %v2307_v47, 5  ;;  %v1260_v59 = vrot.slane %v1258_v35, 4  ;;  %v6098_v11 = vcombine.low %v7851_v2, %v7864_v31  ;;  %v1209_v28 = vld [vmem:[%s7604_s28 + $0x30] sm:$0xe]  ;;  %v7437_v42 = vld [vmem:[%s7604_s28 + $0x78] sm:$0xff]  }
  0x9e   : > { %6849 = vmatmul.mubr.msk.bf16.gmra.mrb[4].mxu1 %vm699_vm3, %v6092_v40  ;;  %7004 = vmatprep.mubr.msk.bf16.mxu0 %vm699_vm3, %v6358_v61  ;;  %v2301_v40 = vshrl.u32 %v8061_v52, 16  ;;  %v6361_v52 = vcombine.low %v2920_v4, %v2923_v32  ;;  %v7420_v61 = vld [vmem:[%s7604_s28 + $0x18] sm:$0xff]   ;;  %v6099_v5 = vcombine.low %v7883_v55, %v7890_v18  ;;  %v1274_v12 = vrot.slane %v1272_v27, 4  ;;  %v7477_v4 = vld [vmem:[%s7604_s28 + $0x2c] sm:$0x1] }
  0x9f   : > { %6852 = vmatprep.mubr.msk.bf16.mxu1 %vm699_vm3, %v6093_v24  ;;  %v1205_v24 = vld [vmem:[%s7604_s28] sm:$0xe]  ;;  %10608 = vst [vmem:[#allocation4_spill] sm:$0xff] %v8209_v57  ;;  %v1275_v16 = vrot.slane %v7476_v13, 5  ;;  %v4113_v2 = vsel %vm748_vm0, %v4063_v46, 0  ;;  %v8233_v55 = vsel %vm7857_vm7, %v6122_v50, %v1265_v44  ;;  %v6124_v18 = vrot.slane %v8206_v53, 9 }
  0xa0   : > { %v2303_v38 = vrot.slane %v2301_v40, 4  ;;  %v6121_v37 = vrot.slane %v1205_v24, 9  ;;  %v8237_v40 = vld [vmem:[%s7604_s28 + $0x3c] sm:$0xe]  ;;  %v8246_v26 = vsel %vm7857_vm7, %v1260_v59, %v1261_v21  ;;  %v8250_v46 = vsel %vm7857_vm7, %v1267_v1, %v1268_v17  ;;  %v6443_v24 = vld [vmem:[%s7604_s28 + $0x18] sm:$0xf] }
  0xa1   : > { %v1282_v32 = vrot.slane %v7477_v4, 5  ;;  %v6103_v44 = vcombine.low %v7987_v51, %v7992_v54  ;;  %v1293_v47 = vrot.slane %v8170_v8, 5  ;;  %v8285_v8 = vsel %vm748_vm0, %v1778_v0, 0  ;;  %v6446_v43 = vld [vmem:[%s7604_s28 + $0x24] sm:$0xf]  ;;  %v7429_v21 = vld [vmem:[%s7604_s28 + $0x48] sm:$0xff]  }
  0xa2   : > { %v2304_v6 = vor.u32 %v2303_v38, %v8185_v29  ;;  %v8229_v31 = vsel %vm7857_vm7, %v6121_v37, %v1258_v35  ;;  %v1286_v38 = vrot.slane %v8144_v49, 5  ;;  %v8269_v49 = vsel %vm7857_vm7, %v1274_v12, %v1275_v16  ;;  %v7427_v35 = vld [vmem:[%s7604_s28 + $0x3c] sm:$0xff]   ;;  %v7478_v50 = vld [vmem:[%s7604_s28 + $0x38] sm:$0x1]  ;;  %v7479_v17 = vld [vmem:[%s7604_s28 + $0x44] sm:$0x1] }
  0xa3   : > { %v1289_v53 = vrot.slane %v7478_v50, 5  ;;  %v6126_v36 = vrot.slane %v8237_v40, 9  ;;  %v1296_v59 = vrot.slane %v7479_v17, 5  ;;  %v6447_v62 = vld [vmem:[%s7604_s28 + $0x28] sm:$0xf]  ;;  %v1295_v13 = vrot.slane %v1293_v47, 4 }
  0xa4   : > { %v8211_v56 = vrot.slane %v2304_v6, 4  ;;  %v1288_v37 = vrot.slane %v1286_v38, 4  ;;  %v7481_v16 = vld [vmem:[%s7604_s28 + $0x50] sm:$0x1]  ;;  %v3652_v4 = vshrl.u32 %v6446_v43, 16  ;;  %v3661_v50 = vshll.u32 %v6447_v62, 16 }
  0xa5   : > { %7005 = vmatmul.mubr.msk.bf16.gmra.mrb[24].mxu0 %vm699_vm3, %v6359_v39  ;;  %v7425_v39 = vld [vmem:[%s7604_s28 + $0x30] sm:$0xff]   ;;  %v3665_v17 = vshrl.u32 %v6447_v62, 16  ;;  %vm5293_vm15 = vcmask 60416   ;;  %vm5371_vm1 = vcmask 191616   ;;  %vm5410_vm2 = vcmask 257216  }
  0xa6   : > { %6853 = vmatmul.mubr.msk.bf16.gmra.mrb[8].mxu1 %vm699_vm3, %v6094_v10  ;;  %7008 = vmatprep.mubr.msk.bf16.mxu0 %vm699_vm3, %v6360_v19  ;;  %10609 = vst [vmem:[#allocation5_spill] sm:$0xff] %v8211_v56  ;;  %v6123_v10 = vrot.slane %v1207_v14, 9  ;;  %v6100_v19 = vcombine.low %v7909_v41, %v7917_v25  ;;  %v8342_v25 = vld [vmem:[%s7604_s28 + $0x60] sm:$0xe]  ;;  %v8348_v62 = vrot.slane %v3661_v50, 5  ;;  %vm5527_vm5 = vcmask 454016  }
  0xa7   : > { %6856 = vmatprep.mubr.msk.bf16.mxu1 %vm699_vm3, %v6095_v20  ;;  %v1279_v20 = vrot.slane %v8132_v33, 5  ;;  %v8242_v33 = vld [vmem:[%s10509_s1 + $0x10] sm:$0x3]  ;;  %v7485_v50 = vld [vmem:[%s7604_s28 + $0x68] sm:$0x1]  ;;  %vm5566_vm6 = vcmask 519616  }
  0xa8   : > { %v6449_v0 = vld [vmem:[%s7604_s28 + $0x30] sm:$0xf]  ;;  %v7495_v56 = vld [vmem:[%s7604_s28 + $0xa0] sm:$0xf] }
  0xa9   : > { %v8300_v1 = vsel %vm7857_vm7, %v6124_v18, %v1279_v20  ;;  %v1349_v57 = vrot.slane %v7495_v56, 5 }
  0xad   : > { %7009 = vmatmul.mubr.msk.bf16.gmra.mrb[28].mxu0 %vm699_vm3, %v6361_v52  ;;  %v1211_v52 = vld [vmem:[%s7604_s28 + $0x48] sm:$0xe] }
  0xae   : > { %6857 = vmatmul.mubr.msk.bf16.gmra.mrb[12].mxu1 %vm699_vm3, %v6096_v22  ;;  %7014 = vmatprep.mubr.msk.bf16.mxu0 %vm699_vm3, %v7420_v61  ;;  %v6101_v22 = vcombine.low %v7936_v9, %v7946_v30  ;;  %v6102_v61 = vcombine.low %v7963_v58, %v7968_v60  ;;  %v1281_v9 = vrot.slane %v1279_v20, 4  ;;  %v6125_v30 = vrot.slane %v1209_v28, 9  ;;  %v7488_v60 = vld [vmem:[%s7604_s28 + $0x74] sm:$0x1] }
  0xaf   : > { %6860 = vmatprep.mubr.msk.bf16.mxu1 %vm699_vm3, %v6097_v45  ;;  %v8264_v45 = vsel %vm7857_vm7, %v6123_v10, %v1272_v27  ;;  %v6444_v27 = vld [vmem:[%s7604_s28 + $0x1c] sm:$0xf]  ;;  %v8304_v10 = vld [vmem:[%s7604_s28 + $0x54] sm:$0xe]  ;;  %v1303_v28 = vrot.slane %v7481_v16, 5  ;;  %v3631_v20 = vshll.u32 %v6443_v24, 16 }
  0xb0   : > { %v8312_v12 = vsel %vm7857_vm7, %v6125_v30, %v1286_v38  ;;  %v3637_v18 = vshll.u32 %v6444_v27, 16  ;;  %v3641_v40 = vshrl.u32 %v6444_v27, 16  ;;  %v8320_v38 = vsel %vm7857_vm7, %v1288_v37, %v1289_v53  ;;  %v7482_v30 = vld [vmem:[%s7604_s28 + $0x58] sm:$0xf]  ;;  %v7484_v16 = vld [vmem:[%s7604_s28 + $0x64] sm:$0xf] }
  0xb1   : > { %v8334_v27 = vsel %vm7857_vm7, %v1295_v13, %v1296_v59  ;;  %v6128_v41 = vrot.slane %v8304_v10, 9  ;;  %v7483_v10 = vld [vmem:[%s7604_s28 + $0x5c] sm:$0x1] }
  0xb2   : > { %v8346_v37 = vrot.slane %v3637_v18, 5  ;;  %v3643_v53 = vrot.slane %v3641_v40, 4  ;;  %v1310_v13 = vrot.slane %v7483_v10, 5  ;;  %v7433_v18 = vld [vmem:[%s7604_s28 + $0x60] sm:$0xff]   ;;  %v1214_v10 = vld [vmem:[%s7604_s28 + $0x6c] sm:$0xe] }
  0xb5   : > { %7015 = vmatmul.mubr.msk.bf16.vlgmr.msra.gmra.mrb[0].mxu0 %vm699_vm3, %v7423_v63  ;;  %v7480_v63 = vld [vmem:[%s7604_s28 + $0x4c] sm:$0xf] }
  0xb6   : > { %6861 = vmatmul.mubr.msk.bf16.gmra.mrb[16].mxu1 %vm699_vm3, %v6098_v11  ;;  %7047 = vmatpush3.bf16.msra.mxu0 %v4113_v2  ;;  %v6127_v11 = vrot.slane %v1211_v52, 9  ;;  %v3628_v2 = vshrl.u32 %v6443_v24, 16  ;;  %v3655_v52 = vshll.u32 %v6446_v43, 16  ;;  %v1307_v24 = vrot.slane %v7482_v30, 5 }
  0xb7   : > { %6864 = vmatprep.mubr.msk.bf16.mxu1 %vm699_vm3, %v6099_v5  ;;  %7018 = vmatprep.mubr.msk.bf16.mxu0 %vm699_vm3, %v7425_v39  ;;  %v1300_v5 = vrot.slane %v7480_v63, 5  ;;  %v8308_v39 = vsel %vm7857_vm7, %v1281_v9, %v1282_v32  ;;  %v7431_v63 = vld [vmem:[%s7604_s28 + $0x54] sm:$0xff]   ;;  %v3644_v30 = vor.u32 %v3643_v53, %v8346_v37 }
  0xb8   : > { %7381 = vmatprep.subr.msk.bf16.mxu0 %vm748_vm0, %v8242_v33  ;;  %v3657_v59 = vrot.slane %v3655_v52, 5  ;;  %v6129_v52 = vrot.slane %v8342_v25, 9  ;;  %v1215_v53 = vld [vmem:[%s7604_s28 + $0x78] sm:$0xe]  ;;  %v10619_v56 = vcombine.low %v8300_v1, %v8308_v39  ;;  %v7496_v1 = vld [vmem:[%s7604_s28 + $0xa4] sm:$0x1] }
  0xb9   : > { %v1302_v9 = vrot.slane %v1300_v5, 4  ;;  %v8338_v43 = vsel %vm7857_vm7, %v6127_v11, %v1300_v5  ;;  %v3667_v11 = vrot.slane %v3665_v17, 4  ;;  %v1317_v17 = vrot.slane %v7485_v50, 5  ;;  %v7487_v50 = vld [vmem:[%s7604_s28 + $0x7c] sm:$0xf] }
  0xba   : > { %v1352_v39 = vrot.slane %v7496_v1, 5 }
  0xbb   : > { %v8353_v5 = vsel %vm7857_vm7, %v1302_v9, %v1303_v28 }
  0xbd   : > { %7019 = vmatmul.mubr.msk.bf16.gmra.mrb[4].mxu0 %vm699_vm3, %v7427_v35  ;;  %v8330_v35 = vsel %vm7857_vm7, %v6126_v36, %v1293_v47  ;;  %v3630_v47 = vrot.slane %v3628_v2, 4  ;;  %v3654_v36 = vrot.slane %v3652_v4, 4  ;;  %v1314_v2 = vrot.slane %v7484_v16, 5  ;;  %v7486_v16 = vld [vmem:[%s7604_s28 + $0x70] sm:$0xf] }
  0xbe   : > { %6865 = vmatmul.mubr.msk.bf16.gmra.mrb[20].mxu1 %vm699_vm3, %v6100_v19  ;;  %7022 = vmatprep.mubr.msk.bf16.mxu0 %vm699_vm3, %v7429_v21  ;;  %v6445_v19 = vld [vmem:[%s7604_s28 + $0x20] sm:$0x1]  ;;  %v3633_v21 = vrot.slane %v3631_v20, 5  ;;  %v6448_v20 = vld [vmem:[%s7604_s28 + $0x2c] sm:$0x1]  ;;  %v1321_v32 = vrot.slane %v7486_v16, 5  ;;  %v3668_v4 = vor.u32 %v3667_v11, %v8348_v62 }
  0xbf   : > { %6868 = vmatprep.mubr.msk.bf16.mxu1 %vm699_vm3, %v6101_v22  ;;  %v1309_v22 = vrot.slane %v1307_v24, 4  ;;  %v3647_v28 = vshll.u32 %v6445_v19, 16  ;;  %v3658_v14 = vor.u32 %v3657_v59, %v3654_v36  ;;  %v3671_v25 = vshll.u32 %v6448_v20, 16 }
  0xc0   : > { %v3634_v9 = vor.u32 %v3633_v21, %v3630_v47  ;;  %v8375_v19 = vsel %vm7857_vm7, %v6128_v41, %v1307_v24  ;;  %v1316_v21 = vrot.slane %v1314_v2, 4  ;;  %v1328_v16 = vrot.slane %v7487_v50, 5  ;;  %v6450_v41 = vld [vmem:[%s7604_s28 + $0x34] sm:$0xf] }
  0xc1   : > { %v8379_v47 = vsel %vm7857_vm7, %v1309_v22, %v1310_v13  ;;  %v3649_v36 = vrot.slane %v3647_v28, 5  ;;  %v6130_v24 = vrot.slane %v1214_v10, 9  ;;  %v3676_v59 = vshrl.u32 %v6449_v0, 16  ;;  %v7435_v10 = vld [vmem:[%s7604_s28 + $0x6c] sm:$0xff]  }
  0xc2   : > { %v3679_v11 = vshll.u32 %v6449_v0, 16  ;;  %v3645_v22 = vrot.slane %v3644_v30, 4  ;;  %v1323_v58 = vrot.slane %v1321_v32, 4  ;;  %v3659_v13 = vrot.slane %v3658_v14, 4  ;;  %v7489_v0 = vld [vmem:[%s7604_s28 + $0x80] sm:$0x1] }
  0xc3   : > { %v3669_v20 = vrot.slane %v3668_v4, 4  ;;  %v6131_v28 = vrot.slane %v1215_v53, 9  ;;  %v1330_v50 = vrot.slane %v1328_v16, 4  ;;  %v1331_v40 = vrot.slane %v7489_v0, 5  ;;  %v6451_v30 = vld [vmem:[%s7604_s28 + $0x38] sm:$0x1] }
  0xc4   : > { %v3685_v6 = vshll.u32 %v6450_v41, 16  ;;  %v3689_v51 = vshrl.u32 %v6450_v41, 16  ;;  %v3678_v14 = vrot.slane %v3676_v59, 4  ;;  %v3681_v4 = vrot.slane %v3679_v11, 5  ;;  %v8468_v0 = vld [vmem:[%s7604_s28 + $0x4c] sm:$0xf] }
  0xc5   : > { %7023 = vmatmul.mubr.msk.bf16.gmra.mrb[8].mxu0 %vm699_vm3, %v7431_v63  ;;  %v3635_v63 = vrot.slane %v3634_v9, 4  ;;  %v8401_v9 = vsel %vm7857_vm7, %v6129_v52, %v1314_v2  ;;  %v8413_v41 = vsel %vm7857_vm7, %v6130_v24, %v1321_v32  ;;  %v6452_v52 = vld [vmem:[%s7604_s28 + $0x3c] sm:$0xf]  ;;  %v3650_v59 = vsel %vm7631_vm4, %v3645_v22, %v3649_v36  ;;  %v1216_v22 = vld [vmem:[%s7604_s28 + $0x84] sm:$0xe]  ;;  %10612 = vst [vmem:[#allocation6_spill] sm:$0xff] %v8468_v0 }
  0xc6   : > { %6869 = vmatmul.mubr.msk.bf16.gmra.mrb[24].mxu1 %vm699_vm3, %v6102_v61  ;;  %7026 = vmatprep.mubr.msk.bf16.mxu0 %vm699_vm3, %v7433_v18  ;;  %v1324_v61 = vrot.slane %v7488_v60, 5  ;;  %v3673_v18 = vrot.slane %v3671_v25, 5  ;;  %v8406_v25 = vsel %vm7857_vm7, %v1316_v21, %v1317_v17  ;;  %v3664_v17 = vsel %vm7631_vm4, %v3659_v13, %v8348_v62 }
  0xc7   : > { %6872 = vmatprep.mubr.msk.bf16.mxu1 %vm699_vm3, %v6103_v44  ;;  %v3640_v53 = vsel %vm7631_vm4, %v3635_v63, %v8346_v37  ;;  %v8429_v32 = vsel %vm7857_vm7, %v6131_v28, %v1328_v16  ;;  %v8434_v21 = vsel %vm7857_vm7, %v1330_v50, %v1331_v40  ;;  %v8436_v24 = vrot.slane %v3685_v6, 5  ;;  %v6453_v63 = vld [vmem:[%s7604_s28 + $0x40] sm:$0xf]  ;;  %v6455_v50 = vld [vmem:[%s7604_s28 + $0x48] sm:$0xf] }
  0xc8   : > { %v8417_v2 = vsel %vm7857_vm7, %v1323_v58, %v1324_v61  ;;  %v3674_v37 = vsel %vm7631_vm4, %v3669_v20, %v3673_v18  ;;  %v3691_v36 = vrot.slane %v3689_v51, 4  ;;  %v3695_v11 = vshll.u32 %v6451_v30, 16  ;;  %v7490_v58 = vld [vmem:[%s7604_s28 + $0x88] sm:$0xf]  ;;  %v7439_v51 = vld [vmem:[%s7604_s28 + $0x90] sm:$0xff]  }
  0xc9   : > { %v10610_v62 = vcombine.low %v8004_v7, %v8016_v23  ;;  %v3682_v16 = vor.u32 %v3681_v4, %v3678_v14  ;;  %v1335_v40 = vrot.slane %v7490_v58, 5  ;;  %v3700_v6 = vshrl.u32 %v6452_v52, 16  ;;  %v7438_v7 = vld [vmem:[%s7604_s28 + $0x84] sm:$0xff]   ;;  %v8479_v58 = vld [vmem:[%s7604_s28 + $0x58] sm:$0xf] }
  0xca   : > { %v3703_v60 = vshll.u32 %v6452_v52, 16  ;;  %v10611_v61 = vcombine.low %v8229_v31, %v8246_v26  ;;  %v8459_v20 = vsel %vm748_vm0, %v8242_v33, 0  ;;  %v8461_v18 = vcombine.low %v3664_v17, %v3674_v37  ;;  %v6454_v26 = vld [vmem:[%s7604_s28 + $0x44] sm:$0x1]  ;;  %v7491_v33 = vld [vmem:[%s7604_s28 + $0x8c] sm:$0x1] }
  0xcb   : > { %v3709_v28 = vshll.u32 %v6453_v63, 16  ;;  %v3692_v30 = vor.u32 %v3691_v36, %v8436_v24  ;;  %v8472_v14 = vrot.slane %v3695_v11, 5  ;;  %v6132_v4 = vrot.slane %v1216_v22, 9  ;;  %v6458_v52 = vld [vmem:[%s7604_s28 + $0x54] sm:$0xf]  ;;  %10613 = vst [vmem:[#allocation7_spill] sm:$0xff] %v8479_v58 }
  0xcc   : > { %v1337_v17 = vrot.slane %v1335_v40, 4  ;;  %v3702_v37 = vrot.slane %v3700_v6, 4  ;;  %v3733_v31 = vshll.u32 %v8468_v0, 16  ;;  %v3737_v13 = vshrl.u32 %v8468_v0, 16  ;;  %v7492_v23 = vld [vmem:[%s7604_s28 + $0x94] sm:$0xf] }
  0xcd   : > { %7027 = vmatmul.mubr.msk.bf16.gmra.mrb[12].mxu0 %vm699_vm3, %v7435_v10  ;;  %v3713_v10 = vshrl.u32 %v6453_v63, 16  ;;  %v3724_v63 = vshrl.u32 %v6455_v50, 16  ;;  %v8483_v36 = vrot.slane %v3709_v28, 5  ;;  %v3748_v22 = vshrl.u32 %v6458_v52, 16  ;;  %v1219_v0 = vld [vmem:[%s7604_s28 + $0xa8] sm:$0xe] }
  0xce   : > { %6873 = vmatmul.mubr.msk.bf16.gmra.mrb[28].mxu1 %vm699_vm3, %v10610_v62  ;;  %7030 = vmatprep.mubr.msk.bf16.mxu0 %vm699_vm3, %v7437_v42  ;;  %v8453_v42 = vcombine.low %v3640_v53, %v3650_v59  ;;  %v1338_v53 = vrot.slane %v7491_v33, 5  ;;  %v8476_v59 = vrot.slane %v3682_v16, 4  ;;  %v3705_v62 = vrot.slane %v3703_v60, 5 }
  0xcf   : > { %6878 = vmatprep.mubr.msk.bf16.mxu1 %vm699_vm3, %v10611_v61  ;;  %v3727_v61 = vshll.u32 %v6455_v50, 16  ;;  %v3715_v11 = vrot.slane %v3713_v10, 4  ;;  %v3751_v33 = vshll.u32 %v6458_v52, 16  ;;  %v8488_v16 = vsel %vm7857_vm7, %v6132_v4, %v1335_v40 }
  0xd0   : > { %v3719_v6 = vshll.u32 %v6454_v26, 16  ;;  %v3757_v60 = vshll.u32 %v8479_v58, 16  ;;  %v3761_v50 = vshrl.u32 %v8479_v58, 16  ;;  %v10614_v28 = vcombine.low %v8233_v55, %v8250_v46  ;;  %v8508_v55 = vld [vmem:[%s7604_s28 + $0x90] sm:$0xe] }
  0xd1   : > { %v8505_v26 = vsel %vm7857_vm7, %v1337_v17, %v1338_v53  ;;  %v3706_v10 = vor.u32 %v3705_v62, %v3702_v37  ;;  %v8511_v46 = vld [vmem:[%s7604_s28 + $0x50] sm:$0x1]  ;;  %v3726_v4 = vrot.slane %v3724_v63, 4  ;;  %v8518_v52 = vrot.slane %v3733_v31, 5  ;;  %v6461_v53 = vld [vmem:[%s7604_s28 + $0x60] sm:$0xf] }
  0xd2   : > { %10615 = vst [vmem:[#allocation8_spill] sm:$0xff] %v8511_v46  ;;  %v7440_v17 = vld [vmem:[%s7604_s28 + $0x9c] sm:$0xff]   ;;  %v7441_v37 = vld [vmem:[%s7604_s28 + $0xa8] sm:$0xff]   ;;  %v3716_v62 = vor.u32 %v3715_v11, %v8483_v36  ;;  %v3750_v44 = vrot.slane %v3748_v22, 4  ;;  %v3753_v40 = vrot.slane %v3751_v33, 5  ;;  %v8535_v63 = vrot.slane %v3757_v60, 5 }
  0xd3   : > { %v8533_v31 = vld [vmem:[%s7604_s28 + $0x5c] sm:$0x1]  ;;  %v3743_v22 = vshll.u32 %v8511_v46, 16  ;;  %v8540_v33 = vld [vmem:[%s7604_s28 + $0x64] sm:$0xf]  ;;  %v3775_v29 = vshll.u32 %v6461_v53, 16 }
  0xd4   : > { %10617 = vst [vmem:[#allocation9_spill] sm:$0xff] %v8533_v31  ;;  %10618 = vst [vmem:[#allocation10_spill] sm:$0xff] %v8540_v33  ;;  %v3717_v60 = vrot.slane %v3716_v62, 4 }
  0xd5   : > { %7031 = vmatmul.mubr.msk.bf16.gmra.mrb[16].mxu0 %vm699_vm3, %v7438_v7  ;;  %v8501_v7 = vrot.slane %v3692_v30, 4  ;;  %v3729_v30 = vrot.slane %v3727_v61, 5  ;;  %v3763_v61 = vrot.slane %v3761_v50, 4  ;;  %v3754_v50 = vor.u32 %v3753_v40, %v3750_v44 }
  0xd6   : > { %6879 = vmatmul.mubr.msk.bf16.vlgmr.msra.gmra.mrb[0].mxu1 %vm699_vm3, %v10614_v28  ;;  %7034 = vmatprep.mubr.msk.bf16.mxu0 %vm699_vm3, %v7439_v51  ;;  %v10616_v51 = vcombine.low %v8264_v45, %v8269_v49  ;;  %v3739_v28 = vrot.slane %v3737_v13, 4  ;;  %v7493_v45 = vld [vmem:[%s10509_s1 + $0x8] sm:$0x3]  ;;  %v8529_v49 = vrot.slane %v3719_v6, 5  ;;  %v6133_v13 = vrot.slane %v8508_v55, 9 }
  0xd7   : > { %6911 = vmatpush3.bf16.msra.mxu1 %v8285_v8  ;;  %v1342_v8 = vrot.slane %v7492_v23, 5  ;;  %v7494_v23 = vld [vmem:[%s7604_s28 + $0x98] sm:$0x1]  ;;  %v3730_v6 = vor.u32 %v3729_v30, %v3726_v4  ;;  %v1218_v55 = vld [vmem:[%s7604_s28 + $0x9c] sm:$0xe]  ;;  %v3764_v46 = vor.u32 %v3763_v61, %v8535_v63  ;;  %v3781_v4 = vshll.u32 %v8540_v33, 16 }
  0xd8   : > { %6882 = vmatprep.mubr.msk.bf16.mxu1 %vm699_vm3, %v10616_v51  ;;  %7377 = vmatprep.subr.msk.bf16.mxu1 %vm748_vm0, %v7493_v45  ;;  %v1345_v11 = vrot.slane %v7494_v23, 5  ;;  %v3772_v51 = vshrl.u32 %v6461_v53, 16  ;;  %v8542_v45 = vrot.slane %v3706_v10, 4  ;;  %v3740_v3 = vor.u32 %v3739_v28, %v8518_v52 }
  0xd9   : > { %v1344_v58 = vrot.slane %v1342_v8, 4  ;;  %v3767_v23 = vshll.u32 %v8533_v31, 16  ;;  %v1356_v10 = vrot.slane %v7992_v54, 5  ;;  %v3785_v30 = vshrl.u32 %v8540_v33, 16 }
  0xda   : > { %v3745_v44 = vrot.slane %v3743_v22, 5  ;;  %v6134_v40 = vrot.slane %v1218_v55, 9  ;;  %v3774_v28 = vrot.slane %v3772_v51, 4  ;;  %v3777_v53 = vrot.slane %v3775_v29, 5  ;;  %v7442_v22 = vld [vmem:[%s7604_s28 + $0xb4] sm:$0xff]  }
  0xdb   : > { %v3731_v54 = vrot.slane %v3730_v6, 4  ;;  %v3741_v62 = vrot.slane %v3740_v3, 4  ;;  %v1351_v61 = vrot.slane %v1349_v57, 4  ;;  %v3769_v33 = vrot.slane %v3767_v23, 5 }
  0xdc   : > { %v6135_v31 = vrot.slane %v1219_v0, 9  ;;  %v3765_v29 = vrot.slane %v3764_v46, 4  ;;  %v1358_v51 = vrot.slane %v1356_v10, 4  ;;  %v8566_v55 = vrot.slane %v3781_v4, 5  ;;  %v8582_v46 = vld [vmem:[%s7604_s28 + $0x68] sm:$0x1] }
  0xdd   : > { %7035 = vmatmul.mubr.msk.bf16.gmra.mrb[20].mxu0 %vm699_vm3, %v7440_v17  ;;  %v10620_v17 = vcombine.low %v8312_v12, %v8320_v38  ;;  %v3787_v12 = vrot.slane %v3785_v30, 4  ;;  %v7443_v38 = vld [vmem:[%s7604_s28 + $0xc0] sm:$0xff]   ;;  %v3698_v3 = vsel %vm7631_vm4, %v8501_v7, %v8472_v14  ;;  %v3712_v0 = vsel %vm7631_vm4, %v8542_v45, %v8483_v36  ;;  %v1220_v7 = vld [vmem:[%s7604_s28 + $0xb4] sm:$0xe]  ;;  %v7497_v4 = vld [vmem:[%s7604_s28 + $0xb8] sm:$0xf] }
  0xde   : > { %6883 = vmatmul.mubr.msk.bf16.gmra.mrb[4].mxu1 %vm699_vm3, %v10619_v56  ;;  %7038 = vmatprep.mubr.msk.bf16.mxu0 %vm699_vm3, %v7441_v37  ;;  %v3755_v56 = vrot.slane %v3754_v50, 4  ;;  %v1359_v37 = vrot.slane %v7997_v48, 5  ;;  %v8579_v48 = vsel %vm7857_vm7, %v6133_v13, %v1342_v8  ;;  %v3778_v6 = vor.u32 %v3777_v53, %v3774_v28  ;;  %v6464_v13 = vld [vmem:[%s7604_s28 + $0x6c] sm:$0xf]  ;;  %v8648_v53 = vld [vmem:[%s7604_s28 + $0x70] sm:$0xf] }
  0xdf   : > { %6886 = vmatprep.mubr.msk.bf16.mxu1 %vm699_vm3, %v10620_v17  ;;  %v3722_v50 = vsel %vm7631_vm4, %v3717_v60, %v8529_v49  ;;  %v8589_v23 = vsel %vm7857_vm7, %v1344_v58, %v1345_v11  ;;  %v3736_v14 = vsel %vm7631_vm4, %v3731_v54, %v8518_v52  ;;  %v8596_v36 = vsel %vm7857_vm7, %v6134_v40, %v1349_v57 }
  0xe0   : > { %v3746_v8 = vsel %vm7631_vm4, %v3741_v62, %v3745_v44  ;;  %v8603_v49 = vsel %vm7857_vm7, %v1351_v61, %v1352_v39  ;;  %v3760_v58 = vsel %vm7631_vm4, %v3755_v56, %v8535_v63  ;;  %v8610_v52 = vsel %vm7857_vm7, %v6135_v31, %v1356_v10  ;;  %v6467_v62 = vld [vmem:[%s7604_s28 + $0x78] sm:$0xf]  ;;  %v8661_v61 = vld [vmem:[%s7604_s28 + $0x7c] sm:$0xf] }
  0xe1   : > { %v3770_v57 = vsel %vm7631_vm4, %v3765_v29, %v3769_v33  ;;  %v8618_v11 = vsel %vm7857_vm7, %v1358_v51, %v1359_v37  ;;  %v3788_v45 = vor.u32 %v3787_v12, %v8566_v55  ;;  %v3791_v63 = vshll.u32 %v8582_v46, 16  ;;  %10624 = vst [vmem:[#allocation11_spill] sm:$0xff] %v8661_v61  ;;  %v8668_v56 = vld [vmem:[%s7604_s28 + $0xbc] sm:$0x1]  ;;  %v6470_v29 = vld [vmem:[%s7604_s28 + $0x84] sm:$0xf] }
  0xe2   : > { %v10621_v31 = vcombine.low %v8330_v35, %v8334_v27  ;;  %v8629_v33 = vrot.slane %v3778_v6, 4  ;;  %v6136_v10 = vrot.slane %v1220_v7, 9  ;;  %v1363_v30 = vrot.slane %v7497_v4, 5  ;;  %v6473_v6 = vld [vmem:[%s7604_s28 + $0x90] sm:$0xf] }
  0xe3   : > { %v10622_v44 = vcombine.low %v8338_v43, %v8353_v5  ;;  %v10623_v35 = vsel %vm7631_vm4, %v8476_v59, %v8436_v24  ;;  %v8643_v40 = vcombine.low %v3712_v0, %v3722_v50  ;;  %v3796_v17 = vshrl.u32 %v6464_v13, 16  ;;  %v7444_v43 = vld [vmem:[%s7604_s28 + $0xcc] sm:$0xff]   ;;  %v8684_v0 = vld [vmem:[%s7604_s28 + $0x88] sm:$0xf] }
  0xe4   : > { %v8641_v27 = vcombine.low %v10623_v35, %v3698_v3  ;;  %v8651_v5 = vcombine.low %v3736_v14, %v3746_v8  ;;  %v8655_v24 = vcombine.low %v3760_v58, %v3770_v57  ;;  %v8663_v1 = vrot.slane %v3788_v45, 4  ;;  %10625 = vst [vmem:[#allocation12_spill] sm:$0xff] %v8684_v0  ;;  %v8691_v58 = vld [vmem:[%s7604_s28 + $0x94] sm:$0xf]  ;;  %v8723_v51 = vld [vmem:[%s7604_s28 + $0x8c] sm:$0x1] }
  0xe5   : > { %7039 = vmatmul.mubr.msk.bf16.gmra.mrb[24].mxu0 %vm699_vm3, %v7442_v22  ;;  %v8665_v39 = vrot.slane %v3791_v63, 5  ;;  %v3799_v22 = vshll.u32 %v6464_v13, 16  ;;  %v8678_v12 = vsel %vm7857_vm7, %v6136_v10, %v1363_v30  ;;  %v3805_v3 = vshll.u32 %v8648_v53, 16  ;;  %10626 = vst [vmem:[#allocation13_spill] sm:$0xff] %v8691_v58  ;;  %v8694_v13 = vld [vmem:[%s7604_s28 + $0x74] sm:$0x1] }
  0xe6   : > { %6887 = vmatmul.mubr.msk.bf16.gmra.mrb[8].mxu1 %vm699_vm3, %v10621_v31  ;;  %7042 = vmatprep.mubr.msk.bf16.mxu0 %vm699_vm3, %v7443_v38  ;;  %v8680_v38 = vrot.slane %v1363_v30, 4  ;;  %v8687_v50 = vrot.slane %v3796_v17, 4  ;;  %v3809_v14 = vshrl.u32 %v8648_v53, 16  ;;  %v3820_v7 = vshrl.u32 %v6467_v62, 16 }
  0xe7   : > { %6890 = vmatprep.mubr.msk.bf16.mxu1 %vm699_vm3, %v10622_v44  ;;  %v3823_v8 = vshll.u32 %v6467_v62, 16  ;;  %v3829_v57 = vshll.u32 %v8661_v61, 16  ;;  %v3833_v45 = vshrl.u32 %v8661_v61, 16  ;;  %v3844_v63 = vshrl.u32 %v6470_v29, 16 }
  0xe8   : > { %v3847_v31 = vshll.u32 %v6470_v29, 16  ;;  %v3853_v10 = vshll.u32 %v8684_v0, 16  ;;  %v3857_v4 = vshrl.u32 %v8684_v0, 16  ;;  %v3868_v30 = vshrl.u32 %v6473_v6, 16 }
  0xe9   : > { %v3871_v44 = vshll.u32 %v6473_v6, 16  ;;  %v10627_v35 = vcombine.low %v8375_v19, %v8379_v47  ;;  %v3801_v17 = vrot.slane %v3799_v22, 5  ;;  %v8707_v62 = vrot.slane %v3805_v3, 5  ;;  %v6476_v3 = vld [vmem:[%s7604_s28 + $0x9c] sm:$0xf] }
  0xea   : > { %v3877_v29 = vshll.u32 %v8691_v58, 16  ;;  %v3881_v59 = vshrl.u32 %v8691_v58, 16  ;;  %v10628_v6 = vcombine.low %v8401_v9, %v8406_v25  ;;  %v3811_v19 = vrot.slane %v3809_v14, 4  ;;  %v8728_v9 = vld [vmem:[%s7604_s28 + $0x98] sm:$0x1] }
  0xeb   : > { %v3815_v47 = vshll.u32 %v8694_v13, 16  ;;  %v3825_v22 = vrot.slane %v3823_v8, 5  ;;  %v3835_v54 = vrot.slane %v3833_v45, 4  ;;  %v3846_v28 = vrot.slane %v3844_v63, 4 }
  0xec   : > { %v3849_v60 = vrot.slane %v3847_v31, 5  ;;  %v8725_v37 = vrot.slane %v3853_v10, 5  ;;  %v3859_v58 = vrot.slane %v3857_v4, 4  ;;  %v3870_v25 = vrot.slane %v3868_v30, 4 }
  0xed   : > { %7043 = vmatmul.mubr.msk.bf16.gmra.mrb[28].mxu0 %vm699_vm3, %v7444_v43  ;;  %v8710_v43 = vld [vmem:[%s7604_s28 + $0x80] sm:$0x1]  ;;  %v3873_v14 = vrot.slane %v3871_v44, 5  ;;  %v3883_v0 = vrot.slane %v3881_v59, 4  ;;  %v3892_v8 = vshrl.u32 %v6476_v3, 16  ;;  %v3802_v45 = vor.u32 %v3801_v17, %v8687_v50 }
  0xee   : > { %6891 = vmatmul.mubr.msk.bf16.gmra.mrb[12].mxu1 %vm699_vm3, %v10627_v35  ;;  %7048 = vmatprep.mubr.msk.bf16.mxu0 %vm699_vm3, %v8453_v42  ;;  %v3822_v42 = vrot.slane %v3820_v7, 4  ;;  %v8720_v35 = vrot.slane %v3829_v57, 5  ;;  %v8733_v7 = vld [vmem:[%s7604_s28 + $0xa0] sm:$0xf]  ;;  %v3895_v57 = vshll.u32 %v6476_v3, 16  ;;  %v3812_v63 = vor.u32 %v3811_v19, %v8707_v62 }
  0xef   : > { %6894 = vmatprep.mubr.msk.bf16.mxu1 %vm699_vm3, %v10628_v6  ;;  %v8730_v6 = vrot.slane %v3877_v29, 5  ;;  %10629 = vst [vmem:[#allocation14_spill] sm:$0xff] %v8733_v7  ;;  %v3839_v10 = vshll.u32 %v8710_v43, 16  ;;  %v3817_v4 = vrot.slane %v3815_v47, 5  ;;  %v3850_v30 = vor.u32 %v3849_v60, %v3846_v28  ;;  %v6479_v17 = vld [vmem:[%s7604_s28 + $0xa8] sm:$0xf] }
  0xf0   : > { %v3826_v31 = vor.u32 %v3825_v22, %v3822_v42  ;;  %v3836_v61 = vor.u32 %v3835_v54, %v8720_v35  ;;  %v3863_v44 = vshll.u32 %v8723_v51, 16  ;;  %v3860_v59 = vor.u32 %v3859_v58, %v8725_v37 }
  0xf1   : > { %v3874_v29 = vor.u32 %v3873_v14, %v3870_v25  ;;  %v3887_v3 = vshll.u32 %v8728_v9, 16  ;;  %v3901_v50 = vshll.u32 %v8733_v7, 16  ;;  %v10630_v19 = vcombine.low %v8413_v41, %v8417_v2 }
  0xf2   : > { %v3884_v60 = vor.u32 %v3883_v0, %v8730_v6  ;;  %v3894_v28 = vrot.slane %v3892_v8, 4  ;;  %v3897_v54 = vrot.slane %v3895_v57, 5  ;;  %v10631_v58 = vcombine.low %v8429_v32, %v8434_v21  ;;  %v8760_v21 = vld [vmem:[%s7604_s28 + $0xa4] sm:$0x1] }
  0xf3   : > { %v3803_v41 = vrot.slane %v3802_v45, 4  ;;  %v3813_v2 = vrot.slane %v3812_v63, 4  ;;  %v3827_v47 = vrot.slane %v3826_v31, 4  ;;  %v3841_v42 = vrot.slane %v3839_v10, 5 }
  0xf4   : > { %v3865_v22 = vrot.slane %v3863_v44, 5  ;;  %v3916_v0 = vshrl.u32 %v6479_v17, 16  ;;  %v3919_v25 = vshll.u32 %v6479_v17, 16  ;;  %v3851_v14 = vrot.slane %v3850_v30, 4  ;;  %v8781_v30 = vld [vmem:[%s7604_s28 + $0xac] sm:$0xf] }
  0xf5   : > { %7049 = vmatmul.mubr.msk.bf16.vlgmr.msra.gmra.mrb[0].mxu0 %vm699_vm3, %v8461_v18  ;;  %v3905_v18 = vshrl.u32 %v8733_v7, 16  ;;  %v3861_v8 = vrot.slane %v3860_v59, 4  ;;  %v3875_v57 = vrot.slane %v3874_v29, 4  ;;  %v3885_v32 = vrot.slane %v3884_v60, 4  ;;  %v8800_v59 = vld [vmem:[%s7604_s28 + $0xb0] sm:$0x1] }
  0xf6   : > { %6895 = vmatmul.mubr.msk.bf16.gmra.mrb[16].mxu1 %vm699_vm3, %v10630_v19  ;;  %7081 = vmatpush3.bf16.msra.mxu0 %v8459_v20  ;;  %v3837_v20 = vrot.slane %v3836_v61, 4  ;;  %v3889_v19 = vrot.slane %v3887_v3, 5  ;;  %v8762_v7 = vrot.slane %v3901_v50, 5  ;;  %v3794_v61 = vsel %vm7631_vm4, %v8663_v1, %v8665_v39  ;;  %v6482_v29 = vld [vmem:[%s7604_s28 + $0xb4] sm:$0xf] }
  0xf7   : > { %6898 = vmatprep.mubr.msk.bf16.mxu1 %vm699_vm3, %v10631_v58  ;;  %7052 = vmatprep.mubr.msk.bf16.mxu0 %vm699_vm3, %v8641_v27  ;;  %v3898_v58 = vor.u32 %v3897_v54, %v3894_v28  ;;  %v3907_v27 = vrot.slane %v3905_v18, 4  ;;  %v10632_v45 = vrot.slane %v8668_v56, 5  ;;  %v3808_v31 = vsel %vm7631_vm4, %v3803_v41, %v8707_v62  ;;  %v8830_v54 = vld [vmem:[%s7604_s28 + $0xb8] sm:$0xf] }
  0xf8   : > { %v3818_v10 = vsel %vm7631_vm4, %v3813_v2, %v3817_v4  ;;  %v3832_v1 = vsel %vm7631_vm4, %v3827_v47, %v8720_v35  ;;  %v3842_v39 = vsel %vm7631_vm4, %v3837_v20, %v3841_v42  ;;  %v3918_v56 = vrot.slane %v3916_v0, 4  ;;  %v6528_v2 = vld [vmem:[%s7604_s28 + $0x48] sm:$0xe]  ;;  %v6529_v20 = vld [vmem:[%s7604_s28 + $0x54] sm:$0xe] }
  0xf9   : > { %v8773_v63 = vsel %vm7857_vm7, %v8680_v38, %v10632_v45  ;;  %v3921_v44 = vrot.slane %v3919_v25, 5  ;;  %v3856_v38 = vsel %vm7631_vm4, %v3851_v14, %v8725_v37  ;;  %v3866_v62 = vsel %vm7631_vm4, %v3861_v8, %v3865_v22 }
  0xfa   : > { %v3880_v35 = vsel %vm7631_vm4, %v3875_v57, %v8730_v6  ;;  %v3911_v4 = vshll.u32 %v8760_v21, 16  ;;  %v3890_v37 = vsel %vm7631_vm4, %v3885_v32, %v3889_v19  ;;  %v8811_v3 = vrot.slane %v3898_v58, 4  ;;  %v10636_v19 = vld [vmem:[#allocation6_spill] sm:$0xff]  ;;  %v10637_v58 = vld [vmem:[#allocation8_spill] sm:$0xff] }
  0xfb   : > { %v3908_v6 = vor.u32 %v3907_v27, %v8762_v7  ;;  %v3925_v50 = vshll.u32 %v8781_v30, 16  ;;  %v10634_v17 = vcombine.low %v8579_v48, %v8589_v23  ;;  %v8826_v60 = vcombine.low %v3808_v31, %v3818_v10 }
  0xfc   : > { %v3929_v28 = vshrl.u32 %v8781_v30, 16  ;;  %v8832_v18 = vcombine.low %v3832_v1, %v3842_v39  ;;  %v3922_v48 = vor.u32 %v3921_v44, %v3918_v56  ;;  %v3935_v23 = vshll.u32 %v8800_v59, 16  ;;  %v10638_v44 = vld [vmem:[#allocation7_spill] sm:$0xff] }
  0xfd   : > { %7053 = vmatmul.mubr.msk.bf16.gmra.mrb[4].mxu0 %vm699_vm3, %v8643_v40  ;;  %v10633_v40 = vcombine.low %v8488_v16, %v8505_v26  ;;  %v10635_v16 = vsel %vm7631_vm4, %v8629_v33, %v8566_v55  ;;  %v3940_v41 = vshrl.u32 %v6482_v29, 16  ;;  %v8836_v47 = vcombine.low %v3856_v38, %v3866_v62  ;;  %v4777_v62 = vld [vmem:[%s10510_s2] sm:$0xff] }
  0xfe   : > { %7056 = vmatprep.mubr.msk.bf16.mxu0 %vm699_vm3, %v8651_v5  ;;  %v6497_v26 = vcombine.low %v10635_v16, %v3794_v61  ;;  %v6152_v5 = vcombine.low %v8678_v12, %v8773_v63  ;;  %v8838_v55 = vcombine.low %v3880_v35, %v3890_v37  ;;  %v8840_v33 = vrot.slane %v3911_v4, 5  ;;  %v6530_v61 = vld [vmem:[%s7604_s28 + $0x60] sm:$0xe]  ;;  %v6531_v35 = vld [vmem:[%s7604_s28 + $0x6c] sm:$0xe] }
  0xff   : > { %6899 = vmatmul.mubr.msk.bf16.gmra.mrb[20].mxu1 %vm699_vm3, %v10633_v40  ;;  %v3943_v42 = vshll.u32 %v6482_v29, 16  ;;  %v3904_v22 = vsel %vm7631_vm4, %v8811_v3, %v8762_v7  ;;  %v3909_v0 = vrot.slane %v3908_v6, 4  ;;  %v8847_v25 = vrot.slane %v3925_v50, 5  ;;  %v10640_v29 = vld [vmem:[#allocation9_spill] sm:$0xff]  ;;  %v4779_v3 = vld [vmem:[%s10510_s2 + $0x10] sm:$0xff]  ;;  %v10643_v12 = vld [vmem:[#allocation11_spill] sm:$0xff] }
 0x100   : > { %6902 = vmatprep.mubr.msk.bf16.mxu1 %vm699_vm3, %v10634_v17  ;;  %v3949_v14 = vshll.u32 %v8830_v54, 16  ;;  %v8850_v8 = vrot.slane %v3929_v28, 4  ;;  %v6544_v57 = vrot.slane %v6528_v2, 9  ;;  %v4402_v32 = vrot.slane %v10636_v19, 5  ;;  %v8890_v50 = vld [vmem:[%s7604_s28 + $0xbc] sm:$0x1] }
 0x101   : > { %v4405_v27 = vrot.slane %v10637_v58, 5  ;;  %v8855_v45 = vrot.slane %v3922_v48, 4  ;;  %v8857_v31 = vrot.slane %v3935_v23, 5  ;;  %v8859_v10 = vrot.slane %v3940_v41, 4  ;;  %v6485_v28 = vld [vmem:[%s7604_s28 + $0xc0] sm:$0xf] }
 0x102   : > { %v6545_v7 = vrot.slane %v6529_v20, 9  ;;  %v8863_v1 = vrot.slane %v3943_v42, 5  ;;  %v8867_v39 = vsel %vm7857_vm7, %v6544_v57, %v4402_v32  ;;  %v4404_v56 = vrot.slane %v4402_v32, 4  ;;  %v4778_v57 = vld [vmem:[%s10510_s2 + $0x8] sm:$0xff] }
 0x103   : > { %v4409_v38 = vrot.slane %v10638_v44, 5  ;;  %v10639_v4 = vcombine.low %v8596_v36, %v8603_v49  ;;  %v4412_v40 = vrot.slane %v10640_v29, 5  ;;  %v6546_v37 = vrot.slane %v6530_v61, 9  ;;  %v7445_v32 = vld [vmem:[%s7604_s28 + $0xc] sm:$0xff]  }
 0x104   : > { %v10641_v6 = vcombine.low %v8610_v52, %v8618_v11  ;;  %v3953_v36 = vshrl.u32 %v8830_v54, 16  ;;  %v8895_v49 = vsel %vm7857_vm7, %v4404_v56, %v4405_v27  ;;  %v10642_v11 = vld [vmem:[#allocation10_spill] sm:$0xff]  ;;  %v4419_v23 = vrot.slane %v8582_v46, 5 }
 0x105   : > { %7057 = vmatmul.mubr.msk.bf16.gmra.mrb[8].mxu0 %vm699_vm3, %v8655_v24  ;;  %v8879_v24 = vrot.slane %v3949_v14, 5  ;;  %v8899_v17 = vsel %vm7857_vm7, %v6545_v7, %v4409_v38  ;;  %v4411_v16 = vrot.slane %v4409_v38, 4  ;;  %v6560_v52 = vcombine.low %v8867_v39, %v8895_v49  ;;  %v8933_v27 = vld [vmem:[%s7604_s28 + $0xc4] sm:$0xf]  ;;  %v6270_v49 = vld [vmem:[%s7604_s28 + $0x9c] sm:$0xf] }
 0x106   : > { %7060 = vmatprep.mubr.msk.bf16.mxu0 %vm699_vm3, %v6497_v26  ;;  %v7529_v26 = vmov 0   ;;  %v4416_v48 = vrot.slane %v10642_v11, 5  ;;  %v6547_v41 = vrot.slane %v6531_v35, 9  ;;  %v3914_v2 = vsel %vm7631_vm4, %v3909_v0, %v8840_v33  ;;  %v6261_v35 = vld [vmem:[%s7604_s28 + $0x78] sm:$0xf] }
 0x107   : > { %6903 = vmatmul.mubr.msk.bf16.gmra.mrb[24].mxu1 %vm699_vm3, %v10639_v4  ;;  %7407 = vset.pattern.permute.xlu0 %v7529_v26  ;;  %v8911_v42 = vsel %vm7857_vm7, %v4411_v16, %v4412_v40  ;;  %v4423_v20 = vrot.slane %v8648_v53, 5  ;;  %v4426_v14 = vrot.slane %v8694_v13, 5  ;;  %v3932_v46 = vor.u32 %v8850_v8, %v8847_v25  ;;  %v6532_v53 = vld [vmem:[%s7604_s28 + $0x78] sm:$0xe]  ;;  %v4781_v40 = vld [vmem:[%s10510_s2 + $0x20] sm:$0xff] }
 0x108   : > { %6906 = vmatprep.mubr.msk.bf16.mxu1 %vm699_vm3, %v10641_v6  ;;  %4811 = vperm.xlu0 %7407, %v4777_v62   ;;  %v6561_v19 = vcombine.low %v8899_v17, %v8911_v42  ;;  %v8924_v33 = vsel %vm7857_vm7, %v6546_v37, %v4416_v48  ;;  %v4418_v0 = vrot.slane %v4416_v48, 4  ;;  %v4780_v13 = vld [vmem:[%s10510_s2 + $0x18] sm:$0xff]  ;;  %v3959_v58 = vshll.u32 %v8890_v50, 16 }
 0x109   : > { %7408 = vset.pattern.permute.xlu1 %v7529_v26  ;;  %v3964_v8 = vshrl.u32 %v6485_v28, 16  ;;  %v8937_v61 = vsel %vm7857_vm7, %v6547_v41, %v4423_v20  ;;  %v4425_v7 = vrot.slane %v4423_v20, 4  ;;  %v8939_v56 = vcombine.low %v3904_v22, %v3914_v2  ;;  %v4782_v26 = vld [vmem:[%s10510_s2 + $0x28] sm:$0xff]  ;;  %v10645_v41 = vld [vmem:[#allocation5_spill] sm:$0xff] }
 0x10a   : > { %4821 = vperm.xlu1 %7408, %v4779_v3   ;;  %v3928_v44 = vsel %vm7631_vm4, %v8855_v45, %v8847_v25  ;;  %v3967_v38 = vshll.u32 %v6485_v28, 16  ;;  %v8947_v62 = vsel %vm7857_vm7, %v4418_v0, %v4419_v23  ;;  %v8952_v4 = vrot.slane %v3953_v36, 4  ;;  %v6533_v3 = vld [vmem:[%s7604_s28 + $0x84] sm:$0xe]  ;;  %v10644_v23 = vld [vmem:[#allocation4_spill] sm:$0xff]  ;;  %v4788_v25 = vld [vmem:[%s10510_s2 + $0x58] sm:$0xff] }
 0x10b   : > { %v6562_v22 = vcombine.low %v8924_v33, %v8947_v62  ;;  %v8958_v29 = vsel %vm7857_vm7, %v4425_v7, %v4426_v14  ;;  %v6548_v37 = vrot.slane %v6532_v53, 9  ;;  %v3973_v6 = vshll.u32 %v8933_v27, 16  ;;  %v8991_v14 = vld [vmem:[%s7604_s28 + $0xc8] sm:$0x1]  ;;  %v4783_v53 = vld [vmem:[%s10510_s2 + $0x30] sm:$0xff]  ;;  %v7449_v45 = vld [vmem:[%s7604_s28 + $0x3c] sm:$0xff]  }
 0x10c   : > { %4816 = vperm.xlu0 %7407, %v4778_v57   ;;  %v3977_v36 = vshrl.u32 %v8933_v27, 16  ;;  %v6563_v16 = vcombine.low %v8937_v61, %v8958_v29  ;;  %v4430_v63 = vrot.slane %v10643_v12, 5  ;;  %v2291_v28 = vshll.u32 %v6261_v35, 16  ;;  %v6488_v7 = vld [vmem:[%s7604_s28 + $0xcc] sm:$0xf] }
 0x10d   : > { %7061 = vmatmul.mubr.msk.bf16.gmra.mrb[12].mxu0 %vm699_vm3, %v8826_v60  ;;  %v8970_v60 = vrot.slane %v3932_v46, 4  ;;  %v8982_v11 = vrot.slane %v3964_v8, 4  ;;  %v8984_v48 = vrot.slane %v3967_v38, 5  ;;  %v2310_v2 = vsel %vm7631_vm4, %v10645_v41, %v10644_v23  ;;  %v10646_v38 = vld [vmem:[#allocation12_spill] sm:$0xff]  ;;  %v7515_v29 = vld [vmem:[%s7604_s28 + $0xac] sm:$0xf] }
 0x10e   : > { %4826 = vperm.xlu1 %7408, %v4780_v13   ;;  %7064 = vmatprep.mubr.msk.bf16.mxu0 %vm699_vm3, %v8832_v18  ;;  %v2288_v18 = vshrl.u32 %v6261_v35, 16  ;;  %v6549_v20 = vrot.slane %v6533_v3, 9  ;;  %v4432_v57 = vrot.slane %v4430_v63, 4  ;;  %v2293_v0 = vrot.slane %v2291_v28, 5  ;;  %v7446_v13 = vld [vmem:[%s7604_s28 + $0x18] sm:$0xff]   ;;  %v7447_v3 = vld [vmem:[%s7604_s28 + $0x24] sm:$0xff]  }
 0x10f   : > { %6907 = vmatmul.mubr.msk.bf16.gmra.mrb[28].mxu1 %vm699_vm3, %v6152_v5  ;;  %v4433_v5 = vrot.slane %v8710_v43, 5  ;;  %v8995_v43 = vsel %vm7857_vm7, %v6548_v37, %v4430_v63  ;;  %v3956_v8 = vor.u32 %v8952_v4, %v8879_v24  ;;  %v4437_v35 = vrot.slane %v10646_v38, 5  ;;  %v4784_v37 = vld [vmem:[%s10510_s2 + $0x38] sm:$0xff]  ;;  %v9015_v63 = vld [vmem:[%s7604_s28 + $0xd0] sm:$0xf] }
 0x110   : > { %6912 = vmatprep.mubr.msk.bf16.mxu1 %vm699_vm3, %v7445_v32  ;;  %4831 = vperm.xlu0 %7407, %v4781_v40   ;;  %v2290_v46 = vrot.slane %v2288_v18, 4  ;;  %v3946_v32 = vor.u32 %v8863_v1, %v8859_v10  ;;  %v4440_v40 = vrot.slane %v8723_v51, 5  ;;  %v9012_v12 = vrot.slane %v3973_v6, 5  ;;  %v6534_v18 = vld [vmem:[%s7604_s28 + $0x90] sm:$0xe] }
 0x111   : > { %v9019_v10 = vsel %vm7857_vm7, %v4432_v57, %v4433_v5  ;;  %v3938_v51 = vsel %vm7631_vm4, %v8970_v60, %v8857_v31  ;;  %v9029_v6 = vsel %vm7857_vm7, %v6549_v20, %v4437_v35  ;;  %v3970_v5 = vor.u32 %v8984_v48, %v8982_v11  ;;  %v4785_v60 = vld [vmem:[%s10510_s2 + $0x40] sm:$0xff]  ;;  %v4786_v20 = vld [vmem:[%s10510_s2 + $0x48] sm:$0xff] }
 0x112   : > { %4836 = vperm.xlu1 %7408, %v4782_v26   ;;  %v3979_v26 = vrot.slane %v3977_v36, 4  ;;  %v2294_v1 = vor.u32 %v2293_v0, %v2290_v46  ;;  %v6564_v4 = vcombine.low %v8995_v43, %v9019_v10  ;;  %v4439_v36 = vrot.slane %v4437_v35, 4  ;;  %v10647_v57 = vld [vmem:[#allocation2_spill] sm:$0xff]  ;;  %v10648_v46 = vld [vmem:[#allocation3_spill] sm:$0xff]  ;;  %v7516_v10 = vld [vmem:[%s7604_s28 + $0xb8] sm:$0xf] }
 0x113   : > { %v3983_v28 = vshll.u32 %v8991_v14, 16  ;;  %v3988_v23 = vshrl.u32 %v6488_v7, 16  ;;  %v3991_v41 = vshll.u32 %v6488_v7, 16  ;;  %v4001_v11 = vshrl.u32 %v9015_v63, 16 }
 0x114   : > { %4841 = vperm.xlu0 %7407, %v4783_v53   ;;  %v2295_v31 = vrot.slane %v2294_v1, 4  ;;  %v9047_v48 = vsel %vm7857_vm7, %v4439_v36, %v4440_v40  ;;  %v3947_v7 = vrot.slane %v3946_v32, 4  ;;  %v3957_v38 = vrot.slane %v3956_v8, 4  ;;  %v9063_v40 = vld [vmem:[%s7604_s28 + $0xd4] sm:$0x1]  ;;  %v10649_v1 = vld [vmem:[#allocation13_spill] sm:$0xff] }
 0x115   : > { %7065 = vmatmul.mubr.msk.bf16.gmra.mrb[16].mxu0 %vm699_vm3, %v8836_v47  ;;  %v3997_v47 = vshll.u32 %v9015_v63, 16  ;;  %v6565_v53 = vcombine.low %v9029_v6, %v9047_v48  ;;  %v3961_v35 = vrot.slane %v3959_v58, 5  ;;  %v4444_v36 = vrot.slane %v10649_v1, 5  ;;  %v6535_v8 = vld [vmem:[%s7604_s28 + $0x9c] sm:$0xe]  ;;  %v4787_v58 = vld [vmem:[%s10510_s2 + $0x50] sm:$0xff] }
 0x116   : > { %4846 = vperm.xlu1 %7408, %v4784_v37   ;;  %7068 = vmatprep.mubr.msk.bf16.mxu0 %vm699_vm3, %v8838_v55  ;;  %v3980_v55 = vor.u32 %v3979_v26, %v9012_v12  ;;  %v2300_v0 = vsel %vm7631_vm4, %v2295_v31, %v10648_v46  ;;  %v3985_v26 = vrot.slane %v3983_v28, 5  ;;  %v4447_v32 = vrot.slane %v8728_v9, 5  ;;  %v7499_v1 = vld [vmem:[%s7604_s28 + $0x1c] sm:$0xf] }
 0x117   : > { %6913 = vmatmul.mubr.msk.bf16.vlgmr.msra.gmra.mrb[0].mxu1 %vm699_vm3, %v7446_v13  ;;  %v6550_v13 = vrot.slane %v6534_v18, 9  ;;  %v9065_v37 = vcombine.low %v2300_v0, %v2310_v2  ;;  %v7448_v2 = vld [vmem:[%s7604_s28 + $0x30] sm:$0xff]   ;;  %v3990_v18 = vrot.slane %v3988_v23, 4  ;;  %v3993_v31 = vrot.slane %v3991_v41, 5  ;;  %v6524_v0 = vld [vmem:[%s7604_s28 + $0x18] sm:$0xe] }
 0x118   : > { %7115 = vmatpush3.bf16.msra.mxu1 %v10647_v57  ;;  %6916 = vmatprep.mubr.msk.bf16.mxu1 %vm699_vm3, %v7447_v3  ;;  %v6503_v3 = vcombine.low %v3928_v44, %v3938_v51  ;;  %v4003_v57 = vrot.slane %v4001_v11, 4  ;;  %v3971_v44 = vrot.slane %v3970_v5, 4  ;;  %v3981_v51 = vrot.slane %v3980_v55, 4 }
 0x119   : > { %4851 = vperm.xlu0 %7407, %v4785_v60   ;;  %v9079_v60 = vrot.slane %v3997_v47, 5  ;;  %v9087_v9 = vsel %vm7857_vm7, %v6550_v13, %v4444_v36  ;;  %v4446_v28 = vrot.slane %v4444_v36, 4  ;;  %v3952_v23 = vsel %vm7631_vm4, %v3947_v7, %v8879_v24  ;;  %v4789_v24 = vld [vmem:[%s10510_s2 + $0x60] sm:$0xff] }
 0x11a   : > { %4856 = vperm.xlu1 %7408, %v4786_v20   ;;  %v3962_v41 = vsel %vm7631_vm4, %v3957_v38, %v3961_v35  ;;  %v4007_v5 = vshll.u32 %v9063_v40, 16  ;;  %v6551_v11 = vrot.slane %v6535_v8, 9  ;;  %v10650_v20 = vld [vmem:[#allocation14_spill] sm:$0xff]  ;;  %v4454_v7 = vrot.slane %v8760_v21, 5  ;;  %v4790_v38 = vld [vmem:[%s10510_s2 + $0x68] sm:$0xff] }
 0x11b   : > { %v9099_v47 = vsel %vm7857_vm7, %v4446_v28, %v4447_v32  ;;  %v4451_v55 = vrot.slane %v10650_v20, 5  ;;  %v4004_v46 = vor.u32 %v4003_v57, %v9079_v60  ;;  %v3976_v35 = vsel %vm7631_vm4, %v3971_v44, %v9012_v12  ;;  %v4791_v12 = vld [vmem:[%s10510_s2 + $0x70] sm:$0xff]  ;;  %v4792_v44 = vld [vmem:[%s10510_s2 + $0x78] sm:$0xff]  ;;  %v6525_v20 = vld [vmem:[%s7604_s28 + $0x24] sm:$0xe] }
 0x11c   : > { %v6566_v13 = vcombine.low %v9087_v9, %v9099_v47  ;;  %v4374_v36 = vrot.slane %v7499_v1, 5  ;;  %v6504_v8 = vcombine.low %v3952_v23, %v3962_v41  ;;  %v7500_v23 = vld [vmem:[%s7604_s28 + $0x20] sm:$0x1]  ;;  %v7502_v1 = vld [vmem:[%s7604_s28 + $0x34] sm:$0xf]  ;;  %vm5332_vm0 = vcmask 126016  }
 0x11d   : > { %4861 = vperm.xlu0 %7407, %v4787_v58   ;;  %7069 = vmatmul.mubr.msk.bf16.gmra.mrb[20].mxu0 %vm699_vm3, %v8939_v56  ;;  %v3994_v56 = vor.u32 %v3993_v31, %v3990_v18  ;;  %v9124_v21 = vsel %vm7857_vm7, %v6551_v11, %v4451_v55  ;;  %v4453_v32 = vrot.slane %v4451_v55, 4  ;;  %v4009_v58 = vrot.slane %v4007_v5, 5  ;;  %v6536_v18 = vld [vmem:[%s7604_s28 + $0xa8] sm:$0xe] }
 0x11e   : > { %4866 = vperm.xlu1 %7408, %v4788_v25   ;;  %7072 = vmatprep.mubr.msk.bf16.mxu0 %vm699_vm3, %v6503_v3  ;;  %v3986_v3 = vsel %vm7631_vm4, %v3981_v51, %v3985_v26  ;;  %v7450_v26 = vld [vmem:[%s7604_s28 + $0x48] sm:$0xff]   ;;  %v4005_v25 = vrot.slane %v4004_v46, 4  ;;  %v7451_v51 = vld [vmem:[%s7604_s28 + $0x54] sm:$0xff]   ;;  %v4376_v28 = vrot.slane %v4374_v36, 4  ;;  %v4377_v41 = vrot.slane %v7500_v23, 5 }
 0x11f   : > { %6917 = vmatmul.mubr.msk.bf16.gmra.mrb[4].mxu1 %vm699_vm3, %v7448_v2  ;;  %v6540_v2 = vrot.slane %v6524_v0, 9  ;;  %v6505_v31 = vcombine.low %v3976_v35, %v3986_v3  ;;  %v3995_v57 = vrot.slane %v3994_v56, 4  ;;  %v6552_v11 = vrot.slane %v6536_v18, 9  ;;  %v4793_v56 = vld [vmem:[%s10510_s2 + $0x80] sm:$0xff]  ;;  %v4794_v35 = vld [vmem:[%s10510_s2 + $0x88] sm:$0xff] }
 0x120   : > { %6920 = vmatprep.mubr.msk.bf16.mxu1 %vm699_vm3, %v7449_v45  ;;  %v9133_v45 = vsel %vm7857_vm7, %v4453_v32, %v4454_v7  ;;  %v4458_v55 = vrot.slane %v8781_v30, 5  ;;  %v4010_v0 = vsel %vm7631_vm4, %v4005_v25, %v4009_v58  ;;  %v6526_v3 = vld [vmem:[%s7604_s28 + $0x30] sm:$0xe]  ;;  %v4388_v32 = vrot.slane %v7502_v1, 5  ;;  %v7503_v18 = vld [vmem:[%s7604_s28 + $0x2c] sm:$0x1] }
 0x121   : > { %4871 = vperm.xlu0 %7407, %v4789_v24   ;;  %v6567_v5 = vcombine.low %v9124_v21, %v9133_v45  ;;  %v4461_v24 = vrot.slane %v8800_v59, 5  ;;  %v4000_v46 = vsel %vm7631_vm4, %v3995_v57, %v9079_v60  ;;  %v4375_v30 = vsel %vm7857_vm7, %v6540_v2, %v4374_v36  ;;  %v7501_v59 = vld [vmem:[%s7604_s28 + $0x28] sm:$0xf]  ;;  %v4795_v57 = vld [vmem:[%s10510_s2 + $0x90] sm:$0xff]  ;;  %v7452_v25 = vld [vmem:[%s7604_s28 + $0x60] sm:$0xff]  }
 0x122   : > { %4876 = vperm.xlu1 %7408, %v4790_v38   ;;  %v4381_v7 = vrot.slane %v7501_v59, 5  ;;  %v6537_v38 = vld [vmem:[%s7604_s28 + $0xb4] sm:$0xe]  ;;  %v4378_v60 = vsel %vm7857_vm7, %v4376_v28, %v4377_v41  ;;  %v4460_v36 = vrot.slane %v4458_v55, 4  ;;  %v6541_v58 = vrot.slane %v6525_v20, 9  ;;  %v4796_v41 = vld [vmem:[%s10510_s2 + $0x98] sm:$0xff] }
 0x123   : > { %v6506_v2 = vcombine.low %v4000_v46, %v4010_v0  ;;  %v6542_v28 = vrot.slane %v6526_v3, 9  ;;  %v4390_v20 = vrot.slane %v4388_v32, 4  ;;  %v4468_v46 = vrot.slane %v8890_v50, 5  ;;  %v6527_v0 = vld [vmem:[%s7604_s28 + $0x3c] sm:$0xe]  ;;  %v4797_v3 = vld [vmem:[%s10510_s2 + $0xa0] sm:$0xff] }
 0x124   : > { %v4798_v1 = vld [vmem:[%s10510_s2 + $0xa8] sm:$0xff] }
 0x125   : > { %4881 = vperm.xlu0 %7407, %v4791_v12   ;;  %7073 = vmatmul.mubr.msk.bf16.gmra.mrb[24].mxu0 %vm699_vm3, %v6504_v8  ;;  %v9170_v8 = vsel %vm7857_vm7, %v6552_v11, %v4458_v55  ;;  %v4384_v12 = vrot.slane %v7503_v18, 5  ;;  %v7453_v11 = vld [vmem:[%s7604_s28 + $0x6c] sm:$0xff]   ;;  %v7504_v55 = vld [vmem:[%s7604_s28 + $0x38] sm:$0x1]  ;;  %v7520_v21 = vld [vmem:[%s7604_s28 + $0xc8] sm:$0x1] }
 0x126   : > { %4886 = vperm.xlu1 %7408, %v4792_v44   ;;  %7076 = vmatprep.mubr.msk.bf16.mxu0 %vm699_vm3, %v6505_v31  ;;  %v6553_v31 = vrot.slane %v6537_v38, 9  ;;  %v6556_v44 = vcombine.low %v4375_v30, %v4378_v60  ;;  %v7505_v30 = vld [vmem:[%s7604_s28 + $0x40] sm:$0xf]  ;;  %v2451_v45 = vshll.u32 %v7520_v21, 16 }
 0x127   : > { %6921 = vmatmul.mubr.msk.bf16.gmra.mrb[8].mxu1 %vm699_vm3, %v7450_v26  ;;  %v9175_v26 = vsel %vm7857_vm7, %v4460_v36, %v4461_v24  ;;  %v4391_v24 = vrot.slane %v7504_v55, 5  ;;  %v4395_v59 = vrot.slane %v7505_v30, 5  ;;  %v6538_v60 = vld [vmem:[%s7604_s28 + $0xc0] sm:$0xe]  ;;  %v4389_v36 = vsel %vm7857_vm7, %v6542_v28, %v4388_v32  ;;  %v4799_v28 = vld [vmem:[%s10510_s2 + $0xb0] sm:$0xff] }
 0x128   : > { %6924 = vmatprep.mubr.msk.bf16.mxu1 %vm699_vm3, %v7451_v51  ;;  %v4383_v51 = vrot.slane %v4381_v7, 4  ;;  %v6568_v23 = vcombine.low %v9170_v8, %v9175_v26 }
 0x129   : > { %4891 = vperm.xlu0 %7407, %v4793_v56   ;;  %v4465_v56 = vrot.slane %v8830_v54, 5  ;;  %v4382_v54 = vsel %vm7857_vm7, %v6541_v58, %v4381_v7  ;;  %v6543_v58 = vrot.slane %v6527_v0, 9  ;;  %v4397_v32 = vrot.slane %v4395_v59, 4 }
 0x12a   : > { %4896 = vperm.xlu1 %7408, %v4794_v35   ;;  %v4385_v50 = vsel %vm7857_vm7, %v4383_v51, %v4384_v12  ;;  %v6554_v12 = vrot.slane %v6538_v60, 9  ;;  %v4475_v51 = vrot.slane %v8991_v14, 5  ;;  %v6539_v14 = vld [vmem:[%s7604_s28 + $0xcc] sm:$0xe] }
 0x12b   : > { %v9195_v38 = vsel %vm7857_vm7, %v6553_v31, %v4465_v56  ;;  %v4467_v35 = vrot.slane %v4465_v56, 4  ;;  %v4472_v31 = vrot.slane %v8933_v27, 5  ;;  %v7455_v56 = vld [vmem:[%s7604_s28 + $0x84] sm:$0xff]   ;;  %v4396_v0 = vsel %vm7857_vm7, %v6543_v58, %v4395_v59 }
 0x12c   : > { %v4479_v58 = vrot.slane %v9015_v63, 5 }
 0x12d   : > { %4901 = vperm.xlu0 %7407, %v4795_v57   ;;  %7077 = vmatmul.mubr.msk.bf16.gmra.mrb[28].mxu0 %vm699_vm3, %v6506_v2  ;;  %v4392_v2 = vsel %vm7857_vm7, %v4390_v20, %v4391_v24  ;;  %v9217_v7 = vsel %vm7857_vm7, %v4467_v35, %v4468_v46  ;;  %v6557_v57 = vcombine.low %v4382_v54, %v4385_v50  ;;  %v6258_v20 = vld [vmem:[%s7604_s28 + $0x6c] sm:$0xf]  ;;  %v4474_v27 = vrot.slane %v4472_v31, 4  ;;  %v4800_v24 = vld [vmem:[%s10510_s2 + $0xb8] sm:$0xff]  ;;  %v7507_v50 = vld [vmem:[%s7604_s28 + $0x70] sm:$0xf] }
 0x12e   : > { %4906 = vperm.xlu1 %7408, %v4796_v41   ;;  %7082 = vmatprep.mubr.msk.bf16.mxu0 %vm699_vm3, %v6556_v44  ;;  %v6569_v18 = vcombine.low %v9195_v38, %v9217_v7  ;;  %v7454_v41 = vld [vmem:[%s7604_s28 + $0x78] sm:$0xff]   ;;  %v9231_v55 = vsel %vm7857_vm7, %v6554_v12, %v4472_v31  ;;  %v2264_v35 = vshrl.u32 %v6258_v20, 16  ;;  %v2267_v54 = vshll.u32 %v6258_v20, 16  ;;  %v6264_v20 = vld [vmem:[%s7604_s28 + $0x84] sm:$0xf] }
 0x12f   : > { %6925 = vmatmul.mubr.msk.bf16.gmra.mrb[12].mxu1 %vm699_vm3, %v7452_v25  ;;  %v7506_v25 = vld [vmem:[%s7604_s28 + $0x44] sm:$0x1]  ;;  %v9240_v46 = vsel %vm7857_vm7, %v4474_v27, %v4475_v51  ;;  %v2273_v59 = vshll.u32 %v7507_v50, 16  ;;  %v4482_v12 = vrot.slane %v9063_v40, 5  ;;  %v4804_v40 = vld [vmem:[%s10510_s2 + $0xd8] sm:$0xff] }
 0x130   : > { %6928 = vmatprep.mubr.msk.bf16.mxu1 %vm699_vm3, %v7453_v11  ;;  %v4398_v44 = vrot.slane %v7506_v25, 5  ;;  %v6558_v11 = vcombine.low %v4389_v36, %v4392_v2  ;;  %v6570_v60 = vcombine.low %v9231_v55, %v9240_v46  ;;  %v6555_v36 = vrot.slane %v6539_v14, 9  ;;  %v4802_v2 = vld [vmem:[%s10510_s2 + $0xc8] sm:$0xff]  ;;  %v4803_v25 = vld [vmem:[%s10510_s2 + $0xd0] sm:$0xff] }
 0x131   : > { %4911 = vperm.xlu0 %7407, %v4797_v3   ;;  %v4801_v3 = vld [vmem:[%s10510_s2 + $0xc0] sm:$0xff]  ;;  %v2266_v51 = vrot.slane %v2264_v35, 4  ;;  %v2312_v35 = vshrl.u32 %v6264_v20, 16 }
 0x132   : > { %4916 = vperm.xlu1 %7408, %v4798_v1   ;;  %v4399_v30 = vsel %vm7857_vm7, %v4397_v32, %v4398_v44  ;;  %v2277_v1 = vshrl.u32 %v7507_v50, 16  ;;  %v4481_v32 = vrot.slane %v4479_v58, 4  ;;  %v7456_v44 = vld [vmem:[%s7604_s28 + $0x90] sm:$0xff]   ;;  %v7509_v50 = vld [vmem:[%s7604_s28 + $0x88] sm:$0xf] }
 0x133   : > { %v6559_v31 = vcombine.low %v4396_v0, %v4399_v30  ;;  %v4805_v0 = vld [vmem:[%s10510_s2 + $0xe0] sm:$0xff] }
 0x134   : > { %v2279_v63 = vrot.slane %v2277_v1, 4  ;;  %v9278_v27 = vsel %vm7857_vm7, %v4481_v32, %v4482_v12  ;;  %v2325_v1 = vshrl.u32 %v7509_v50, 16 }
 0x135   : > { %4921 = vperm.xlu0 %7407, %v4799_v28   ;;  %7083 = vmatmul.mubr.msk.bf16.vlgmr.msra.gmra.mrb[0].mxu0 %vm699_vm3, %v6557_v57  ;;  %v9263_v57 = vsel %vm7857_vm7, %v6555_v36, %v4479_v58  ;;  %v2269_v28 = vrot.slane %v2267_v54, 5  ;;  %v4806_v54 = vld [vmem:[%s10510_s2 + $0xe8] sm:$0xff]  ;;  %v6267_v36 = vld [vmem:[%s7604_s28 + $0x90] sm:$0xf]  ;;  %vm5685_vm7 = vcmask 585216  }
 0x136   : > { %4926 = vperm.xlu1 %7408, %v4800_v24   ;;  %7086 = vmatprep.mubr.msk.bf16.mxu0 %vm699_vm3, %v6558_v11  ;;  %v7457_v11 = vld [vmem:[%s7604_s28 + $0x9c] sm:$0xff]   ;;  %v6571_v24 = vcombine.low %v9263_v57, %v9278_v27 }
 0x137   : > { %6929 = vmatmul.mubr.msk.bf16.gmra.mrb[16].mxu1 %vm699_vm3, %v7454_v41  ;;  %v9269_v41 = vrot.slane %v2273_v59, 5  ;;  %v2270_v15 = vor.u32 %v2269_v28, %v2266_v51  ;;  %v2321_v59 = vshll.u32 %v7509_v50, 16  ;;  %v2327_v28 = vrot.slane %v2325_v1, 4 }
 0x138   : > { %6932 = vmatprep.mubr.msk.bf16.mxu1 %vm699_vm3, %v7455_v56  ;;  %v7508_v56 = vld [vmem:[%s7604_s28 + $0x74] sm:$0x1] }
 0x139   : > { %4931 = vperm.xlu0 %7407, %v4801_v3   ;;  %v2283_v14 = vshll.u32 %v7508_v56, 16  ;;  %v2280_v30 = vor.u32 %v2279_v63, %v9269_v41  ;;  %v2315_v3 = vshll.u32 %v6264_v20, 16  ;;  %v2271_v58 = vrot.slane %v2270_v15, 4  ;;  %v7511_v15 = vld [vmem:[%s7604_s28 + $0xa0] sm:$0xf] }
 0x13a   : > { %4936 = vperm.xlu1 %7408, %v4802_v2   ;;  %v7458_v2 = vld [vmem:[%s7604_s28 + $0xa8] sm:$0xff]   ;;  %v9308_v51 = vrot.slane %v2321_v59, 5  ;;  %v2336_v63 = vshrl.u32 %v6267_v36, 16 }
 0x13b   : > { %v2285_v39 = vrot.slane %v2283_v14, 5  ;;  %v2281_v12 = vrot.slane %v2280_v30, 4  ;;  %v2317_v32 = vrot.slane %v2315_v3, 5  ;;  %v2360_v14 = vshrl.u32 %v6270_v49, 16 }
 0x13c   : > { %v2369_v30 = vshll.u32 %v7511_v15, 16  ;;  %v2276_v17 = vsel %vm7631_vm4, %v2271_v58, %v9269_v41  ;;  %v2328_v50 = vor.u32 %v2327_v28, %v9308_v51  ;;  %v2338_v59 = vrot.slane %v2336_v63, 4 }
 0x13d   : > { %4941 = vperm.xlu0 %7407, %v4803_v25   ;;  %7087 = vmatmul.mubr.msk.bf16.gmra.mrb[4].mxu0 %vm699_vm3, %v6559_v31  ;;  %v2314_v31 = vrot.slane %v2312_v35, 4  ;;  %v4808_v25 = vld [vmem:[%s10510_s2 + $0xf8] sm:$0xff]  ;;  %v2373_v35 = vshrl.u32 %v7511_v15, 16  ;;  %v2286_v42 = vsel %vm7631_vm4, %v2281_v12, %v2285_v39  ;;  %v2362_v1 = vrot.slane %v2360_v14, 4 }
 0x13e   : > { %4946 = vperm.xlu1 %7408, %v4804_v40   ;;  %7090 = vmatprep.mubr.msk.bf16.mxu0 %vm699_vm3, %v6560_v52  ;;  %v4807_v52 = vld [vmem:[%s10510_s2 + $0xf0] sm:$0xff]  ;;  %v2339_v40 = vshll.u32 %v6267_v36, 16  ;;  %v9331_v41 = vrot.slane %v2369_v30, 5  ;;  %v2329_v12 = vrot.slane %v2328_v50, 4 }
 0x13f   : > { %6933 = vmatmul.mubr.msk.bf16.gmra.mrb[20].mxu1 %vm699_vm3, %v7456_v44  ;;  %v7459_v44 = vld [vmem:[%s7604_s28 + $0xb4] sm:$0xff]   ;;  %v2375_v39 = vrot.slane %v2373_v35, 4 }
 0x140   : > { %6936 = vmatprep.mubr.msk.bf16.mxu1 %vm699_vm3, %v7457_v11  ;;  %v7510_v11 = vld [vmem:[%s7604_s28 + $0x94] sm:$0xf]  ;;  %v2341_v33 = vrot.slane %v2339_v40, 5 }
 0x141   : > { %4951 = vperm.xlu0 %7407, %v4805_v0   ;;  %v2345_v20 = vshll.u32 %v7510_v11, 16  ;;  %v2349_v56 = vshrl.u32 %v7510_v11, 16  ;;  %v2363_v0 = vshll.u32 %v6270_v49, 16  ;;  %v7460_v49 = vld [vmem:[%s7604_s28 + $0xc0] sm:$0xff]   ;;  %v2376_v40 = vor.u32 %v2375_v39, %v9331_v41 }
 0x142   : > { %4956 = vperm.xlu1 %7408, %v4806_v54   ;;  %v2318_v54 = vor.u32 %v2317_v32, %v2314_v31  ;;  %v2342_v31 = vor.u32 %v2341_v33, %v2338_v59  ;;  %v7513_v32 = vld [vmem:[%s7604_s28 + $0x98] sm:$0x1]  ;;  %v7514_v11 = vld [vmem:[%s7604_s28 + $0xa4] sm:$0x1] }
 0x143   : > { %v9329_v62 = vrot.slane %v2345_v20, 5  ;;  %v2365_v36 = vrot.slane %v2363_v0, 5  ;;  %v2379_v20 = vshll.u32 %v7514_v11, 16  ;;  %v2397_v0 = vshrl.u32 %v7515_v29, 16 }
 0x144   : > { %v2319_v58 = vrot.slane %v2318_v54, 4  ;;  %v2343_v35 = vrot.slane %v2342_v31, 4  ;;  %v2377_v50 = vrot.slane %v2376_v40, 4 }
 0x145   : > { %4961 = vperm.xlu0 %7407, %v4807_v52   ;;  %7091 = vmatmul.mubr.msk.bf16.gmra.mrb[8].mxu0 %vm699_vm3, %v6561_v19  ;;  %v7512_v19 = vld [vmem:[%s7604_s28 + $0x8c] sm:$0x1]  ;;  %v6290_v52 = vcombine.low %v2276_v17, %v2286_v42  ;;  %v2366_v63 = vor.u32 %v2365_v36, %v2362_v1  ;;  %v2381_v59 = vrot.slane %v2379_v20, 5  ;;  %v2399_v36 = vrot.slane %v2397_v0, 4  ;;  %v7519_v20 = vld [vmem:[%s7604_s28 + $0xbc] sm:$0x1] }
 0x146   : > { %4966 = vperm.xlu1 %7408, %v4808_v25   ;;  %7094 = vmatprep.mubr.msk.bf16.mxu0 %vm699_vm3, %v6562_v22  ;;  %v2331_v3 = vshll.u32 %v7512_v19, 16  ;;  %v2351_v22 = vrot.slane %v2349_v56, 4  ;;  %v2355_v25 = vshll.u32 %v7513_v32, 16  ;;  %v6276_v56 = vld [vmem:[%s7604_s28 + $0xb4] sm:$0xf]  ;;  %v2324_v15 = vsel %vm7631_vm4, %v2319_v58, %v9308_v51 }
 0x147   : > { %6937 = vmatmul.mubr.msk.bf16.gmra.mrb[24].mxu1 %vm699_vm3, %v7458_v2  ;;  %v2408_v42 = vshrl.u32 %v6276_v56, 16  ;;  %v2411_v43 = vshll.u32 %v6276_v56, 16  ;;  %v2421_v19 = vshrl.u32 %v7516_v10, 16  ;;  %v2367_v54 = vrot.slane %v2366_v63, 4  ;;  %v6279_v58 = vld [vmem:[%s7604_s28 + $0xc0] sm:$0xf] }
 0x148   : > { %6940 = vmatprep.mubr.msk.bf16.mxu1 %vm699_vm3, %v7459_v44  ;;  %v2333_v2 = vrot.slane %v2331_v3, 5  ;;  %v6273_v44 = vld [vmem:[%s7604_s28 + $0xa8] sm:$0xf]  ;;  %v2352_v28 = vor.u32 %v2351_v22, %v9329_v62  ;;  %v2357_v17 = vrot.slane %v2355_v25, 5  ;;  %v2382_v6 = vsel %vm7631_vm4, %v2377_v50, %v2381_v59 }
 0x149   : > { %v2384_v14 = vshrl.u32 %v6273_v44, 16  ;;  %v2387_v61 = vshll.u32 %v6273_v44, 16  ;;  %v2410_v39 = vrot.slane %v2408_v42, 4  ;;  %v2372_v32 = vsel %vm7631_vm4, %v2367_v54, %v9331_v41 }
 0x14a   : > { %v2334_v30 = vsel %vm7631_vm4, %v2329_v12, %v2333_v2  ;;  %v2353_v3 = vrot.slane %v2352_v28, 4  ;;  %v2423_v2 = vrot.slane %v2421_v19, 4  ;;  %v2348_v12 = vsel %vm7631_vm4, %v2343_v35, %v9329_v62  ;;  %v7517_v62 = vld [vmem:[%s7604_s28 + $0xb0] sm:$0x1]  ;;  %v7518_v28 = vld [vmem:[%s7604_s28 + $0xc4] sm:$0xf] }
 0x14b   : > { %v2386_v33 = vrot.slane %v2384_v14, 4  ;;  %v2389_v22 = vrot.slane %v2387_v61, 5  ;;  %v6292_v51 = vcombine.low %v2324_v15, %v2334_v30  ;;  %v2403_v25 = vshll.u32 %v7517_v62, 16  ;;  %s7530_s28 = smov 48  }
 0x14c   : > { %v2358_v31 = vsel %vm7631_vm4, %v2353_v3, %v2357_v17  ;;  %v2432_v44 = vshrl.u32 %v6279_v58, 16  ;;  %v2435_v41 = vshll.u32 %v6279_v58, 16  ;;  %v2441_v63 = vshll.u32 %v7518_v28, 16 }
 0x14d   : > { %7095 = vmatmul.mubr.msk.bf16.gmra.mrb[12].mxu0 %vm699_vm3, %v6563_v16  ;;  %v2393_v16 = vshll.u32 %v7515_v29, 16  ;;  %v2390_v48 = vor.u32 %v2389_v22, %v2386_v33  ;;  %v2445_v40 = vshrl.u32 %v7518_v28, 16  ;;  %v2427_v9 = vshll.u32 %v7519_v20, 16 }
 0x14e   : > { %7098 = vmatprep.mubr.msk.bf16.mxu0 %vm699_vm3, %v6564_v4  ;;  %v2417_v4 = vshll.u32 %v7516_v10, 16  ;;  %v6293_v47 = vcombine.low %v2348_v12, %v2358_v31  ;;  %v2405_v61 = vrot.slane %v2403_v25, 5  ;;  %v2434_v29 = vrot.slane %v2432_v44, 4 }
 0x14f   : > { %6941 = vmatmul.mubr.msk.bf16.gmra.mrb[28].mxu1 %vm699_vm3, %v7460_v49  ;;  %v2395_v1 = vrot.slane %v2393_v16, 5  ;;  %v2413_v49 = vrot.slane %v2411_v43, 5  ;;  %v2391_v56 = vrot.slane %v2390_v48, 4  ;;  %v2437_v16 = vrot.slane %v2435_v41, 5 }
 0x150   : > { %6962 = vmatprep.mubr.msk.bf16.mxu1 %vm699_vm3, %v6290_v52  ;;  %v2419_v52 = vrot.slane %v2417_v4, 5  ;;  %v2443_v0 = vrot.slane %v2441_v63, 5  ;;  %v2447_v15 = vrot.slane %v2445_v40, 4  ;;  %v2429_v17 = vrot.slane %v2427_v9, 5 }
 0x151   : > { %v2396_v42 = vsel %vm7631_vm4, %v2391_v56, %v2395_v1  ;;  %v2438_v10 = vor.u32 %v2437_v16, %v2434_v29  ;;  %v2453_v54 = vrot.slane %v2451_v45, 5 }
 0x152   : > { %v2424_v11 = vor.u32 %v2423_v2, %v2419_v52  ;;  %v2448_v4 = vor.u32 %v2447_v15, %v2443_v0 }
 0x153   : > { %v2439_v19 = vrot.slane %v2438_v10, 4 }
 0x154   : > { %v2425_v35 = vrot.slane %v2424_v11, 4  ;;  %v2449_v3 = vrot.slane %v2448_v4, 4 }
 0x155   : > { %7099 = vmatmul.mubr.msk.bf16.gmra.mrb[16].mxu0 %vm699_vm3, %v6565_v53  ;;  %v2400_v53 = vor.u32 %v2399_v36, %v2395_v1  ;;  %v2444_v50 = vsel %vm7631_vm4, %v2439_v19, %v2443_v0 }
 0x156   : > { %7102 = vmatprep.mubr.msk.bf16.mxu0 %vm699_vm3, %v6566_v13  ;;  %v6294_v13 = vcombine.low %v2372_v32, %v2382_v6  ;;  %v2430_v8 = vsel %vm7631_vm4, %v2425_v35, %v2429_v17  ;;  %v2454_v59 = vsel %vm7631_vm4, %v2449_v3, %v2453_v54 }
 0x157   : > { %6963 = vmatmul.mubr.msk.bf16.vlgmr.msra.gmra.mrb[16].mxu1 %vm699_vm3, %v9065_v37  ;;  %v2414_v37 = vor.u32 %v2413_v49, %v2410_v39  ;;  %v2401_v14 = vrot.slane %v2400_v53, 4  ;;  %v6297_v33 = vcombine.low %v2444_v50, %v2454_v59 }
 0x158   : > { %6966 = vmatprep.mubr.msk.bf16.mxu1 %vm699_vm3, %v6292_v51 }
 0x159   : > { %v2415_v30 = vrot.slane %v2414_v37, 4  ;;  %v2406_v43 = vsel %vm7631_vm4, %v2401_v14, %v2405_v61 }
 0x15a   : > { %v6295_v26 = vcombine.low %v2396_v42, %v2406_v43 }
 0x15d   : > { %7103 = vmatmul.mubr.msk.bf16.gmra.mrb[20].mxu0 %vm699_vm3, %v6567_v5  ;;  %v2420_v5 = vsel %vm7631_vm4, %v2415_v30, %v2419_v52  ;;  %vm5488_vm4 = vcmask 388416  }
 0x15e   : > { %7106 = vmatprep.mubr.msk.bf16.mxu0 %vm699_vm3, %v6568_v23  ;;  %v6296_v23 = vcombine.low %v2420_v5, %v2430_v8 }
 0x15f   : > { %6967 = vmatmul.mubr.msk.bf16.gmra.mrb[20].mxu1 %vm699_vm3, %v6293_v47 }
 0x160   : > { %6970 = vmatprep.mubr.msk.bf16.mxu1 %vm699_vm3, %v6294_v13 }
 0x165   : > { %7107 = vmatmul.mubr.msk.bf16.gmra.mrb[24].mxu0 %vm699_vm3, %v6569_v18 }
 0x166   : > { %7110 = vmatprep.mubr.msk.bf16.mxu0 %vm699_vm3, %v6570_v60 }
 0x167   : > { %6971 = vmatmul.mubr.msk.bf16.gmra.mrb[24].mxu1 %vm699_vm3, %v6295_v26 }
 0x168   : > { %6974 = vmatprep.mubr.msk.bf16.mxu1 %vm699_vm3, %v6296_v23 }
 0x16d   : > { %7111 = vmatmul.mubr.msk.bf16.gmra.mrb[28].mxu0 %vm699_vm3, %v6571_v24 }
 0x16f   : > { %6975 = vmatmul.mubr.msk.bf16.gmra.mrb[28].mxu1 %vm699_vm3, %v6297_v33  ;;  %vm5449_vm3 = vcmask 322816  }
 0x187   : > { %v9420_v38 = vpop.permute.xlu0 %4811 }
 0x188   : > { %10651 = vst [vmem:[#allocation6_spill] sm:$0xff] %v9420_v38 }
 0x189   : > { %v9422_v7 = vpop.permute.xlu1 %4821 }
 0x18a   : > { %10652 = vst [vmem:[#allocation8_spill] sm:$0xff] %v9422_v7 }
 0x18b   : > { %v9424_v18 = vpop.permute.xlu0 %4816 }
 0x18c   : > { %10653 = vst [vmem:[#allocation7_spill] sm:$0xff] %v9424_v18 }
 0x18d   : > { %v9426_v60 = vpop.permute.xlu1 %4826 }
 0x18e   : > { %10654 = vst [vmem:[#allocation9_spill] sm:$0xff] %v9426_v60 }
 0x18f   : > { %v9428_v22 = vpop.permute.xlu0 %4831 }
 0x190   : > { %10655 = vst [vmem:[#allocation10_spill] sm:$0xff] %v9428_v22 }
 0x191   : > { %v9430_v36 = vpop.permute.xlu1 %4836 }
 0x192   : > { %10656 = vst [vmem:[#allocation11_spill] sm:$0xff] %v9430_v36 }
 0x193   : > { %v9432_v27 = vpop.permute.xlu0 %4841 }
 0x194   : > { %10657 = vst [vmem:[#allocation4_spill] sm:$0xff] %v9432_v27 }
 0x195   : > { %v9434_v49 = vpop.permute.xlu1 %4846 }
 0x196   : > { %10658 = vst [vmem:[#allocation5_spill] sm:$0xff] %v9434_v49 }
 0x198   : > { %v9436_v52 = vpop.permute.xlu0 %4851 }
 0x199   : > { %10659 = vst [vmem:[#allocation12_spill] sm:$0xff] %v9436_v52  ;;  %v9446_v32 = vpop.permute.xlu1 %4856 }
 0x19a   : > { %10660 = vst [vmem:[#allocation2_spill] sm:$0xff] %v9446_v32 }
 0x19c   : > { %v9448_v6 = vpop.permute.xlu0 %4861 }
 0x19d   : > { %10661 = vst [vmem:[#allocation3_spill] sm:$0xff] %v9448_v6  ;;  %v9454_v62 = vpop.permute.xlu1 %4866 }
 0x19e   : > { %10662 = vst [vmem:[#allocation13_spill] sm:$0xff] %v9454_v62 }
 0x1a0   : > { %v9458_v44 = vpop.permute.xlu0 %4871 }
 0x1a1   : > { %10663 = vst [vmem:[#allocation14_spill] sm:$0xff] %v9458_v44  ;;  %v9462_v63 = vpop.permute.xlu1 %4876 }
 0x1a2   : > { %10664 = vst [vmem:[#allocation15_spill] sm:$0xff] %v9462_v63 }
 0x1a4   : > { %v9466_v11 = vpop.permute.xlu0 %4881 }
 0x1a5   : > { %10665 = vst [vmem:[#allocation16_spill] sm:$0xff] %v9466_v11  ;;  %v9482_v30 = vpop.permute.xlu1 %4886 }
 0x1a6   : > { %10666 = vst [vmem:[#allocation17_spill] sm:$0xff] %v9482_v30 }
 0x1a8   : > { %v9486_v42 = vpop.permute.xlu0 %4891 }
 0x1a9   : > { %10668 = vst [vmem:[#allocation19_spill] sm:$0xff] %v9486_v42 }
 0x1ea   : > { %v6914_v55 = vpop.f32.mrb[0].mxu1 }
 0x1eb   : > { %v1864_v46 = vpop.f32.mrb[1].mxu1 }
 0x1ec   : > { %v6915_v34 = vpop.f32.mrb[2].mxu1 }
 0x1ed   : > { %v1867_v1 = vpop.f32.mrb[3].mxu1 }
 0x1f2   : > { %v6918_v57 = vpop.f32.mrb[4].mxu1 }
 0x1f3   : > { %v1880_v24 = vpop.f32.mrb[5].mxu1 }
 0x1f4   : > { %v6919_v51 = vpop.f32.mrb[6].mxu1 }
 0x1f5   : > { %v1883_v39 = vpop.f32.mrb[7].mxu1 }
 0x1fa   : > { %v9438_v2 = vpop.f32.mrb[8].mxu1 }
 0x1fb   : > { %v9440_v58 = vpop.f32.mrb[9].mxu1 }
 0x1fc   : > { %v9442_v12 = vpop.f32.mrb[10].mxu1 }
 0x1fd   : > { %v9444_v31 = vpop.f32.mrb[11].mxu1 }
 0x202   : > { %v9450_v48 = vpop.f32.mrb[12].mxu1 }
 0x203   : > { %v9452_v53 = vpop.f32.mrb[13].mxu1 }
 0x204   : > { %v9456_v25 = vpop.f32.mrb[14].mxu1 }
 0x205   : > { %v9460_v41 = vpop.f32.mrb[15].mxu1 }
 0x208   : > { %v7084_v28 = vpop.f32.mrb[0].mxu0 }
 0x209   : > { %v9464_v40 = vadd.f32 %v7084_v28, %v6914_v55  ;;  %v4618_v37 = vpop.f32.mrb[1].mxu0 }
 0x20a   : > { %v9468_v20 = vadd.f32 %v4618_v37, %v1864_v46  ;;  %v7085_v9 = vpop.f32.mrb[2].mxu0 }
 0x20b   : > { %v4971_v47 = vmul.f32 %v9464_v40, %v9422_v7  ;;  %v9472_v13 = vadd.f32 %v7085_v9, %v6915_v34  ;;  %v4621_v56 = vpop.f32.mrb[3].mxu0  ;;  %v9512_v9 = vpop.permute.xlu1 %4896 }
 0x20c   : > { %v4969_v14 = vmul.f32 %v9468_v20, %v9420_v38  ;;  %v9476_v61 = vadd.f32 %v4621_v56, %v1867_v1  ;;  %10672 = vst [vmem:[#allocation23_spill] sm:$0xff] %v9512_v9 }
 0x20d   : > { %v6624_v29 = vpack.c.bf16 %v4971_v47, %v4971_v47  ;;  %v4972_v16 = vmul.f32 %v9472_v13, %v9426_v60 }
 0x20e   : > { %v6623_v0 = vpack.c.bf16 %v4969_v14, %v4969_v14  ;;  %v4970_v15 = vmul.f32 %v9476_v61, %v9424_v18 }
 0x20f   : > { %v9484_v35 = vunpack.c.l.b16 %v6624_v29  ;;  %v6640_v17 = vpack.c.bf16 %v4972_v16, %v4972_v16  ;;  %v9519_v29 = vpop.permute.xlu0 %4901 }
 0x210   : > { %v9488_v43 = vunpack.c.l.b16 %v6623_v0  ;;  %v5001_v10 = vadd.f32 %v4970_v15, %v4969_v14  ;;  %v6639_v4 = vpack.c.bf16 %v4970_v15, %v4970_v15  ;;  %v7088_v21 = vpop.f32.mrb[4].mxu0  ;;  %10673 = vst [vmem:[#allocation24_spill] sm:$0xff] %v9519_v29 }
 0x211   : > { %10667 = vst [vmem:[#allocation18_spill] sm:$0xff] %v9484_v35  ;;  %v9490_v45 = vunpack.c.l.b16 %v6640_v17  ;;  %v9492_v5 = vadd.f32 %v7088_v21, %v6918_v57  ;;  %v4634_v8 = vpop.f32.mrb[5].mxu0  ;;  %v5492_v26 = vrot.slane %v9484_v35, 5  ;;  %v5336_v23 = vrot.slane %v9484_v35, 1 }
 0x212   : > { %10669 = vst [vmem:[#allocation20_spill] sm:$0xff] %v9488_v43  ;;  %v5002_v19 = vadd.f32 %v5001_v10, %v4971_v47  ;;  %v9496_v3 = vunpack.c.l.b16 %v6639_v4  ;;  %v9498_v54 = vadd.f32 %v4634_v8, %v1880_v24  ;;  %v7089_v50 = vpop.f32.mrb[6].mxu0  ;;  %v5491_v59 = vrot.slane %v9488_v43, 6 }
 0x213   : > { %10670 = vst [vmem:[#allocation21_spill] sm:$0xff] %v9490_v45  ;;  %v4975_v33 = vmul.f32 %v9492_v5, %v9432_v27  ;;  %v9503_v55 = vadd.f32 %v7089_v50, %v6919_v51  ;;  %v4637_v46 = vpop.f32.mrb[7].mxu0  ;;  %v5296_v34 = vrot.slane %v9488_v43, 1  ;;  %v5335_v1 = vrot.slane %v9488_v43, 2  ;;  %v9544_v50 = vpop.permute.xlu1 %4906 }
 0x214   : > { %10671 = vst [vmem:[#allocation22_spill] sm:$0xff] %v9496_v3  ;;  %v4973_v57 = vmul.f32 %v9498_v54, %v9428_v22  ;;  %v5003_v28 = vadd.f32 %v5002_v19, %v4972_v16  ;;  %v9509_v37 = vadd.f32 %v4637_v46, %v1883_v39  ;;  %v5493_v24 = vsel %vm5255_vm8, %v5492_v26, %v5491_v59 }
 0x215   : > { %v6626_v47 = vpack.c.bf16 %v4975_v33, %v4975_v33  ;;  %v4976_v51 = vmul.f32 %v9503_v55, %v9434_v49  ;;  %v5297_v56 = vsel %vm5255_vm8, %v9484_v35, %v5296_v34  ;;  %v5337_v14 = vsel %vm5255_vm8, %v5336_v23, %v5335_v1  ;;  %10677 = vst [vmem:[#allocation28_spill] sm:$0xff] %v9544_v50 }
 0x216   : > { %v5004_v0 = vadd.f32 %v5003_v28, %v4973_v57  ;;  %v6625_v16 = vpack.c.bf16 %v4973_v57, %v4973_v57  ;;  %v4974_v39 = vmul.f32 %v9509_v37, %v9430_v36  ;;  %v5374_v15 = vrot.slane %v9488_v43, 3 }
 0x217   : > { %v9524_v17 = vunpack.c.l.b16 %v6626_v47  ;;  %v6642_v10 = vpack.c.bf16 %v4976_v51, %v4976_v51  ;;  %v5375_v4 = vrot.slane %v9484_v35, 2 }
 0x218   : > { %v9528_v8 = vunpack.c.l.b16 %v6625_v16  ;;  %v5005_v26 = vadd.f32 %v5004_v0, %v4974_v39  ;;  %v6641_v23 = vpack.c.bf16 %v4974_v39, %v4974_v39  ;;  %v7092_v19 = vpop.f32.mrb[8].mxu0 }
 0x219   : > { %10674 = vst [vmem:[#allocation25_spill] sm:$0xff] %v9524_v17  ;;  %v9531_v59 = vunpack.c.l.b16 %v6642_v10  ;;  %v9534_v46 = vadd.f32 %v7092_v19, %v9438_v2  ;;  %v4650_v34 = vpop.f32.mrb[9].mxu0  ;;  %v5496_v1 = vrot.slane %v9524_v17, 3  ;;  %v5300_v57 = vrot.slane %v9524_v17, 6 }
 0x21a   : > { %10675 = vst [vmem:[#allocation26_spill] sm:$0xff] %v9528_v8  ;;  %v5006_v28 = vadd.f32 %v5005_v26, %v4975_v33  ;;  %v9538_v47 = vunpack.c.l.b16 %v6641_v23  ;;  %v9541_v16 = vadd.f32 %v4650_v34, %v9440_v58  ;;  %v7093_v0 = vpop.f32.mrb[10].mxu0  ;;  %v5494_v39 = vrot.slane %v9528_v8, 4  ;;  %v9554_v58 = vpop.permute.xlu0 %4911 }
 0x21b   : > { %v4979_v2 = vmul.f32 %v9534_v46, %v9448_v6  ;;  %v9549_v10 = vadd.f32 %v7093_v0, %v9442_v12  ;;  %v4653_v19 = vpop.f32.mrb[11].mxu0  ;;  %v5298_v33 = vrot.slane %v9528_v8, 7  ;;  %v5338_v26 = vsel %vm5258_vm9, %v9528_v8, %v5337_v14  ;;  %10678 = vst [vmem:[#allocation29_spill] sm:$0xff] %v9554_v58 }
 0x21c   : > { %10676 = vst [vmem:[#allocation27_spill] sm:$0xff] %v9538_v47  ;;  %v4977_v23 = vmul.f32 %v9541_v16, %v9436_v52  ;;  %v5007_v34 = vadd.f32 %v5006_v28, %v4976_v51  ;;  %v9559_v21 = vadd.f32 %v4653_v19, %v9444_v31  ;;  %v5495_v12 = vsel %vm5258_vm9, %v5494_v39, %v5493_v24 }
 0x21d   : > { %v6628_v0 = vpack.c.bf16 %v4979_v2, %v4979_v2  ;;  %v4980_v6 = vmul.f32 %v9549_v10, %v9454_v62  ;;  %v5497_v49 = vsel %vm5261_vm10, %v5496_v1, %v5495_v12  ;;  %v5299_v14 = vsel %vm5258_vm9, %v5298_v33, %v5297_v56 }
 0x21e   : > { %v5008_v27 = vadd.f32 %v5007_v34, %v4977_v23  ;;  %v6627_v36 = vpack.c.bf16 %v4977_v23, %v4977_v23  ;;  %v4978_v52 = vmul.f32 %v9559_v21, %v9446_v32  ;;  %v5301_v51 = vsel %vm5261_vm10, %v5300_v57, %v5299_v14  ;;  %v9576_v23 = vpop.permute.xlu1 %4916 }
 0x21f   : > { %v9569_v31 = vunpack.c.l.b16 %v6628_v0  ;;  %v6644_v28 = vpack.c.bf16 %v4980_v6, %v4980_v6  ;;  %v5339_v24 = vrot.slane %v9524_v17, 7  ;;  %v5376_v39 = vsel %vm5255_vm8, %v5375_v4, %v5374_v15  ;;  %10681 = vst [vmem:[#allocation32_spill] sm:$0xff] %v9576_v23 }
 0x220   : > { %v9573_v19 = vunpack.c.l.b16 %v6627_v36  ;;  %v5009_v1 = vadd.f32 %v5008_v27, %v4978_v52  ;;  %v6643_v12 = vpack.c.bf16 %v4978_v52, %v4978_v52  ;;  %v7096_v56 = vpop.f32.mrb[12].mxu0  ;;  %v5377_v33 = vrot.slane %v9528_v8, 1  ;;  %v9585_v36 = vpop.permute.xlu0 %4921 }
 0x221   : > { %10679 = vst [vmem:[#allocation30_spill] sm:$0xff] %v9569_v31  ;;  %v9578_v34 = vunpack.c.l.b16 %v6644_v28  ;;  %v9581_v57 = vadd.f32 %v7096_v56, %v9450_v48  ;;  %v4666_v0 = vpop.f32.mrb[13].mxu0  ;;  %v5500_v14 = vrot.slane %v9569_v31, 1  ;;  %v5304_v15 = vrot.slane %v9569_v31, 4  ;;  %10683 = vst [vmem:[#allocation34_spill] sm:$0xff] %v9585_v36 }
 0x222   : > { %10680 = vst [vmem:[#allocation31_spill] sm:$0xff] %v9573_v19  ;;  %v5010_v27 = vadd.f32 %v5009_v1, %v4979_v2  ;;  %v9587_v52 = vunpack.c.l.b16 %v6643_v12  ;;  %v9590_v4 = vadd.f32 %v4666_v0, %v9452_v53  ;;  %v7097_v62 = vpop.f32.mrb[14].mxu0  ;;  %v5498_v28 = vrot.slane %v9573_v19, 2 }
 0x223   : > { %10682 = vst [vmem:[#allocation33_spill] sm:$0xff] %v9581_v57  ;;  %v4983_v48 = vmul.f32 %v9581_v57, %v9466_v11  ;;  %v9596_v56 = vadd.f32 %v7097_v62, %v9456_v25  ;;  %v4669_v32 = vpop.f32.mrb[15].mxu0  ;;  %v5302_v22 = vrot.slane %v9573_v19, 5  ;;  %v5340_v60 = vsel %vm5261_vm10, %v5339_v24, %v5338_v26  ;;  %v9613_v24 = vpop.permute.xlu1 %4926 }
 0x224   : > { %v4981_v2 = vmul.f32 %v9590_v4, %v9458_v44  ;;  %v5011_v1 = vadd.f32 %v5010_v27, %v4980_v6  ;;  %v9603_v53 = vadd.f32 %v4669_v32, %v9460_v41  ;;  %v5499_v12 = vsel %vm5264_vm11, %v5498_v28, %v5497_v49  ;;  %10686 = vst [vmem:[#allocation37_spill] sm:$0xff] %v9613_v24  ;;  %v9619_v28 = vpop.permute.xlu0 %4931 }
 0x225   : > { %10684 = vst [vmem:[#allocation35_spill] sm:$0xff] %v9596_v56  ;;  %v6630_v0 = vpack.c.bf16 %v4983_v48, %v4983_v48  ;;  %v4984_v11 = vmul.f32 %v9596_v56, %v9482_v30  ;;  %v5501_v62 = vsel %vm5267_vm12, %v5500_v14, %v5499_v12  ;;  %v5303_v25 = vsel %vm5264_vm11, %v5302_v22, %v5301_v51 }
 0x226   : > { %10685 = vst [vmem:[#allocation36_spill] sm:$0xff] %v9603_v53  ;;  %v5012_v7 = vadd.f32 %v5011_v1, %v4981_v2  ;;  %v6629_v18 = vpack.c.bf16 %v4981_v2, %v4981_v2  ;;  %v4982_v26 = vmul.f32 %v9603_v53, %v9462_v63  ;;  %v5305_v6 = vsel %vm5267_vm12, %v5304_v15, %v5303_v25 }
 0x227   : > { %v9615_v32 = vunpack.c.l.b16 %v6630_v0  ;;  %v6646_v49 = vpack.c.bf16 %v4984_v11, %v4984_v11  ;;  %v5341_v41 = vrot.slane %v9573_v19, 6  ;;  %v5343_v27 = vrot.slane %v9569_v31, 5  ;;  %10688 = vst [vmem:[#allocation39_spill] sm:$0xff] %v9619_v28 }
 0x228   : > { %v9621_v14 = vunpack.c.l.b16 %v6629_v18  ;;  %v5013_v22 = vadd.f32 %v5012_v7, %v4982_v26  ;;  %v6645_v51 = vpack.c.bf16 %v4982_v26, %v4982_v26  ;;  %v7100_v2 = vpop.f32.mrb[16].mxu0  ;;  %v5378_v1 = vsel %vm5258_vm9, %v5377_v33, %v5376_v39 }
 0x229   : > { %10687 = vst [vmem:[#allocation38_spill] sm:$0xff] %v9615_v32  ;;  %v9624_v12 = vunpack.c.l.b16 %v6646_v49  ;;  %v4682_v25 = vpop.f32.mrb[17].mxu0  ;;  %v5503_v0 = vrot.slane %v9615_v32, 7  ;;  %v5308_v30 = vrot.slane %v9615_v32, 2  ;;  %v5342_v63 = vsel %vm5264_vm11, %v5341_v41, %v5340_v60 }
 0x22a   : > { %10689 = vst [vmem:[#allocation40_spill] sm:$0xff] %v9621_v14  ;;  %v6964_v15 = vpop.f32.mrb[16].mxu1  ;;  %v5014_v44 = vadd.f32 %v5013_v22, %v4983_v48  ;;  %v9629_v38 = vunpack.c.l.b16 %v6645_v51  ;;  %v7101_v26 = vpop.f32.mrb[18].mxu0  ;;  %v5502_v39 = vsel %vm5270_vm13, %v9621_v14, %v5501_v62  ;;  %v5306_v53 = vrot.slane %v9621_v14, 3 }
 0x22b   : > { %10690 = vst [vmem:[#allocation41_spill] sm:$0xff] %v9624_v12  ;;  %v9631_v18 = vadd.f32 %v7100_v2, %v6964_v15  ;;  %v2653_v7 = vpop.f32.mrb[17].mxu1  ;;  %v4685_v56 = vpop.f32.mrb[19].mxu0  ;;  %v5504_v57 = vsel %vm5273_vm14, %v5503_v0, %v5502_v39  ;;  %v5344_v60 = vsel %vm5267_vm12, %v5343_v27, %v5342_v63  ;;  %v5345_v0 = vrot.slane %v9621_v14, 4 }
 0x22c   : > { %10691 = vst [vmem:[#allocation42_spill] sm:$0xff] %v9629_v38  ;;  %v9635_v33 = vadd.f32 %v4682_v25, %v2653_v7  ;;  %v6965_v49 = vpop.f32.mrb[18].mxu1  ;;  %v5015_v41 = vadd.f32 %v5014_v44, %v4984_v11  ;;  %v5519_v2 = vpack.c.b16 %v5504_v57, %v5504_v57  ;;  %v5307_v25 = vsel %vm5270_vm13, %v5306_v53, %v5305_v6  ;;  %v9655_v57 = vpop.permute.xlu1 %4936 }
 0x22d   : > { %10692 = vst [vmem:[#allocation43_spill] sm:$0xff] %v9631_v18  ;;  %v4987_v48 = vmul.f32 %v9631_v18, %v9519_v29  ;;  %v9642_v22 = vadd.f32 %v7101_v26, %v6965_v49  ;;  %v2656_v51 = vpop.f32.mrb[19].mxu1  ;;  %v5309_v44 = vsel %vm5273_vm14, %v5308_v30, %v5307_v25  ;;  %v5347_v11 = vrot.slane %v9615_v32, 3  ;;  %10694 = vst [vmem:[#allocation45_spill] sm:$0xff] %v9655_v57  ;;  %v9659_v26 = vpop.permute.xlu0 %4941 }
 0x22e   : > { %v4985_v62 = vmul.f32 %v9635_v33, %v9486_v42  ;;  %v9646_v15 = vadd.f32 %v4685_v56, %v2656_v51  ;;  %5521 = vrot.lane.b32.xlu0 %v5519_v2, %s7530_s28  ;;  %v5324_v6 = vpack.c.b16 %v5309_v44, %v5309_v44  ;;  %10695 = vst [vmem:[#allocation46_spill] sm:$0xff] %v9659_v26 }
 0x22f   : > { %10693 = vst [vmem:[#allocation44_spill] sm:$0xff] %v9642_v22  ;;  %v6632_v7 = vpack.c.bf16 %v4987_v48, %v4987_v48  ;;  %v4988_v63 = vmul.f32 %v9642_v22, %v9544_v50  ;;  %v5346_v2 = vsel %vm5270_vm13, %v5345_v0, %v5344_v60  ;;  %v5379_v30 = vsel %vm5261_vm10, %v9524_v17, %v5378_v1 }
 0x230   : > { %v5016_v27 = vadd.f32 %v5015_v41, %v4985_v62  ;;  %v6631_v56 = vpack.c.bf16 %v4985_v62, %v4985_v62  ;;  %v4986_v53 = vmul.f32 %v9646_v15, %v9512_v9  ;;  %v7104_v51 = vpop.f32.mrb[20].mxu0  ;;  %v5348_v9 = vsel %vm5273_vm14, %v5347_v11, %v5346_v2 }
 0x231   : > { %v9661_v39 = vunpack.c.l.b16 %v6632_v7  ;;  %v6648_v49 = vpack.c.bf16 %v4988_v63, %v4988_v63  ;;  %v4698_v29 = vpop.f32.mrb[21].mxu0  ;;  %v5363_v60 = vpack.c.b16 %v5348_v9, %v5348_v9  ;;  %v5380_v1 = vrot.slane %v9573_v19, 7 }
 0x232   : > { %v9666_v25 = vunpack.c.l.b16 %v6631_v56  ;;  %v5017_v50 = vadd.f32 %v5016_v27, %v4986_v53  ;;  %v6647_v41 = vpack.c.bf16 %v4986_v53, %v4986_v53  ;;  %v6968_v62 = vpop.f32.mrb[20].mxu1  ;;  %v7105_v22 = vpop.f32.mrb[22].mxu0  ;;  %5326 = vrot.lane.b32.xlu0 %v5324_v6, %s7531_s12  ;;  %v5382_v11 = vrot.slane %v9569_v31, 6 }
 0x233   : > { %10696 = vst [vmem:[#allocation47_spill] sm:$0xff] %v9661_v39  ;;  %v9669_v44 = vunpack.c.l.b16 %v6648_v49  ;;  %v9671_v42 = vadd.f32 %v7104_v51, %v6968_v62  ;;  %v2669_v7 = vpop.f32.mrb[21].mxu1  ;;  %v4701_v18 = vpop.f32.mrb[23].mxu0  ;;  %v5381_v6 = vsel %vm5264_vm11, %v5380_v1, %v5379_v30  ;;  %v5384_v9 = vrot.slane %v9621_v14, 5 }
 0x234   : > { %v5018_v0 = vadd.f32 %v5017_v50, %v4987_v48  ;;  %v9675_v56 = vunpack.c.l.b16 %v6647_v41  ;;  %v9677_v27 = vadd.f32 %v4698_v29, %v2669_v7  ;;  %v6969_v53 = vpop.f32.mrb[22].mxu1  ;;  %v5383_v41 = vsel %vm5267_vm12, %v5382_v11, %v5381_v6  ;;  %v9696_v1 = vpop.permute.xlu1 %4946 }
 0x235   : > { %10697 = vst [vmem:[#allocation48_spill] sm:$0xff] %v9669_v44  ;;  %10698 = vst [vmem:[#allocation49_spill] sm:$0xff] %v9671_v42  ;;  %v4991_v49 = vmul.f32 %v9671_v42, %v9585_v36  ;;  %v9682_v51 = vadd.f32 %v7105_v22, %v6969_v53  ;;  %v2672_v2 = vpop.f32.mrb[23].mxu1  ;;  %v5385_v22 = vsel %vm5270_vm13, %v5384_v9, %v5383_v41  ;;  %v5386_v30 = vrot.slane %v9615_v32, 4 }
 0x236   : > { %10699 = vst [vmem:[#allocation50_spill] sm:$0xff] %v9675_v56  ;;  %10700 = vst [vmem:[#allocation51_spill] sm:$0xff] %v9677_v27  ;;  %v4989_v50 = vmul.f32 %v9677_v27, %v9554_v58  ;;  %v5019_v48 = vadd.f32 %v5018_v0, %v4988_v63  ;;  %v9688_v29 = vadd.f32 %v4701_v18, %v2672_v2  ;;  %5365 = vrot.lane.b32.xlu0 %v5363_v60, %s7532_s13  ;;  %v9705_v2 = vpop.permute.xlu0 %4951 }
 0x237   : > { %10701 = vst [vmem:[#allocation52_spill] sm:$0xff] %v9682_v51  ;;  %v6634_v62 = vpack.c.bf16 %v4991_v49, %v4991_v49  ;;  %v4992_v7 = vmul.f32 %v9682_v51, %v9613_v24  ;;  %10703 = vst [vmem:[#allocation54_spill] sm:$0xff] %v9696_v1  ;;  %v10704_v63 = vrot.slane %v9488_v43, 4  ;;  %v10705_v0 = vrot.slane %v9484_v35, 3 }
 0x238   : > { %10702 = vst [vmem:[#allocation53_spill] sm:$0xff] %v9688_v29  ;;  %v5020_v53 = vadd.f32 %v5019_v48, %v4989_v50  ;;  %v6633_v44 = vpack.c.bf16 %v4989_v50, %v4989_v50  ;;  %v4990_v18 = vmul.f32 %v9688_v29, %v9576_v23  ;;  %10706 = vst [vmem:[#allocation55_spill] sm:$0xff] %v9705_v2  ;;  %v7108_v9 = vpop.f32.mrb[24].mxu0  ;;  %v5416_v48 = vrot.slane %v9528_v8, 2 }
 0x239   : > { %v5415_v11 = vsel %vm5255_vm8, %v10705_v0, %v10704_v63  ;;  %v9707_v60 = vunpack.c.l.b16 %v6634_v62  ;;  %v6650_v6 = vpack.c.bf16 %v4992_v7, %v4992_v7  ;;  %v5387_v41 = vsel %vm5273_vm14, %v5386_v30, %v5385_v22  ;;  %v4714_v23 = vpop.f32.mrb[25].mxu0 }
 0x23a   : > { %v9711_v50 = vunpack.c.l.b16 %v6633_v44  ;;  %v5021_v56 = vadd.f32 %v5020_v53, %v4990_v18  ;;  %v6649_v24 = vpack.c.bf16 %v4990_v18, %v4990_v18  ;;  %v6972_v36 = vpop.f32.mrb[24].mxu1  ;;  %v5402_v58 = vpack.c.b16 %v5387_v41, %v5387_v41  ;;  %v7109_v62 = vpop.f32.mrb[26].mxu0 }
 0x23b   : > { %v9713_v51 = vunpack.c.l.b16 %v6650_v6  ;;  %v9715_v63 = vadd.f32 %v7108_v9, %v6972_v36  ;;  %v2685_v0 = vpop.f32.mrb[25].mxu1  ;;  %v5417_v42 = vsel %vm5258_vm9, %v5416_v48, %v5415_v11  ;;  %v5418_v29 = vrot.slane %v9524_v17, 1  ;;  %v4717_v18 = vpop.f32.mrb[27].mxu0 }
 0x23c   : > { %v5022_v22 = vadd.f32 %v5021_v56, %v4991_v49  ;;  %v9719_v30 = vunpack.c.l.b16 %v6649_v24  ;;  %v9721_v44 = vadd.f32 %v4714_v23, %v2685_v0  ;;  %5404 = vrot.lane.b32.xlu0 %v5402_v58, %s7533_s14  ;;  %v6973_v53 = vpop.f32.mrb[26].mxu1  ;;  %v5421_v6 = vrot.slane %v9569_v31, 7 }
 0x23d   : > { %10707 = vst [vmem:[#allocation56_spill] sm:$0xff] %v9713_v51  ;;  %10708 = vst [vmem:[#allocation57_spill] sm:$0xff] %v9715_v63  ;;  %v4995_v36 = vmul.f32 %v9715_v63, %v9659_v26  ;;  %v9727_v9 = vadd.f32 %v7109_v62, %v6973_v53  ;;  %v2688_v11 = vpop.f32.mrb[27].mxu1  ;;  %v5419_v41 = vsel %vm5261_vm10, %v5418_v29, %v5417_v42  ;;  %v5423_v24 = vrot.slane %v9621_v14, 6  ;;  %v9741_v42 = vpop.permute.xlu1 %4956 }
 0x23e   : > { %10709 = vst [vmem:[#allocation58_spill] sm:$0xff] %v9719_v30  ;;  %10710 = vst [vmem:[#allocation59_spill] sm:$0xff] %v9721_v44  ;;  %v4993_v23 = vmul.f32 %v9721_v44, %v9619_v28  ;;  %v5023_v56 = vadd.f32 %v5022_v22, %v4992_v7  ;;  %v9733_v49 = vadd.f32 %v4717_v18, %v2688_v11  ;;  %v5425_v53 = vrot.slane %v9615_v32, 5  ;;  %v9746_v18 = vpop.permute.xlu0 %4961 }
 0x23f   : > { %10711 = vst [vmem:[#allocation60_spill] sm:$0xff] %v9727_v9  ;;  %v5420_v58 = vsel %vm5264_vm11, %v9573_v19, %v5419_v41  ;;  %v6636_v48 = vpack.c.bf16 %v4995_v36, %v4995_v36  ;;  %v4996_v0 = vmul.f32 %v9727_v9, %v9696_v1  ;;  %10713 = vst [vmem:[#allocation62_spill] sm:$0xff] %v9746_v18  ;;  %v5453_v63 = vrot.slane %v9484_v35, 4 }
 0x240   : > { %10712 = vst [vmem:[#allocation61_spill] sm:$0xff] %v9733_v49  ;;  %v5422_v62 = vsel %vm5267_vm12, %v5421_v6, %v5420_v58  ;;  %v5024_v29 = vadd.f32 %v5023_v56, %v4993_v23  ;;  %v6635_v51 = vpack.c.bf16 %v4993_v23, %v4993_v23  ;;  %v4994_v7 = vmul.f32 %v9733_v49, %v9655_v57  ;;  %v7112_v1 = vpop.f32.mrb[28].mxu0 }
 0x241   : > { %v5424_v22 = vsel %vm5270_vm13, %v5423_v24, %v5422_v62  ;;  %v9748_v11 = vunpack.c.l.b16 %v6636_v48  ;;  %v6652_v41 = vpack.c.bf16 %v4996_v0, %v4996_v0  ;;  %v5452_v6 = vrot.slane %v9488_v43, 5  ;;  %v4730_v9 = vpop.f32.mrb[29].mxu0 }
 0x242   : > { %v5426_v30 = vsel %vm5273_vm14, %v5425_v53, %v5424_v22  ;;  %v9752_v58 = vunpack.c.l.b16 %v6635_v51  ;;  %v5025_v26 = vadd.f32 %v5024_v29, %v4994_v7  ;;  %v6651_v56 = vpack.c.bf16 %v4994_v7, %v4994_v7  ;;  %v6976_v28 = vpop.f32.mrb[28].mxu1  ;;  %v7113_v48 = vpop.f32.mrb[30].mxu0 }
 0x243   : > { %10714 = vst [vmem:[#allocation63_spill] sm:$0xff] %v9748_v11  ;;  %v5441_v23 = vpack.c.b16 %v5426_v30, %v5426_v30  ;;  %v9754_v57 = vunpack.c.l.b16 %v6652_v41  ;;  %v9756_v24 = vadd.f32 %v7112_v1, %v6976_v28  ;;  %v2701_v62 = vpop.f32.mrb[29].mxu1  ;;  %v5455_v53 = vrot.slane %v9528_v8, 3  ;;  %v4733_v7 = vpop.f32.mrb[31].mxu0 }
 0x244   : > { %10715 = vst [vmem:[#allocation64_spill] sm:$0xff] %v9752_v58  ;;  %v5026_v22 = vadd.f32 %v5025_v26, %v4995_v36  ;;  %v9760_v49 = vunpack.c.l.b16 %v6651_v56  ;;  %v9763_v51 = vadd.f32 %v4730_v9, %v2701_v62  ;;  %v5457_v30 = vrot.slane %v9524_v17, 2  ;;  %v6977_v29 = vpop.f32.mrb[30].mxu1 }
 0x245   : > { %10716 = vst [vmem:[#allocation65_spill] sm:$0xff] %v9754_v57  ;;  %10717 = vst [vmem:[#allocation66_spill] sm:$0xff] %v9756_v24  ;;  %5443 = vrot.lane.b32.xlu0 %v5441_v23, %s7534_s17  ;;  %v4999_v28 = vmul.f32 %v9756_v24, %v9746_v18  ;;  %v5454_v1 = vsel %vm5255_vm8, %v5453_v63, %v5452_v6  ;;  %v5459_v41 = vrot.slane %v9573_v19, 1  ;;  %v5462_v26 = vrot.slane %v9621_v14, 7  ;;  %v2704_v36 = vpop.f32.mrb[31].mxu1  ;;  %v9780_v63 = vpop.permute.xlu1 %4966 }
 0x246   : > { %10718 = vst [vmem:[#allocation67_spill] sm:$0xff] %v9760_v49  ;;  %v4997_v56 = vmul.f32 %v9763_v51, %v9705_v2  ;;  %v5027_v23 = vadd.f32 %v5026_v22, %v4996_v0  ;;  %v5456_v9 = vsel %vm5258_vm9, %v5455_v53, %v5454_v1  ;;  %v5464_v62 = vrot.slane %v9615_v32, 6 }
 0x247   : > { %v6638_v57 = vpack.c.bf16 %v4999_v28, %v4999_v28  ;;  %v5458_v49 = vsel %vm5261_vm10, %v5457_v30, %v5456_v9  ;;  %v9776_v44 = vadd.f32 %v7113_v48, %v6977_v29  ;;  %v9778_v18 = vadd.f32 %v4733_v7, %v2704_v36 }
 0x248   : > { %v5028_v6 = vadd.f32 %v5027_v23, %v4997_v56  ;;  %v6637_v24 = vpack.c.bf16 %v4997_v56, %v4997_v56  ;;  %v5460_v27 = vsel %vm5264_vm11, %v5459_v41, %v5458_v49  ;;  %v5530_v2 = vrot.slane %v9488_v43, 7 }
 0x249   : > { %v9784_v0 = vunpack.c.l.b16 %v6638_v57  ;;  %v5461_v53 = vsel %vm5267_vm12, %v9569_v31, %v5460_v27  ;;  %v5000_v22 = vmul.f32 %v9776_v44, %v9780_v63  ;;  %v4998_v48 = vmul.f32 %v9778_v18, %v9741_v42 }
 0x24a   : > { %v9792_v30 = vunpack.c.l.b16 %v6637_v24  ;;  %v5463_v29 = vsel %vm5270_vm13, %v5462_v26, %v5461_v53  ;;  %v5531_v7 = vrot.slane %v9484_v35, 6  ;;  %v5533_v49 = vrot.slane %v9528_v8, 5  ;;  %v10736_v8 = vld [vmem:[#allocation6_spill] sm:$0xff]  ;;  %v10737_v35 = vld [vmem:[#allocation7_spill] sm:$0xff] }
 0x24b   : > { %v5465_v57 = vsel %vm5273_vm14, %v5464_v62, %v5463_v29  ;;  %v6654_v1 = vpack.c.bf16 %v5000_v22, %v5000_v22  ;;  %v5029_v41 = vadd.f32 %v5028_v6, %v4998_v48  ;;  %v6653_v36 = vpack.c.bf16 %v4998_v48, %v4998_v48 }
 0x24c   : > { %10719 = vst [vmem:[#allocation68_spill] sm:$0xff] %v9792_v30  ;;  %v5480_v27 = vpack.c.b16 %v5465_v57, %v5465_v57  ;;  %v5532_v56 = vsel %vm5255_vm8, %v5531_v7, %v5530_v2  ;;  %v5535_v23 = vrot.slane %v9524_v17, 4  ;;  %v5537_v9 = vrot.slane %v9573_v19, 3 }
 0x24d   : > { %v9801_v24 = vunpack.c.l.b16 %v6654_v1  ;;  %v5030_v43 = vadd.f32 %v5029_v41, %v4999_v28  ;;  %v9803_v26 = vunpack.c.l.b16 %v6653_v36  ;;  %v5534_v53 = vsel %vm5258_vm9, %v5533_v49, %v5532_v56 }
 0x24e   : > { %5482 = vrot.lane.b32.xlu0 %v5480_v27, %s7535_s18  ;;  %v5536_v62 = vsel %vm5261_vm10, %v5535_v23, %v5534_v53  ;;  %v5539_v6 = vrot.slane %v9569_v31, 2  ;;  %v5541_v2 = vrot.slane %v9621_v14, 1  ;;  %v5883_v48 = vrot.slane %v9496_v3, 6 }
 0x24f   : > { %10720 = vst [vmem:[#allocation69_spill] sm:$0xff] %v9801_v24  ;;  %10721 = vst [vmem:[#allocation70_spill] sm:$0xff] %v9803_v26  ;;  %v5031_v29 = vadd.f32 %v5030_v43, %v5000_v22  ;;  %v5538_v7 = vsel %vm5264_vm11, %v5537_v9, %v5536_v62  ;;  %v5884_v28 = vrot.slane %v9490_v45, 5  ;;  %v5886_v57 = vrot.slane %v9538_v47, 4 }
 0x250   : > { %v5540_v49 = vsel %vm5267_vm12, %v5539_v6, %v5538_v7  ;;  %v5888_v1 = vrot.slane %v9531_v59, 3  ;;  %v5890_v41 = vrot.slane %v9587_v52, 2  ;;  %v5892_v36 = vrot.slane %v9578_v34, 1 }
 0x251   : > { %v5032_v27 = vrot.slane %v5031_v29, 4  ;;  %v5542_v56 = vsel %vm5270_vm13, %v5541_v2, %v5540_v49  ;;  %v5885_v23 = vsel %vm5255_vm8, %v5884_v28, %v5883_v48  ;;  %v5895_v43 = vrot.slane %v9624_v12, 7 }
 0x252   : > { %v5543_v22 = vsel %vm5273_vm14, %v9615_v32, %v5542_v56  ;;  %v5887_v9 = vsel %vm5258_vm9, %v5886_v57, %v5885_v23  ;;  %v5649_v53 = vrot.slane %v9490_v45, 7  ;;  %v5651_v62 = vrot.slane %v9538_v47, 6 }
 0x253   : > { %v5033_v6 = vadd.f32 %v5032_v27, %v5031_v29  ;;  %v5558_v7 = vpack.c.b16 %v5543_v22, %v5543_v22  ;;  %v5889_v14 = vsel %vm5261_vm10, %v5888_v1, %v5887_v9  ;;  %v5653_v31 = vrot.slane %v9531_v59, 5 }
 0x254   : > { %v5891_v2 = vsel %vm5264_vm11, %v5890_v41, %v5889_v14  ;;  %v5650_v48 = vsel %vm5255_vm8, %v5649_v53, %v9496_v3  ;;  %v5655_v28 = vrot.slane %v9587_v52, 4  ;;  %v5657_v49 = vrot.slane %v9578_v34, 3 }
 0x255   : > { %v5034_v57 = vrot.slane %v5033_v6, 2  ;;  %5560 = vrot.lane.b32.xlu0 %v5558_v7, %s7536_s19  ;;  %v5893_v29 = vsel %vm5267_vm12, %v5892_v36, %v5891_v2  ;;  %v5652_v1 = vsel %vm5258_vm9, %v5651_v62, %v5650_v48  ;;  %v5659_v27 = vrot.slane %v9629_v38, 2 }
 0x256   : > { %v5894_v14 = vsel %vm5270_vm13, %v9629_v38, %v5893_v29  ;;  %v5654_v41 = vsel %vm5261_vm10, %v5653_v31, %v5652_v1  ;;  %v5661_v56 = vrot.slane %v9624_v12, 1  ;;  %v5505_v23 = vrot.slane %v9666_v25, 6 }
 0x257   : > { %v5035_v22 = vadd.f32 %v5034_v57, %v5033_v6  ;;  %v5896_v9 = vsel %vm5273_vm14, %v5895_v43, %v5894_v14  ;;  %v5656_v53 = vsel %vm5264_vm11, %v5655_v28, %v5654_v41  ;;  %v5506_v36 = vrot.slane %v9661_v39, 5  ;;  %v10745_v39 = vld [vmem:[#allocation2_spill] sm:$0xff] }
 0x258   : > { %v5911_v7 = vpack.c.b16 %v5896_v9, %v5896_v9  ;;  %v5658_v62 = vsel %vm5267_vm12, %v5657_v49, %v5656_v53  ;;  %v5508_v2 = vrot.slane %v9711_v50, 4  ;;  %v5510_v48 = vrot.slane %v9707_v60, 3 }
 0x259   : > { %v5036_v31 = vrot.slane %v5035_v22, 1  ;;  %v5660_v29 = vsel %vm5270_vm13, %v5659_v27, %v5658_v62  ;;  %v5507_v1 = vsel %vm5255_vm8, %v5506_v36, %v5505_v23  ;;  %v5512_v6 = vrot.slane %v9752_v58, 2 }
 0x25a   : > { %5913 = vrot.lane.b32.xlu0 %v5911_v7, %s7537_s21  ;;  %v5662_v43 = vsel %vm5273_vm14, %v5661_v56, %v5660_v29  ;;  %v5509_v28 = vsel %vm5258_vm9, %v5508_v2, %v5507_v1  ;;  %v5514_v49 = vrot.slane %v9748_v11, 1  ;;  %v5688_v27 = vrot.slane %v9496_v3, 1  ;;  %v10743_v11 = vld [vmem:[#allocation5_spill] sm:$0xff] }
 0x25b   : > { %v5037_v14 = vadd.f32 %v5036_v31, %v5035_v22  ;;  %v5677_v41 = vpack.c.b16 %v5662_v43, %v5662_v43  ;;  %v5511_v9 = vsel %vm5261_vm10, %v5510_v48, %v5509_v28  ;;  %v5690_v56 = vrot.slane %v9538_v47, 7  ;;  %v10739_v47 = vld [vmem:[#allocation9_spill] sm:$0xff] }
 0x25c   : > { %v5513_v23 = vsel %vm5264_vm11, %v5512_v6, %v5511_v9  ;;  %v5689_v62 = vsel %vm5255_vm8, %v9490_v45, %v5688_v27  ;;  %v10740_v45 = vld [vmem:[#allocation10_spill] sm:$0xff] }
 0x25d   : > { %v9868_v22 = vmul.f32 0.0051020407, %v5037_v14  ;;  %v5515_v7 = vsel %vm5267_vm12, %v5514_v49, %v5513_v23  ;;  %v9880_v31 = vsel %vm5258_vm9, %v5690_v56, %v5689_v62 }
 0x25e   : > { %5679 = vrot.lane.b32.xlu0 %v5677_v41, %s7538_s25  ;;  %v9877_v48 = vsel %vm5270_vm13, %v9792_v30, %v5515_v7  ;;  %v10742_v30 = vld [vmem:[#allocation4_spill] sm:$0xff] }
 0x25f   : > { %v5039_v6 = vsub.f32 %v9468_v20, %v9868_v22  ;;  %v5040_v43 = vsub.f32 %v9476_v61, %v9868_v22  ;;  %v5041_v28 = vsub.f32 %v9464_v40, %v9868_v22  ;;  %v5042_v49 = vsub.f32 %v9472_v13, %v9868_v22  ;;  %5172 = vst [vmem:[%s9862_s24] sm:$0x1] %v9868_v22 }
 0x260   : > { %v5043_v14 = vsub.f32 %v9498_v54, %v9868_v22  ;;  %v5044_v41 = vsub.f32 %v9509_v37, %v9868_v22  ;;  %v5045_v20 = vsub.f32 %v9492_v5, %v9868_v22  ;;  %v5046_v61 = vsub.f32 %v9503_v55, %v9868_v22  ;;  %v10722_v5 = vld [vmem:[#allocation36_spill] sm:$0xff]  ;;  %v10723_v55 = vld [vmem:[#allocation33_spill] sm:$0xff] }
 0x261   : > { %v5047_v40 = vsub.f32 %v9541_v16, %v9868_v22  ;;  %v5048_v13 = vsub.f32 %v9559_v21, %v9868_v22  ;;  %v5049_v9 = vsub.f32 %v9534_v46, %v9868_v22  ;;  %v5050_v54 = vsub.f32 %v9549_v10, %v9868_v22  ;;  %v10724_v16 = vld [vmem:[#allocation35_spill] sm:$0xff] }
 0x262   : > { %v5051_v37 = vsub.f32 %v9590_v4, %v9868_v22  ;;  %v5052_v27 = vsub.f32 %v10722_v5, %v9868_v22  ;;  %v5053_v23 = vsub.f32 %v10723_v55, %v9868_v22  ;;  %v5054_v56 = vsub.f32 %v10724_v16, %v9868_v22  ;;  %v10725_v10 = vld [vmem:[#allocation43_spill] sm:$0xff]  ;;  %v10726_v4 = vld [vmem:[#allocation44_spill] sm:$0xff]  ;;  %v10728_v55 = vld [vmem:[#allocation53_spill] sm:$0xff] }
 0x263   : > { %v5055_v21 = vsub.f32 %v9635_v33, %v9868_v22  ;;  %v5056_v46 = vsub.f32 %v9646_v15, %v9868_v22  ;;  %v5057_v7 = vsub.f32 %v10725_v10, %v9868_v22  ;;  %v5058_v62 = vsub.f32 %v10726_v4, %v9868_v22  ;;  %v10727_v5 = vld [vmem:[#allocation51_spill] sm:$0xff]  ;;  %v10729_v16 = vld [vmem:[#allocation49_spill] sm:$0xff]  ;;  %v10730_v33 = vld [vmem:[#allocation52_spill] sm:$0xff] }
 0x264   : > { %v5059_v1 = vsub.f32 %v10727_v5, %v9868_v22  ;;  %v5060_v29 = vsub.f32 %v10728_v55, %v9868_v22  ;;  %v5061_v2 = vsub.f32 %v10729_v16, %v9868_v22  ;;  %v5062_v36 = vsub.f32 %v10730_v33, %v9868_v22  ;;  %v10731_v15 = vld [vmem:[#allocation59_spill] sm:$0xff]  ;;  %v10732_v10 = vld [vmem:[#allocation61_spill] sm:$0xff]  ;;  %v10734_v5 = vld [vmem:[#allocation60_spill] sm:$0xff] }
 0x265   : > { %v5063_v53 = vsub.f32 %v10731_v15, %v9868_v22  ;;  %v5064_v57 = vsub.f32 %v10732_v10, %v9868_v22  ;;  %v10733_v4 = vld [vmem:[#allocation57_spill] sm:$0xff]  ;;  %v5066_v17 = vsub.f32 %v10734_v5, %v9868_v22  ;;  %v5067_v55 = vsub.f32 %v9763_v51, %v9868_v22  ;;  %v10735_v33 = vld [vmem:[#allocation66_spill] sm:$0xff]  ;;  %v10741_v51 = vld [vmem:[#allocation11_spill] sm:$0xff] }
 0x266   : > { %v5065_v32 = vsub.f32 %v10733_v4, %v9868_v22  ;;  %v5068_v16 = vsub.f32 %v9778_v18, %v9868_v22  ;;  %v5069_v19 = vsub.f32 %v10735_v33, %v9868_v22  ;;  %v5070_v15 = vsub.f32 %v9776_v44, %v9868_v22  ;;  %v10738_v4 = vld [vmem:[#allocation8_spill] sm:$0xff]  ;;  %v10746_v22 = vld [vmem:[#allocation3_spill] sm:$0xff] }
 0x267   : > { %v5071_v10 = vmul.f32 %v5039_v6, %v10736_v8  ;;  %v5072_v26 = vmul.f32 %v5040_v43, %v10737_v35  ;;  %v5073_v24 = vmul.f32 %v5041_v28, %v10738_v4  ;;  %v5074_v5 = vmul.f32 %v5042_v49, %v10739_v47  ;;  %v10744_v33 = vld [vmem:[#allocation12_spill] sm:$0xff]  ;;  %v10747_v6 = vld [vmem:[#allocation13_spill] sm:$0xff]  ;;  %v10748_v43 = vld [vmem:[#allocation14_spill] sm:$0xff] }
 0x268   : > { %v5075_v3 = vmul.f32 %v5043_v14, %v10740_v45  ;;  %v5076_v12 = vmul.f32 %v5044_v41, %v10741_v51  ;;  %v5077_v18 = vmul.f32 %v5045_v20, %v10742_v30  ;;  %v5078_v38 = vmul.f32 %v5046_v61, %v10743_v11  ;;  %v10749_v4 = vld [vmem:[#allocation15_spill] sm:$0xff]  ;;  %v10750_v49 = vld [vmem:[#allocation16_spill] sm:$0xff]  ;;  %v10751_v14 = vld [vmem:[#allocation17_spill] sm:$0xff] }
 0x269   : > { %v5079_v58 = vmul.f32 %v5047_v40, %v10744_v33  ;;  %v5080_v44 = vmul.f32 %v5048_v13, %v10745_v39  ;;  %v5081_v8 = vmul.f32 %v5049_v9, %v10746_v22  ;;  %v5082_v35 = vmul.f32 %v5050_v54, %v10747_v6  ;;  %v10752_v51 = vld [vmem:[#allocation19_spill] sm:$0xff]  ;;  %v10754_v61 = vld [vmem:[#allocation24_spill] sm:$0xff]  ;;  %v10756_v13 = vld [vmem:[#allocation29_spill] sm:$0xff] }
 0x26a   : > { %v5083_v28 = vmul.f32 %v5051_v37, %v10748_v43  ;;  %v5084_v47 = vmul.f32 %v5052_v27, %v10749_v4  ;;  %v5085_v45 = vmul.f32 %v5053_v23, %v10750_v49  ;;  %v5086_v41 = vmul.f32 %v5054_v56, %v10751_v14  ;;  %v10753_v20 = vld [vmem:[#allocation23_spill] sm:$0xff]  ;;  %v10755_v33 = vld [vmem:[#allocation28_spill] sm:$0xff]  ;;  %v10758_v6 = vld [vmem:[#allocation34_spill] sm:$0xff] }
 0x26b   : > { %v5087_v30 = vmul.f32 %v5055_v21, %v10752_v51  ;;  %v5088_v11 = vmul.f32 %v5056_v46, %v10753_v20  ;;  %v5089_v40 = vmul.f32 %v5057_v7, %v10754_v61  ;;  %v5090_v39 = vmul.f32 %v5058_v62, %v10755_v33  ;;  %v10757_v22 = vld [vmem:[#allocation32_spill] sm:$0xff]  ;;  %v10759_v43 = vld [vmem:[#allocation37_spill] sm:$0xff]  ;;  %v10760_v4 = vld [vmem:[#allocation39_spill] sm:$0xff] }
 0x26c   : > { %v5091_v9 = vmul.f32 %v5059_v1, %v10756_v13  ;;  %v5092_v54 = vmul.f32 %v5060_v29, %v10757_v22  ;;  %v5093_v37 = vmul.f32 %v5061_v2, %v10758_v6  ;;  %v5094_v27 = vmul.f32 %v5062_v36, %v10759_v43  ;;  %v10761_v49 = vld [vmem:[#allocation45_spill] sm:$0xff]  ;;  %v10762_v14 = vld [vmem:[#allocation46_spill] sm:$0xff]  ;;  %v10764_v20 = vld [vmem:[#allocation55_spill] sm:$0xff] }
 0x26d   : > { %v5095_v23 = vmul.f32 %v5063_v53, %v10760_v4  ;;  %v5096_v56 = vmul.f32 %v5064_v57, %v10761_v49  ;;  %v5097_v21 = vmul.f32 %v5065_v32, %v10762_v14  ;;  %v10763_v51 = vld [vmem:[#allocation54_spill] sm:$0xff]  ;;  %v5099_v7 = vmul.f32 %v5067_v55, %v10764_v20  ;;  %v10770_v14 = vld [vmem:[#allocation47_spill] sm:$0xff] }
 0x26e   : > { %v5098_v46 = vmul.f32 %v5066_v17, %v10763_v51  ;;  %v5100_v62 = vmul.f32 %v5068_v16, %v9741_v42  ;;  %v10765_v61 = vld [vmem:[#allocation62_spill] sm:$0xff]  ;;  %v5102_v29 = vmul.f32 %v5070_v15, %v9780_v63  ;;  %v5103_v33 = vmul.f32 %v5071_v10, %v5071_v10 }
 0x26f   : > { %v5101_v1 = vmul.f32 %v5069_v19, %v10765_v61  ;;  %v5104_v2 = vmul.f32 %v5072_v26, %v5072_v26  ;;  %v5105_v13 = vmul.f32 %v5073_v24, %v5073_v24  ;;  %v5106_v36 = vmul.f32 %v5074_v5, %v5074_v5  ;;  %v10774_v61 = vld [vmem:[#allocation63_spill] sm:$0xff] }
 0x270   : > { %v5107_v22 = vmul.f32 %v5075_v3, %v5075_v3  ;;  %v5108_v53 = vmul.f32 %v5076_v12, %v5076_v12  ;;  %v9982_v6 = vmul.f32 %v5077_v18, %v5077_v18  ;;  %v9984_v57 = vmul.f32 %v5078_v38, %v5078_v38 }
 0x271   : > { %v9986_v32 = vmul.f32 %v5079_v58, %v5079_v58  ;;  %v9988_v17 = vmul.f32 %v5080_v44, %v5080_v44  ;;  %v9990_v55 = vmul.f32 %v5081_v8, %v5081_v8  ;;  %v9992_v42 = vmul.f32 %v5082_v35, %v5082_v35 }
 0x272   : > { %v9994_v19 = vmul.f32 %v5083_v28, %v5083_v28  ;;  %v9996_v63 = vmul.f32 %v5084_v47, %v5084_v47  ;;  %v9998_v24 = vmul.f32 %v5085_v45, %v5085_v45  ;;  %v10000_v3 = vmul.f32 %v5086_v41, %v5086_v41 }
 0x273   : > { %v10002_v12 = vmul.f32 %v5087_v30, %v5087_v30  ;;  %v10004_v38 = vmul.f32 %v5088_v11, %v5088_v11  ;;  %v10006_v58 = vmul.f32 %v5089_v40, %v5089_v40  ;;  %v10008_v26 = vmul.f32 %v5090_v39, %v5090_v39 }
 0x274   : > { %v10010_v16 = vmul.f32 %v5091_v9, %v5091_v9  ;;  %v10012_v15 = vmul.f32 %v5092_v54, %v5092_v54  ;;  %v10014_v10 = vmul.f32 %v5093_v37, %v5093_v37  ;;  %v10016_v5 = vmul.f32 %v5094_v27, %v5094_v27 }
 0x275   : > { %v10018_v18 = vmul.f32 %v5095_v23, %v5095_v23  ;;  %v10020_v44 = vmul.f32 %v5096_v56, %v5096_v56  ;;  %v10022_v8 = vmul.f32 %v5097_v21, %v5097_v21  ;;  %v10024_v35 = vmul.f32 %v5098_v46, %v5098_v46  ;;  %v10772_v46 = vld [vmem:[#allocation42_spill] sm:$0xff] }
 0x276   : > { %v10026_v28 = vmul.f32 %v5099_v7, %v5099_v7  ;;  %v10028_v47 = vmul.f32 %v5100_v62, %v5100_v62  ;;  %v10030_v45 = vmul.f32 %v5101_v1, %v5101_v1  ;;  %v10032_v41 = vmul.f32 %v5102_v29, %v5102_v29  ;;  %v10775_v29 = vld [vmem:[#allocation68_spill] sm:$0xff] }
 0x277   : > { %v5135_v30 = vadd.f32 %v5104_v2, %v5103_v33  ;;  %v10766_v11 = vrot.slane %v9784_v0, 7  ;;  %v10767_v39 = vrot.slane %v9531_v59, 6  ;;  %v5310_v54 = vrot.slane %v9666_v25, 1 }
 0x278   : > { %v10768_v43 = vrot.slane %v9587_v52, 5  ;;  %v5312_v4 = vrot.slane %v9711_v50, 7  ;;  %v5314_v23 = vrot.slane %v9707_v60, 6  ;;  %v10769_v56 = vrot.slane %v9578_v34, 4 }
 0x279   : > { %v5518_v40 = vsel %vm5273_vm14, %v10766_v11, %v9877_v48  ;;  %v5693_v9 = vsel %vm5261_vm10, %v10767_v39, %v9880_v31  ;;  %v5136_v49 = vadd.f32 %v5135_v30, %v5105_v13  ;;  %v5311_v21 = vsel %vm5255_vm8, %v10770_v14, %v5310_v54  ;;  %v10771_v31 = vld [vmem:[#allocation64_spill] sm:$0xff]  ;;  %v10776_v13 = vld [vmem:[#allocation41_spill] sm:$0xff] }
 0x27a   : > { %v5520_v37 = vpack.c.b16 %v5518_v40, %v5518_v40  ;;  %v5695_v27 = vsel %vm5264_vm11, %v10768_v43, %v5693_v9  ;;  %v5316_v51 = vrot.slane %v10771_v31, 5  ;;  %v10773_v20 = vrot.slane %v10772_v46, 3 }
 0x27b   : > { %v5697_v48 = vsel %vm5267_vm12, %v10769_v56, %v5695_v27  ;;  %v5313_v62 = vsel %vm5258_vm9, %v5312_v4, %v5311_v21  ;;  %v5318_v1 = vrot.slane %v10774_v61, 4  ;;  %v5320_v33 = vrot.slane %v10775_v29, 3  ;;  %v10779_v27 = vld [vmem:[#allocation21_spill] sm:$0xff] }
 0x27c   : > { %5523 = vrot.lane.b32.xlu1 %v5520_v37, %s7530_s28  ;;  %v5699_v7 = vsel %vm5270_vm13, %v10773_v20, %v5697_v48  ;;  %v5137_v2 = vadd.f32 %v5136_v49, %v5106_v36  ;;  %v10777_v30 = vrot.slane %v10776_v13, 2  ;;  %v5315_v40 = vsel %vm5261_vm10, %v5314_v23, %v5313_v62  ;;  %v10778_v37 = vld [vmem:[#allocation22_spill] sm:$0xff]  ;;  %v10780_v62 = vld [vmem:[#allocation27_spill] sm:$0xff] }
 0x27d   : > { %v5322_v39 = vrot.slane %v9784_v0, 2  ;;  %v5317_v54 = vsel %vm5264_vm11, %v5316_v51, %v5315_v40  ;;  %v5727_v43 = vrot.slane %v10778_v37, 2  ;;  %v5728_v4 = vrot.slane %v10779_v27, 1 }
 0x27e   : > { %v5701_v11 = vsel %vm5273_vm14, %v10777_v30, %v5699_v7  ;;  %v5138_v56 = vadd.f32 %v5137_v2, %v5107_v22  ;;  %v5319_v48 = vsel %vm5267_vm12, %v5318_v1, %v5317_v54  ;;  %v5731_v36 = vrot.slane %v9531_v59, 7 }
 0x27f   : > { %v5716_v9 = vpack.c.b16 %v5701_v11, %v5701_v11  ;;  %v5733_v49 = vrot.slane %v9587_v52, 6  ;;  %v5321_v23 = vsel %vm5270_vm13, %v5320_v33, %v5319_v48  ;;  %v5729_v21 = vsel %vm5255_vm8, %v5728_v4, %v5727_v43 }
 0x280   : > { %v5735_v51 = vrot.slane %v9578_v34, 5  ;;  %v5737_v20 = vrot.slane %v10772_v46, 4  ;;  %v5139_v7 = vadd.f32 %v5138_v56, %v5108_v53  ;;  %v5323_v22 = vsel %vm5273_vm14, %v5322_v39, %v5321_v23 }
 0x281   : > { %5718 = vrot.lane.b32.xlu0 %v5716_v9, %s7539_s26  ;;  %v5730_v1 = vsel %vm5258_vm9, %v10780_v62, %v5729_v21  ;;  %v5739_v2 = vrot.slane %v10776_v13, 3  ;;  %v5325_v30 = vpack.c.b16 %v5323_v22, %v5323_v22  ;;  %v5349_v40 = vrot.slane %v9666_v25, 2 }
 0x282   : > { %v5732_v11 = vsel %vm5261_vm10, %v5731_v36, %v5730_v1  ;;  %v5350_v33 = vrot.slane %v10770_v14, 1  ;;  %v5140_v9 = vadd.f32 %v5139_v7, %v9982_v6  ;;  %v5353_v53 = vrot.slane %v9707_v60, 7 }
 0x283   : > { %v5734_v54 = vsel %vm5264_vm11, %v5733_v49, %v5732_v11  ;;  %v5355_v39 = vrot.slane %v10771_v31, 6  ;;  %5328 = vrot.lane.b32.xlu1 %v5325_v30, %s7531_s12  ;;  %v5357_v56 = vrot.slane %v10774_v61, 5  ;;  %v5359_v48 = vrot.slane %v10775_v29, 4 }
 0x284   : > { %v5736_v43 = vsel %vm5267_vm12, %v5735_v51, %v5734_v54  ;;  %v5351_v4 = vsel %vm5255_vm8, %v5350_v33, %v5349_v40  ;;  %v5141_v36 = vadd.f32 %v5140_v9, %v9984_v57  ;;  %v5361_v23 = vrot.slane %v9784_v0, 3 }
 0x285   : > { %v5738_v6 = vsel %vm5270_vm13, %v5737_v20, %v5736_v43  ;;  %v5352_v49 = vsel %vm5258_vm9, %v9711_v50, %v5351_v4  ;;  %v5766_v51 = vrot.slane %v10778_v37, 3  ;;  %v5767_v22 = vrot.slane %v10779_v27, 2 }
 0x286   : > { %v5740_v21 = vsel %vm5273_vm14, %v5739_v2, %v5738_v6  ;;  %v5354_v7 = vsel %vm5261_vm10, %v5353_v53, %v5352_v49  ;;  %v5142_v1 = vadd.f32 %v5141_v36, %v9986_v32  ;;  %v5769_v20 = vrot.slane %v10780_v62, 1 }
 0x287   : > { %v5755_v30 = vpack.c.b16 %v5740_v21, %v5740_v21  ;;  %v5356_v57 = vsel %vm5264_vm11, %v5355_v39, %v5354_v7  ;;  %v5768_v40 = vsel %vm5255_vm8, %v5767_v22, %v5766_v51  ;;  %v5772_v33 = vrot.slane %v9587_v52, 7 }
 0x288   : > { %v5358_v11 = vsel %vm5267_vm12, %v5357_v56, %v5356_v57  ;;  %v5774_v2 = vrot.slane %v9578_v34, 6  ;;  %v5143_v9 = vadd.f32 %v5142_v1, %v9988_v17  ;;  %v5770_v54 = vsel %vm5258_vm9, %v5769_v20, %v5768_v40 }
 0x289   : > { %5757 = vrot.lane.b32.xlu0 %v5755_v30, %s7540_s27  ;;  %v5360_v32 = vsel %vm5270_vm13, %v5359_v48, %v5358_v11  ;;  %v5776_v53 = vrot.slane %v10772_v46, 5  ;;  %v5771_v43 = vsel %vm5261_vm10, %v9531_v59, %v5770_v54  ;;  %v5778_v4 = vrot.slane %v10776_v13, 4 }
 0x28a   : > { %v5362_v39 = vsel %vm5273_vm14, %v5361_v23, %v5360_v32  ;;  %v5388_v56 = vrot.slane %v9666_v25, 3  ;;  %v5144_v17 = vadd.f32 %v5143_v9, %v9990_v55  ;;  %v5773_v6 = vsel %vm5264_vm11, %v5772_v33, %v5771_v43 }
 0x28b   : > { %v5364_v36 = vpack.c.b16 %v5362_v39, %v5362_v39  ;;  %v5389_v48 = vrot.slane %v10770_v14, 2  ;;  %v5775_v49 = vsel %vm5267_vm12, %v5774_v2, %v5773_v6  ;;  %v5391_v21 = vrot.slane %v9711_v50, 1 }
 0x28c   : > { %v5394_v23 = vrot.slane %v10771_v31, 7  ;;  %v5396_v7 = vrot.slane %v10774_v61, 6  ;;  %v5145_v51 = vadd.f32 %v5144_v17, %v9992_v42  ;;  %v5777_v22 = vsel %vm5270_vm13, %v5776_v53, %v5775_v49 }
 0x28d   : > { %5367 = vrot.lane.b32.xlu1 %v5364_v36, %s7532_s13  ;;  %v5390_v55 = vsel %vm5255_vm8, %v5389_v48, %v5388_v56  ;;  %v5398_v1 = vrot.slane %v10775_v29, 5  ;;  %v5779_v30 = vsel %vm5273_vm14, %v5778_v4, %v5777_v22  ;;  %v5400_v20 = vrot.slane %v9784_v0, 4 }
 0x28e   : > { %v5392_v57 = vsel %vm5258_vm9, %v5391_v21, %v5390_v55  ;;  %v5805_v11 = vrot.slane %v10778_v37, 4  ;;  %v5146_v40 = vadd.f32 %v5145_v51, %v9994_v19  ;;  %v5794_v33 = vpack.c.b16 %v5779_v30, %v5779_v30 }
 0x28f   : > { %v5393_v42 = vsel %vm5261_vm10, %v9707_v60, %v5392_v57  ;;  %v5806_v2 = vrot.slane %v10779_v27, 3  ;;  %v5808_v32 = vrot.slane %v10780_v62, 2  ;;  %v5810_v54 = vrot.slane %v9531_v59, 1 }
 0x290   : > { %v5395_v9 = vsel %vm5264_vm11, %v5394_v23, %v5393_v42  ;;  %v5813_v53 = vrot.slane %v9578_v34, 7  ;;  %v5147_v39 = vadd.f32 %v5146_v40, %v9996_v63  ;;  %5796 = vrot.lane.b32.xlu0 %v5794_v33, %s7541_s29  ;;  %v5815_v4 = vrot.slane %v10772_v46, 6 }
 0x291   : > { %v5397_v19 = vsel %vm5267_vm12, %v5396_v7, %v5395_v9  ;;  %v5807_v43 = vsel %vm5255_vm8, %v5806_v2, %v5805_v11  ;;  %v5817_v36 = vrot.slane %v10776_v13, 5  ;;  %v5427_v6 = vrot.slane %v9666_v25, 4 }
 0x292   : > { %v5399_v56 = vsel %vm5270_vm13, %v5398_v1, %v5397_v19  ;;  %v5809_v17 = vsel %vm5258_vm9, %v5808_v32, %v5807_v43  ;;  %v5148_v48 = vadd.f32 %v5147_v39, %v9998_v24  ;;  %v5428_v21 = vrot.slane %v10770_v14, 3 }
 0x293   : > { %v5401_v63 = vsel %vm5273_vm14, %v5400_v20, %v5399_v56  ;;  %v5811_v49 = vsel %vm5261_vm10, %v5810_v54, %v5809_v17  ;;  %v5430_v51 = vrot.slane %v9711_v50, 2  ;;  %v5432_v22 = vrot.slane %v9707_v60, 1 }
 0x294   : > { %v5403_v23 = vpack.c.b16 %v5401_v63, %v5401_v63  ;;  %v5812_v7 = vsel %vm5264_vm11, %v9587_v52, %v5811_v49  ;;  %v5149_v55 = vadd.f32 %v5148_v48, %v10000_v3  ;;  %v5429_v24 = vsel %vm5255_vm8, %v5428_v21, %v5427_v6 }
 0x295   : > { %v5814_v1 = vsel %vm5267_vm12, %v5813_v53, %v5812_v7  ;;  %v5435_v30 = vrot.slane %v10774_v61, 7  ;;  %v5431_v20 = vsel %vm5258_vm9, %v5430_v51, %v5429_v24  ;;  %v5437_v11 = vrot.slane %v10775_v29, 6 }
 0x296   : > { %5406 = vrot.lane.b32.xlu1 %v5403_v23, %s7533_s14  ;;  %v5816_v57 = vsel %vm5270_vm13, %v5815_v4, %v5814_v1  ;;  %v5439_v40 = vrot.slane %v9784_v0, 5  ;;  %v5150_v33 = vadd.f32 %v5149_v55, %v10002_v12  ;;  %v5433_v42 = vsel %vm5261_vm10, %v5432_v22, %v5431_v20 }
 0x297   : > { %v5818_v3 = vsel %vm5273_vm14, %v5817_v36, %v5816_v57  ;;  %v5844_v2 = vrot.slane %v10778_v37, 5  ;;  %v5434_v32 = vsel %vm5264_vm11, %v10771_v31, %v5433_v42  ;;  %v5845_v54 = vrot.slane %v10779_v27, 4 }
 0x298   : > { %v5833_v9 = vpack.c.b16 %v5818_v3, %v5818_v3  ;;  %v5847_v53 = vrot.slane %v10780_v62, 3  ;;  %v5151_v39 = vadd.f32 %v5150_v33, %v10004_v38  ;;  %v5436_v19 = vsel %vm5267_vm12, %v5435_v30, %v5434_v32 }
 0x299   : > { %v5849_v12 = vrot.slane %v9531_v59, 2  ;;  %v5851_v43 = vrot.slane %v9587_v52, 1  ;;  %v5438_v4 = vsel %vm5270_vm13, %v5437_v11, %v5436_v19  ;;  %v5846_v56 = vsel %vm5255_vm8, %v5845_v54, %v5844_v2 }
 0x29a   : > { %5835 = vrot.lane.b32.xlu0 %v5833_v9, %s7542_s30  ;;  %v5854_v17 = vrot.slane %v10772_v46, 7  ;;  %v5856_v36 = vrot.slane %v10776_v13, 6  ;;  %v5152_v6 = vadd.f32 %v5151_v39, %v10006_v58  ;;  %v5440_v38 = vsel %vm5273_vm14, %v5439_v40, %v5438_v4 }
 0x29b   : > { %v5848_v48 = vsel %vm5258_vm9, %v5847_v53, %v5846_v56  ;;  %v5466_v63 = vrot.slane %v9666_v25, 5  ;;  %v5442_v49 = vpack.c.b16 %v5440_v38, %v5440_v38  ;;  %v5467_v23 = vrot.slane %v10770_v14, 4 }
 0x29c   : > { %v5850_v21 = vsel %vm5261_vm10, %v5849_v12, %v5848_v48  ;;  %v5469_v7 = vrot.slane %v9711_v50, 3  ;;  %v5153_v51 = vadd.f32 %v5152_v6, %v10008_v26  ;;  %v5471_v55 = vrot.slane %v9707_v60, 2 }
 0x29d   : > { %v5852_v22 = vsel %vm5264_vm11, %v5851_v43, %v5850_v21  ;;  %v5473_v58 = vrot.slane %v10771_v31, 1  ;;  %5445 = vrot.lane.b32.xlu1 %v5442_v49, %s7534_s17  ;;  %v5468_v24 = vsel %vm5255_vm8, %v5467_v23, %v5466_v63  ;;  %v5476_v30 = vrot.slane %v10775_v29, 7 }
 0x29e   : > { %v5853_v1 = vsel %vm5267_vm12, %v9578_v34, %v5852_v22  ;;  %v5478_v57 = vrot.slane %v9784_v0, 6  ;;  %v5154_v20 = vadd.f32 %v5153_v51, %v10010_v16  ;;  %v5470_v11 = vsel %vm5258_vm9, %v5469_v7, %v5468_v24  ;;  %v10781_v51 = vld [vmem:[#allocation50_spill] sm:$0xff] }
 0x29f   : > { %v5855_v26 = vsel %vm5270_vm13, %v5854_v17, %v5853_v1  ;;  %v5922_v40 = vrot.slane %v10778_v37, 7  ;;  %v5472_v3 = vsel %vm5261_vm10, %v5471_v55, %v5470_v11  ;;  %v5923_v42 = vrot.slane %v10779_v27, 6  ;;  %v10782_v1 = vld [vmem:[#allocation48_spill] sm:$0xff] }
 0x2a0   : > { %v5857_v33 = vsel %vm5273_vm14, %v5856_v36, %v5855_v26  ;;  %v5925_v2 = vrot.slane %v10780_v62, 5  ;;  %v5155_v9 = vadd.f32 %v5154_v20, %v10012_v15  ;;  %v5474_v54 = vsel %vm5264_vm11, %v5473_v58, %v5472_v3  ;;  %v10783_v20 = vld [vmem:[#allocation58_spill] sm:$0xff] }
 0x2a1   : > { %v5872_v32 = vpack.c.b16 %v5857_v33, %v5857_v33  ;;  %v5927_v16 = vrot.slane %v9531_v59, 4  ;;  %v5475_v53 = vsel %vm5267_vm12, %v10774_v61, %v5474_v54  ;;  %v5924_v37 = vsel %vm5255_vm8, %v5923_v42, %v5922_v40  ;;  %v10785_v40 = vld [vmem:[#allocation67_spill] sm:$0xff] }
 0x2a2   : > { %v5929_v39 = vrot.slane %v9587_v52, 3  ;;  %v5931_v19 = vrot.slane %v9578_v34, 2  ;;  %v5156_v27 = vadd.f32 %v5155_v9, %v10014_v10  ;;  %v5477_v15 = vsel %vm5270_vm13, %v5476_v30, %v5475_v53  ;;  %v10248_v30 = vpop.permute.xlu0 %5521 }
 0x2a3   : > { %5874 = vrot.lane.b32.xlu0 %v5872_v32, %s7543_s5  ;;  %v5926_v62 = vsel %vm5258_vm9, %v5925_v2, %v5924_v37  ;;  %v5933_v59 = vrot.slane %v10772_v46, 1  ;;  %v5479_v12 = vsel %vm5273_vm14, %v5478_v57, %v5477_v15  ;;  %v5544_v4 = vrot.slane %v9666_v25, 7  ;;  %v10786_v2 = vld [vmem:[#allocation65_spill] sm:$0xff] }
 0x2a4   : > { %v5928_v43 = vsel %vm5261_vm10, %v5927_v16, %v5926_v62  ;;  %v5545_v52 = vrot.slane %v10770_v14, 6  ;;  %v5157_v34 = vadd.f32 %v5156_v27, %v10016_v5  ;;  %v5481_v10 = vpack.c.b16 %v5479_v12, %v5479_v12  ;;  %v10787_v16 = vld [vmem:[#allocation69_spill] sm:$0xff] }
 0x2a5   : > { %v5930_v56 = vsel %vm5264_vm11, %v5929_v39, %v5928_v43  ;;  %v5547_v17 = vrot.slane %v9711_v50, 5  ;;  %v5549_v46 = vrot.slane %v9707_v60, 4  ;;  %v5551_v38 = vrot.slane %v10771_v31, 3 }
 0x2a6   : > { %v5932_v36 = vsel %vm5267_vm12, %v5931_v19, %v5930_v56  ;;  %v5546_v6 = vsel %vm5255_vm8, %v5545_v52, %v5544_v4  ;;  %v5158_v48 = vadd.f32 %v5157_v34, %v10018_v18  ;;  %5484 = vrot.lane.b32.xlu1 %v5481_v10, %s7535_s18  ;;  %v5553_v49 = vrot.slane %v10774_v61, 2  ;;  %v10277_v34 = vpop.permute.xlu0 %5326  ;;  %v10788_v10 = vld [vmem:[#allocation70_spill] sm:$0xff] }
 0x2a7   : > { %v5934_v63 = vsel %vm5270_vm13, %v5933_v59, %v5932_v36  ;;  %v5548_v5 = vsel %vm5258_vm9, %v5547_v17, %v5546_v6  ;;  %v5555_v7 = vrot.slane %v10775_v29, 1  ;;  %v5897_v22 = vrot.slane %v10781_v51, 6 }
 0x2a8   : > { %v5935_v21 = vsel %vm5273_vm14, %v10776_v13, %v5934_v63  ;;  %v5550_v23 = vsel %vm5261_vm10, %v5549_v46, %v5548_v5  ;;  %v5159_v55 = vadd.f32 %v5158_v48, %v10020_v44  ;;  %v5898_v24 = vrot.slane %v10782_v1, 5  ;;  %v10784_v13 = vld [vmem:[#allocation56_spill] sm:$0xff] }
 0x2a9   : > { %v5950_v18 = vpack.c.b16 %v5935_v21, %v5935_v21  ;;  %v5552_v58 = vsel %vm5264_vm11, %v5551_v38, %v5550_v23  ;;  %v5900_v26 = vrot.slane %v10783_v20, 4  ;;  %v5902_v11 = vrot.slane %v10784_v13, 3 }
 0x2aa   : > { %v5554_v57 = vsel %vm5267_vm12, %v5553_v49, %v5552_v58  ;;  %v5904_v33 = vrot.slane %v10785_v40, 2  ;;  %v5160_v3 = vadd.f32 %v5159_v55, %v10022_v8  ;;  %v5899_v42 = vsel %vm5255_vm8, %v5898_v24, %v5897_v22 }
 0x2ab   : > { %5952 = vrot.lane.b32.xlu0 %v5950_v18, %s7544_s6  ;;  %v5556_v44 = vsel %vm5270_vm13, %v5555_v7, %v5554_v57  ;;  %v5906_v9 = vrot.slane %v10786_v2, 1  ;;  %v5901_v54 = vsel %vm5258_vm9, %v5900_v26, %v5899_v42  ;;  %v5909_v53 = vrot.slane %v10787_v16, 7 }
 0x2ac   : > { %v5557_v32 = vsel %vm5273_vm14, %v9784_v0, %v5556_v44  ;;  %v5663_v37 = vrot.slane %v10782_v1, 7  ;;  %v5161_v8 = vadd.f32 %v5160_v3, %v10024_v35  ;;  %v5903_v19 = vsel %vm5261_vm10, %v5902_v11, %v5901_v54  ;;  %v10303_v11 = vpop.permute.xlu0 %5365 }
 0x2ad   : > { %v5559_v39 = vpack.c.b16 %v5557_v32, %v5557_v32  ;;  %v5665_v27 = vrot.slane %v10783_v20, 6  ;;  %v5905_v15 = vsel %vm5264_vm11, %v5904_v33, %v5903_v19  ;;  %v5667_v59 = vrot.slane %v10784_v13, 5 }
 0x2ae   : > { %v5664_v62 = vsel %vm5255_vm8, %v5663_v37, %v10781_v51  ;;  %v5669_v12 = vrot.slane %v10785_v40, 4  ;;  %v5162_v43 = vadd.f32 %v5161_v8, %v10026_v28  ;;  %v5907_v35 = vsel %vm5267_vm12, %v5906_v9, %v5905_v15 }
 0x2af   : > { %5562 = vrot.lane.b32.xlu1 %v5559_v39, %s7536_s19  ;;  %v5666_v4 = vsel %vm5258_vm9, %v5665_v27, %v5664_v62  ;;  %v5671_v52 = vrot.slane %v10786_v2, 3  ;;  %v5908_v56 = vsel %vm5270_vm13, %v10788_v10, %v5907_v35  ;;  %v5673_v36 = vrot.slane %v10788_v10, 2 }
 0x2b0   : > { %v5668_v17 = vsel %vm5261_vm10, %v5667_v59, %v5666_v4  ;;  %v5675_v6 = vrot.slane %v10787_v16, 1  ;;  %v5163_v28 = vadd.f32 %v5162_v43, %v10028_v47  ;;  %v5910_v46 = vsel %vm5273_vm14, %v5909_v53, %v5908_v56 }
 0x2b1   : > { %v5670_v38 = vsel %vm5264_vm11, %v5669_v12, %v5668_v17  ;;  %v5702_v48 = vrot.slane %v10781_v51, 1  ;;  %v5912_v63 = vpack.c.b16 %v5910_v46, %v5910_v46  ;;  %v5704_v49 = vrot.slane %v10783_v20, 7 }
 0x2b2   : > { %v5672_v5 = vsel %vm5267_vm12, %v5671_v52, %v5670_v38  ;;  %v5706_v21 = vrot.slane %v10784_v13, 6  ;;  %v5164_v23 = vadd.f32 %v5163_v28, %v10030_v45  ;;  %v5708_v22 = vrot.slane %v10785_v40, 5 }
 0x2b3   : > { %v5674_v7 = vsel %vm5270_vm13, %v5673_v36, %v5672_v5  ;;  %v5703_v47 = vsel %vm5255_vm8, %v10782_v1, %v5702_v48  ;;  %5915 = vrot.lane.b32.xlu1 %v5912_v63, %s7537_s21  ;;  %v5712_v58 = vrot.slane %v10788_v10, 3  ;;  %v5710_v26 = vrot.slane %v10786_v2, 4  ;;  %v10327_v36 = vpop.permute.xlu0 %5404 }
 0x2b4   : > { %v5676_v55 = vsel %vm5273_vm14, %v5675_v6, %v5674_v7  ;;  %v5705_v18 = vsel %vm5258_vm9, %v5704_v49, %v5703_v47  ;;  %v5165_v24 = vadd.f32 %v5164_v23, %v10032_v41  ;;  %v5741_v3 = vrot.slane %v10781_v51, 2 }
 0x2b5   : > { %v5678_v57 = vpack.c.b16 %v5676_v55, %v5676_v55  ;;  %v5707_v45 = vsel %vm5261_vm10, %v5706_v21, %v5705_v18  ;;  %v5742_v44 = vrot.slane %v10782_v1, 1  ;;  %v5745_v42 = vrot.slane %v10784_v13, 7 }
 0x2b6   : > { %v5709_v33 = vsel %vm5264_vm11, %v5708_v22, %v5707_v45  ;;  %v5166_v9 = vrot.slane %v5165_v24, 4  ;;  %v5714_v41 = vrot.slane %v10787_v16, 2  ;;  %v5747_v54 = vrot.slane %v10785_v40, 6 }
 0x2b7   : > { %v5711_v32 = vsel %vm5267_vm12, %v5710_v26, %v5709_v33  ;;  %5681 = vrot.lane.b32.xlu1 %v5678_v57, %s7538_s25  ;;  %v5743_v37 = vsel %vm5255_vm8, %v5742_v44, %v5741_v3  ;;  %v5749_v8 = vrot.slane %v10786_v2, 5  ;;  %v5751_v39 = vrot.slane %v10788_v10, 4 }
 0x2b8   : > { %v5713_v53 = vsel %vm5270_vm13, %v5712_v58, %v5711_v32  ;;  %v5167_v19 = vadd.f32 %v5166_v9, %v5165_v24  ;;  %v5744_v15 = vsel %vm5258_vm9, %v10783_v20, %v5743_v37  ;;  %v5780_v62 = vrot.slane %v10781_v51, 3  ;;  %v10352_v9 = vpop.permute.xlu0 %5443 }
 0x2b9   : > { %v5715_v27 = vsel %vm5273_vm14, %v5714_v41, %v5713_v53  ;;  %v5746_v12 = vsel %vm5261_vm10, %v5745_v42, %v5744_v15  ;;  %v5781_v43 = vrot.slane %v10782_v1, 2  ;;  %v5783_v35 = vrot.slane %v10783_v20, 1 }
 0x2ba   : > { %v5717_v59 = vpack.c.b16 %v5715_v27, %v5715_v27  ;;  %v5168_v4 = vrot.slane %v5167_v19, 2  ;;  %v5748_v52 = vsel %vm5264_vm11, %v5747_v54, %v5746_v12  ;;  %v5753_v56 = vrot.slane %v10787_v16, 3 }
 0x2bb   : > { %v5786_v17 = vrot.slane %v10785_v40, 7  ;;  %v5750_v6 = vsel %vm5267_vm12, %v5749_v8, %v5748_v52  ;;  %v5782_v28 = vsel %vm5255_vm8, %v5781_v43, %v5780_v62  ;;  %v5788_v46 = vrot.slane %v10786_v2, 6 }
 0x2bc   : > { %5720 = vrot.lane.b32.xlu1 %v5717_v59, %s7539_s26  ;;  %v5790_v38 = vrot.slane %v10788_v10, 5  ;;  %v5169_v48 = vadd.f32 %v5168_v4, %v5167_v19  ;;  %v5752_v63 = vsel %vm5270_vm13, %v5751_v39, %v5750_v6  ;;  %v5784_v5 = vsel %vm5258_vm9, %v5783_v35, %v5782_v28 }
 0x2bd   : > { %v5819_v49 = vrot.slane %v10781_v51, 4  ;;  %v5754_v21 = vsel %vm5273_vm14, %v5753_v56, %v5752_v63  ;;  %v5785_v23 = vsel %vm5261_vm10, %v10784_v13, %v5784_v5  ;;  %v5820_v7 = vrot.slane %v10782_v1, 3 }
 0x2be   : > { %v5822_v47 = vrot.slane %v10783_v20, 2  ;;  %v5170_v22 = vrot.slane %v5169_v48, 1  ;;  %v5756_v55 = vpack.c.b16 %v5754_v21, %v5754_v21  ;;  %v5787_v18 = vsel %vm5264_vm11, %v5786_v17, %v5785_v23  ;;  %v10789_v23 = vld [vmem:[#allocation18_spill] sm:$0xff] }
 0x2bf   : > { %v5792_v58 = vrot.slane %v10787_v16, 4  ;;  %v5789_v24 = vsel %vm5267_vm12, %v5788_v46, %v5787_v18  ;;  %v5821_v57 = vsel %vm5255_vm8, %v5820_v7, %v5819_v49  ;;  %v5824_v45 = vrot.slane %v10784_v13, 1 }
 0x2c0   : > { %v5827_v26 = vrot.slane %v10786_v2, 7  ;;  %v5171_v33 = vadd.f32 %v5170_v22, %v5169_v48  ;;  %5759 = vrot.lane.b32.xlu1 %v5756_v55, %s7540_s27  ;;  %v5791_v3 = vsel %vm5270_vm13, %v5790_v38, %v5789_v24  ;;  %v5823_v44 = vsel %vm5258_vm9, %v5822_v47, %v5821_v57  ;;  %v10379_v63 = vpop.permute.xlu0 %5482  ;;  %v10792_v57 = vld [vmem:[#allocation20_spill] sm:$0xff] }
 0x2c1   : > { %v5829_v42 = vrot.slane %v10788_v10, 6  ;;  %v5793_v32 = vsel %vm5273_vm14, %v5792_v58, %v5791_v3  ;;  %v5825_v41 = vsel %vm5261_vm10, %v5824_v45, %v5823_v44  ;;  %v5858_v54 = vrot.slane %v10781_v51, 5 }
 0x2c2   : > { %v5859_v53 = vrot.slane %v10782_v1, 4  ;;  %5173 = vst [vmem:[%s9862_s24 + $0x1] sm:$0x1] %v5171_v33  ;;  %v5795_v37 = vpack.c.b16 %v5793_v32, %v5793_v32  ;;  %v5826_v8 = vsel %vm5264_vm11, %v10785_v40, %v5825_v41  ;;  %v5831_v39 = vrot.slane %v10787_v16, 5  ;;  %v10794_v32 = vld [vmem:[#allocation30_spill] sm:$0xff] }
 0x2c3   : > { %v5861_v19 = vrot.slane %v10783_v20, 3  ;;  %v5828_v27 = vsel %vm5267_vm12, %v5827_v26, %v5826_v8  ;;  %v5863_v62 = vrot.slane %v10784_v13, 2  ;;  %v5865_v59 = vrot.slane %v10785_v40, 1  ;;  %v10793_v26 = vld [vmem:[#allocation25_spill] sm:$0xff] }
 0x2c4   : > { %v5860_v15 = vsel %vm5255_vm8, %v5859_v53, %v5858_v54  ;;  %5798 = vrot.lane.b32.xlu1 %v5795_v37, %s7541_s29  ;;  %v5830_v12 = vsel %vm5270_vm13, %v5829_v42, %v5828_v27  ;;  %v5868_v35 = vrot.slane %v10788_v10, 7  ;;  %v5936_v4 = vrot.slane %v10781_v51, 7  ;;  %v10795_v54 = vld [vmem:[#allocation40_spill] sm:$0xff] }
 0x2c5   : > { %v5862_v43 = vsel %vm5258_vm9, %v5861_v19, %v5860_v15  ;;  %v5832_v52 = vsel %vm5273_vm14, %v5831_v39, %v5830_v12  ;;  %v5937_v17 = vrot.slane %v10782_v1, 6  ;;  %v5939_v6 = vrot.slane %v10783_v20, 5  ;;  %v10796_v15 = vld [vmem:[#allocation38_spill] sm:$0xff] }
 0x2c6   : > { %v5864_v56 = vsel %vm5261_vm10, %v5863_v62, %v5862_v43  ;;  %v5834_v28 = vpack.c.b16 %v5832_v52, %v5832_v52  ;;  %v5870_v38 = vrot.slane %v10787_v16, 6  ;;  %v5943_v48 = vrot.slane %v10785_v40, 3  ;;  %v10790_v40 = vld [vmem:[#allocation26_spill] sm:$0xff] }
 0x2c7   : > { %v5866_v46 = vsel %vm5264_vm11, %v5865_v59, %v5864_v56  ;;  %v5938_v5 = vsel %vm5255_vm8, %v5937_v17, %v5936_v4  ;;  %v5941_v49 = vrot.slane %v10784_v13, 4  ;;  %v5947_v1 = vrot.slane %v10788_v10, 1  ;;  %v10791_v13 = vld [vmem:[#allocation31_spill] sm:$0xff]  ;;  %v5561_v37 = vpop.permute.xlu0 %5560 }
 0x2c8   : > { %v5867_v51 = vsel %vm5267_vm12, %v10786_v2, %v5866_v46  ;;  %5837 = vrot.lane.b32.xlu1 %v5834_v28, %s7542_s30  ;;  %v5940_v21 = vsel %vm5258_vm9, %v5939_v6, %v5938_v5  ;;  %v5254_v7 = vrot.slane %v10789_v23, 7  ;;  %v5257_v47 = vrot.slane %v10790_v40, 6 }
 0x2c9   : > { %v5869_v20 = vsel %vm5270_vm13, %v5868_v35, %v5867_v51  ;;  %v5942_v55 = vsel %vm5261_vm10, %v5941_v49, %v5940_v21  ;;  %v5945_v18 = vrot.slane %v10786_v2, 2  ;;  %v5263_v58 = vrot.slane %v10791_v13, 4 }
 0x2ca   : > { %v5871_v22 = vsel %vm5273_vm14, %v5870_v38, %v5869_v20  ;;  %v5944_v24 = vsel %vm5264_vm11, %v5943_v48, %v5942_v55  ;;  %v5256_v45 = vsel %vm5255_vm8, %v5254_v7, %v10792_v57  ;;  %v5260_v33 = vrot.slane %v10793_v26, 5 }
 0x2cb   : > { %v5873_v10 = vpack.c.b16 %v5871_v22, %v5871_v22  ;;  %v5946_v3 = vsel %vm5267_vm12, %v5945_v18, %v5944_v24  ;;  %v5259_v44 = vsel %vm5258_vm9, %v5257_v47, %v5256_v45  ;;  %v5266_v41 = vrot.slane %v10794_v32, 3 }
 0x2cc   : > { %v5948_v42 = vsel %vm5270_vm13, %v5947_v1, %v5946_v3  ;;  %v5262_v2 = vsel %vm5261_vm10, %v5260_v33, %v5259_v44  ;;  %v5269_v53 = vrot.slane %v10795_v54, 2  ;;  %v5272_v62 = vrot.slane %v10796_v15, 1  ;;  %v5914_v52 = vpop.permute.xlu0 %5913 }
 0x2cd   : > { %5876 = vrot.lane.b32.xlu1 %v5873_v10, %s7543_s5  ;;  %v5949_v8 = vsel %vm5273_vm14, %v10787_v16, %v5948_v42  ;;  %v5265_v39 = vsel %vm5264_vm11, %v5263_v58, %v5262_v2  ;;  %v5275_v12 = vrot.slane %v10770_v14, 7  ;;  %v5277_v43 = vrot.slane %v9711_v50, 6 }
 0x2ce   : > { %v5951_v19 = vpack.c.b16 %v5949_v8, %v5949_v8  ;;  %v5268_v27 = vsel %vm5267_vm12, %v5266_v41, %v5265_v39  ;;  %v5281_v4 = vrot.slane %v10771_v31, 4  ;;  %v5279_v17 = vrot.slane %v9707_v60, 5 }
 0x2cf   : > { %v5271_v59 = vsel %vm5270_vm13, %v5269_v53, %v5268_v27  ;;  %v5276_v56 = vsel %vm5255_vm8, %v5275_v12, %v9666_v25  ;;  %v5285_v50 = vrot.slane %v10775_v29, 2  ;;  %v5283_v25 = vrot.slane %v10774_v61, 3 }
 0x2d0   : > { %v5274_v16 = vsel %vm5273_vm14, %v5272_v62, %v5271_v59  ;;  %v5278_v14 = vsel %vm5258_vm9, %v5277_v43, %v5276_v56  ;;  %vm5724_vm8 = vcmask 650816   ;;  %vm5763_vm9 = vcmask 716416  }
 0x2d1   : > { %5954 = vrot.lane.b32.xlu1 %v5951_v19, %s7544_s6  ;;  %v5289_v35 = vpack.c.b16 %v5274_v16, %v5274_v16  ;;  %v5280_v31 = vsel %vm5261_vm10, %v5279_v17, %v5278_v14  ;;  %vm5802_vm10 = vcmask 782016  }
 0x2d2   : > { %v5282_v60 = vsel %vm5264_vm11, %v5281_v4, %v5280_v31  ;;  %vm5841_vm11 = vcmask 847616  }
 0x2d3   : > { %5294 = vst.msk [vmem:[%s10417_s10] sm:$0xf] %vm5293_vm15, %v5289_v35  ;;  %v5284_v29 = vsel %vm5267_vm12, %v5283_v25, %v5282_v60  ;;  %vm5880_vm12 = vcmask 913216  }
 0x2d4   : > { %5333 = vst.msk [vmem:[%s10417_s10] sm:$0xf] %vm5332_vm0, %v10277_v34  ;;  %v5287_v34 = vrot.slane %v9784_v0, 1  ;;  %v5286_v61 = vsel %vm5270_vm13, %v5285_v50, %v5284_v29  ;;  %vm5919_vm13 = vcmask 978816  }
 0x2d5   : > { %5372 = vst.msk [vmem:[%s10417_s10] sm:$0xf] %vm5371_vm1, %v10303_v11  ;;  %v5680_v11 = vpop.permute.xlu0 %5679 }
 0x2d6   : > { %5411 = vst.msk [vmem:[%s10417_s10] sm:$0xf] %vm5410_vm2, %v10327_v36  ;;  %v5288_v36 = vsel %vm5273_vm14, %v5287_v34, %v5286_v61  ;;  %vm5958_vm14 = vcmask 1044416  }
 0x2d7   : > { %5450 = vst.msk [vmem:[%s10417_s10] sm:$0xf] %vm5449_vm3, %v10352_v9  ;;  %v5290_v0 = vpack.c.b16 %v5288_v36, %v5288_v36 }
 0x2d8   : > { %5489 = vst.msk [vmem:[%s10417_s10] sm:$0xf] %vm5488_vm4, %v10379_v63 }
 0x2d9   : > { %5528 = vst.msk [vmem:[%s10417_s10] sm:$0xf] %vm5527_vm5, %v10248_v30 }
 0x2da   : > { %5567 = vst.msk [vmem:[%s10417_s10] sm:$0xf] %vm5566_vm6, %v5561_v37 }
 0x2db   : > { %5686 = vst.msk [vmem:[%s10417_s10] sm:$0xf] %vm5685_vm7, %v5680_v11 }
 0x2dc   : > { %5295 = vst.msk [vmem:[%s10417_s10 + $0x4] sm:$0xf] %vm5293_vm15, %v5290_v0 }
 0x2ee   : > { %v5524_v9 = vpop.permute.xlu1 %5523 }
 0x2f3   : > { %v5719_v6 = vpop.permute.xlu0 %5718 }
 0x2f4   : > { %5725 = vst.msk [vmem:[%s10417_s10] sm:$0xf] %vm5724_vm8, %v5719_v6 }
 0x2f5   : > { %v5329_v28 = vpop.permute.xlu1 %5328 }
 0x2f6   : > { %5334 = vst.msk [vmem:[%s10417_s10 + $0x4] sm:$0xf] %vm5332_vm0, %v5329_v28 }
 0x2fb   : > { %v5758_v30 = vpop.permute.xlu0 %5757 }
 0x2fc   : > { %5764 = vst.msk [vmem:[%s10417_s10] sm:$0xf] %vm5763_vm9, %v5758_v30 }
 0x2ff   : > { %v5368_v46 = vpop.permute.xlu1 %5367 }
 0x300   : > { %5373 = vst.msk [vmem:[%s10417_s10 + $0x4] sm:$0xf] %vm5371_vm1, %v5368_v46 }
 0x302   : > { %v5797_v38 = vpop.permute.xlu0 %5796 }
 0x303   : > { %5803 = vst.msk [vmem:[%s10417_s10] sm:$0xf] %vm5802_vm10, %v5797_v38 }
 0x308   : > { %v5407_v48 = vpop.permute.xlu1 %5406 }
 0x309   : > { %5412 = vst.msk [vmem:[%s10417_s10 + $0x4] sm:$0xf] %vm5410_vm2, %v5407_v48 }
 0x30c   : > { %v5836_v63 = vpop.permute.xlu0 %5835 }
 0x30d   : > { %5842 = vst.msk [vmem:[%s10417_s10] sm:$0xf] %vm5841_vm11, %v5836_v63 }
 0x30f   : > { %v5446_v51 = vpop.permute.xlu1 %5445 }
 0x310   : > { %5451 = vst.msk [vmem:[%s10417_s10 + $0x4] sm:$0xf] %vm5449_vm3, %v5446_v51 }
 0x315   : > { %v5875_v5 = vpop.permute.xlu0 %5874 }
 0x316   : > { %5881 = vst.msk [vmem:[%s10417_s10] sm:$0xf] %vm5880_vm12, %v5875_v5 }
 0x317   : > { %5920 = vst.msk [vmem:[%s10417_s10] sm:$0xf] %vm5919_vm13, %v5914_v52 }
 0x318   : > { %v5485_v49 = vpop.permute.xlu1 %5484 }
 0x319   : > { %5490 = vst.msk [vmem:[%s10417_s10 + $0x4] sm:$0xf] %vm5488_vm4, %v5485_v49 }
 0x31a   : > { %5529 = vst.msk [vmem:[%s10417_s10 + $0x4] sm:$0xf] %vm5527_vm5, %v5524_v9 }
 0x31d   : > { %v5953_v1 = vpop.permute.xlu0 %5952 }
 0x31e   : > { %5959 = vst.msk [vmem:[%s10417_s10] sm:$0xf] %vm5958_vm14, %v5953_v1 }
 0x321   : > { %v5563_v20 = vpop.permute.xlu1 %5562 }
 0x322   : > { %5568 = vst.msk [vmem:[%s10417_s10 + $0x4] sm:$0xf] %vm5566_vm6, %v5563_v20 }
 0x325   : > { %v5916_v21 = vpop.permute.xlu1 %5915 }
 0x329   : > { %v5682_v23 = vpop.permute.xlu1 %5681 }
 0x32a   : > { %5687 = vst.msk [vmem:[%s10417_s10 + $0x4] sm:$0xf] %vm5685_vm7, %v5682_v23 }
 0x32e   : > { %v5721_v7 = vpop.permute.xlu1 %5720 }
 0x32f   : > { %5726 = vst.msk [vmem:[%s10417_s10 + $0x4] sm:$0xf] %vm5724_vm8, %v5721_v7 }
 0x332   : > { %v5760_v40 = vpop.permute.xlu1 %5759 }
 0x333   : > { %5765 = vst.msk [vmem:[%s10417_s10 + $0x4] sm:$0xf] %vm5763_vm9, %v5760_v40 }
 0x336   : > { %v5799_v47 = vpop.permute.xlu1 %5798 }
 0x337   : > { %5804 = vst.msk [vmem:[%s10417_s10 + $0x4] sm:$0xf] %vm5802_vm10, %v5799_v47 }
 0x33a   : > { %v5838_v22 = vpop.permute.xlu1 %5837 }
 0x33b   : > { %5843 = vst.msk [vmem:[%s10417_s10 + $0x4] sm:$0xf] %vm5841_vm11, %v5838_v22 }
 0x33f   : > { %v5877_v55 = vpop.permute.xlu1 %5876 }
 0x340   : > { %5882 = vst.msk [vmem:[%s10417_s10 + $0x4] sm:$0xf] %vm5880_vm12, %v5877_v55 }
 0x341   : > { %5921 = vst.msk [vmem:[%s10417_s10 + $0x4] sm:$0xf] %vm5919_vm13, %v5916_v21 }
 0x343   : > { %v5955_v18 = vpop.permute.xlu1 %5954 }
 0x344   : > { %5960 = vst.msk [vmem:[%s10417_s10 + $0x4] sm:$0xf] %vm5958_vm14, %v5955_v18 }
 0x345 PF: > { %s15_s15 = sadd.s32 1, %s7527_s15  }
 0x346   : > { %p12_p4 = scmp.ge.s32.totalorder %s15_s15, 4  }
 0x348   :  { %14 = sbr.rel (!%p12_p4) target bundleno = 1 (0x1), region = 76 }

</bundles_post_ra>
